<compile_context>
chip_gen: v5e
topology: v5e:2x2
jax: 0.10.0
libtpu: 0.0.40
codegen_flags: <defaults>
</compile_context>

<pallas_src>
import jax
import jax.numpy as jnp
from jax.experimental import pallas as pl
from jax.experimental.pallas import tpu as pltpu

D_IN = 32 * 32 * 3      # 3072
D_H1 = 512
D_H2 = 64
LANE = 128
TB_MAX = 512            # max batch-tile rows: x tile <= 6 MiB f32, fits every chip's VMEM


def _round_up(n, m):
    return ((n + m - 1) // m) * m


def fc_net_kernel(x_ref, w1_ref, b1_ref, w2_ref, b2_ref, w3_ref, b3_ref, o_ref):
    # Layer 1: (TB, 3072) f32 -> bf16 in-kernel, bf16 MXU, f32 accumulate, +bias, ReLU.
    x_bf = x_ref[...].astype(jnp.bfloat16)
    h1 = jnp.dot(x_bf, w1_ref[...], preferred_element_type=jnp.float32)
    h1 = jnp.maximum(h1 + b1_ref[...], 0.0)
    # Layer 2 (hidden 64 zero-padded to 128): bf16 MXU, f32 accumulate, +bias, ReLU.
    h2 = jnp.dot(h1.astype(jnp.bfloat16), w2_ref[...], preferred_element_type=jnp.float32)
    h2 = jnp.maximum(h2 + b2_ref[...], 0.0)
    # Layer 3 (classes zero-padded to 128, lane-dense store): bf16 MXU, f32 accumulate, +bias.
    out = jnp.dot(h2.astype(jnp.bfloat16), w3_ref[...], preferred_element_type=jnp.float32)
    out = out + b3_ref[...]
    o_ref[...] = out.astype(o_ref.dtype)


def prepare_params(params):
    """One-time parameter prep (cache the result): bf16 weights, zero-padded lane-dense N dims.
    Zero padding of hidden 64->128 and classes->128 is mathematically exact."""
    w1, b1 = params["w1"], params["b1"]
    w2, b2 = params["w2"], params["b2"]
    w3, b3 = params["w3"], params["b3"]
    num_classes = w3.shape[1]
    d_h2_p = _round_up(w2.shape[1], LANE)
    c_p = _round_up(num_classes, LANE)
    return {
        "w1": w1.astype(jnp.bfloat16),
        "b1": b1.astype(jnp.float32),
        "w2": jnp.pad(w2, ((0, 0), (0, d_h2_p - w2.shape[1]))).astype(jnp.bfloat16),
        "b2": jnp.pad(b2, ((0, 0), (0, d_h2_p - b2.shape[1]))).astype(jnp.float32),
        "w3": jnp.pad(w3, ((0, d_h2_p - w3.shape[0]), (0, c_p - num_classes))).astype(jnp.bfloat16),
        "b3": jnp.pad(b3, ((0, 0), (0, c_p - num_classes))).astype(jnp.float32),
        "num_classes": num_classes,
    }


def fc_neural_net_forward(x_nchw, prep):
    """x_nchw: (B, 3, 32, 32) float32. prep: output of prepare_params (kernel-ready weights)."""
    B = x_nchw.shape[0]
    x_flat = x_nchw.reshape(B, -1)                      # nn.Flatten (row-major over C,H,W)
    assert x_flat.shape[1] == D_IN

    w1, b1 = prep["w1"], prep["b1"]
    w2, b2 = prep["w2"], prep["b2"]
    w3, b3 = prep["w3"], prep["b3"]
    num_classes = prep["num_classes"]
    d_h1 = w1.shape[1]
    d_h2_p = w2.shape[1]
    c_p = w3.shape[1]

    # Balanced batch tiling: nsteps tiles of TB rows (TB multiple of 16 for bf16 sublane
    # packing); pad B only up to nsteps*TB.  Force an even >=2-step grid once B >= 128 so
    # the "parallel" batch axis shards across both v7x TensorCores.
    nsteps = pl.cdiv(B, TB_MAX)
    if B >= 128:
        nsteps = max(nsteps, 2)
    if nsteps > 1 and nsteps % 2:
        nsteps += 1
    TB = _round_up(pl.cdiv(B, nsteps), 16)
    B_pad = nsteps * TB
    if B_pad != B:
        x_flat = jnp.pad(x_flat, ((0, B_pad - B), (0, 0)))

    x_spec = pl.BlockSpec((TB, D_IN), lambda i: (i, 0))
    out_spec = pl.BlockSpec((TB, c_p), lambda i: (i, 0))

    def resident(shape):
        # constant index_map -> DMA'd once, stays resident in VMEM across grid steps
        return pl.BlockSpec(shape, lambda i: (0, 0))

    in_specs = [
        x_spec,
        resident((D_IN, d_h1)),   resident((1, d_h1)),
        resident((d_h1, d_h2_p)), resident((1, d_h2_p)),
        resident((d_h2_p, c_p)),  resident((1, c_p)),
    ]

    flops = 2 * B_pad * (D_IN * d_h1 + d_h1 * d_h2_p + d_h2_p * c_p)
    bytes_accessed = (
        x_flat.size * 4                                    # f32 x read
        + (w1.size + w2.size + w3.size) * 2                # bf16 resident weights
        + (b1.size + b2.size + b3.size) * 4                # f32 biases
        + B_pad * c_p * 2                                  # bf16 logits writeback
    )
    cost = pl.CostEstimate(flops=flops, transcendentals=0, bytes_accessed=bytes_accessed)

    out = pl.pallas_call(
        fc_net_kernel,
        out_shape=jax.ShapeDtypeStruct((B_pad, c_p), jnp.bfloat16),
        grid=(nsteps,),
        in_specs=in_specs,
        out_specs=out_spec,
        compiler_params=pltpu.CompilerParams(
            dimension_semantics=("parallel",),
            vmem_limit_bytes=48 << 20,
        ),
        cost_estimate=cost,
    )(x_flat, w1, b1, w2, b2, w3, b3)

    # strip batch padding and class-lane padding; return f32 logits like the torch module
    return out[:B, :num_classes].astype(jnp.float32)


def init_params(key, num_classes=2):
    """Deterministic synthetic params. PyTorch Linear stores (out, in); we keep the
    transposed (in, out) layout for the kernel. Biases kept 2-D (1, out)."""
    k1, k2, k3, k4, k5, k6 = jax.random.split(key, 6)

    def u(k, shape, fan_in):
        bound = 1.0 / jnp.sqrt(fan_in)
        return jax.random.uniform(k, shape, jnp.float32, -bound, bound)

    return {
        "w1": u(k1, (D_IN, D_H1), D_IN),
        "b1": u(k2, (1, D_H1), D_IN),
        "w2": u(k3, (D_H1, D_H2), D_H1),
        "b2": u(k4, (1, D_H2), D_H1),
        "w3": u(k5, (D_H2, num_classes), D_H2),
        "b3": u(k6, (1, num_classes), D_H2),
    }


if __name__ == "__main__":
    key = jax.random.PRNGKey(0)
    kx, kp = jax.random.split(key)

    B, num_classes = 8, 2
    x = jax.random.normal(kx, (B, 3, 32, 32), dtype=jnp.float32)   # NCHW like PyTorch
    params = init_params(kp, num_classes=num_classes)
    prep = prepare_params(params)                                   # one-time weight prep

    out = fc_neural_net_forward(x, prep)
    out = jax.block_until_ready(out)

    # Pure-JAX reference mimicking the kernel's bf16 matmul operands (f32 accumulation).
    bf = lambda a: a.astype(jnp.bfloat16).astype(jnp.float32)
    xf = x.reshape(B, -1)
    h1 = jnp.maximum(bf(xf) @ bf(params["w1"]) + params["b1"], 0.0)
    h2 = jnp.maximum(bf(h1) @ bf(params["w2"]) + params["b2"], 0.0)
    ref = bf(h2) @ bf(params["w3"]) + params["b3"]

    assert out.shape == (B, num_classes), out.shape
    assert jnp.allclose(out, ref, atol=2e-2, rtol=2e-2), "mismatch vs reference"
    print("KERNEL_OK")
</pallas_src>

<mosaic_0001>
module attributes {stable_mosaic.version = 11 : i64} {
  func.func @fc_net_kernel(%arg0: i32, %arg1: memref<16x3072xf32, #tpu.memory_space<vmem>>, %arg2: memref<3072x512xbf16, #tpu.memory_space<vmem>>, %arg3: memref<1x512xf32, #tpu.memory_space<vmem>>, %arg4: memref<512x128xbf16, #tpu.memory_space<vmem>>, %arg5: memref<1x128xf32, #tpu.memory_space<vmem>>, %arg6: memref<128x128xbf16, #tpu.memory_space<vmem>>, %arg7: memref<1x128xf32, #tpu.memory_space<vmem>>, %arg8: memref<16x128xbf16, #tpu.memory_space<vmem>>) attributes {dimension_semantics = [#tpu.dimension_semantics<parallel>], iteration_bounds = array<i64: 1>, scalar_prefetch = 0 : i64, scratch_operands = 0 : i64, tpu.core_type = #tpu.core_type<tc>, window_params = [{transform_indices = @transform_0, window_bounds = array<i64: 16, 3072>}, {pipeline_mode = #tpu.pipeline_mode<synchronous>, transform_indices = @transform_1, window_bounds = array<i64: 3072, 512>}, {pipeline_mode = #tpu.pipeline_mode<synchronous>, transform_indices = @transform_2, window_bounds = array<i64: 1, 512>}, {pipeline_mode = #tpu.pipeline_mode<synchronous>, transform_indices = @transform_3, window_bounds = array<i64: 512, 128>}, {pipeline_mode = #tpu.pipeline_mode<synchronous>, transform_indices = @transform_4, window_bounds = array<i64: 1, 128>}, {pipeline_mode = #tpu.pipeline_mode<synchronous>, transform_indices = @transform_5, window_bounds = array<i64: 128, 128>}, {pipeline_mode = #tpu.pipeline_mode<synchronous>, transform_indices = @transform_6, window_bounds = array<i64: 1, 128>}, {transform_indices = @transform_7, window_bounds = array<i64: 16, 128>}]} {
    %c0 = arith.constant 0 : index
    %c0_0 = arith.constant 0 : index
    %0 = vector.load %arg1[%c0, %c0_0] : memref<16x3072xf32, #tpu.memory_space<vmem>>, vector<16x3072xf32>
    %1 = arith.truncf %0 : vector<16x3072xf32> to vector<16x3072xbf16>
    %c0_1 = arith.constant 0 : index
    %c0_2 = arith.constant 0 : index
    %2 = vector.load %arg2[%c0_1, %c0_2] : memref<3072x512xbf16, #tpu.memory_space<vmem>>, vector<3072x512xbf16>
    %cst = arith.constant dense<0.000000e+00> : vector<16x512xf32>
    %3 = tpu.matmul %1, %2, %cst {dimension_numbers = #tpu.dot_dimension_numbers<[1], [0], [0], [1], [0, 0, 1, 1], [], []>} : vector<16x3072xbf16>, vector<3072x512xbf16>, vector<16x512xf32> -> vector<16x512xf32>
    %c0_3 = arith.constant 0 : index
    %c0_4 = arith.constant 0 : index
    %4 = vector.load %arg3[%c0_3, %c0_4] : memref<1x512xf32, #tpu.memory_space<vmem>>, vector<1x512xf32>
    %5 = vector.broadcast %4 : vector<1x512xf32> to vector<16x512xf32>
    %6 = arith.addf %3, %5 : vector<16x512xf32>
    %cst_5 = arith.constant 0.000000e+00 : f32
    %7 = vector.broadcast %cst_5 : f32 to vector<16x512xf32>
    %8 = arith.maximumf %6, %7 : vector<16x512xf32>
    %9 = arith.truncf %8 : vector<16x512xf32> to vector<16x512xbf16>
    %c0_6 = arith.constant 0 : index
    %c0_7 = arith.constant 0 : index
    %10 = vector.load %arg4[%c0_6, %c0_7] : memref<512x128xbf16, #tpu.memory_space<vmem>>, vector<512x128xbf16>
    %cst_8 = arith.constant dense<0.000000e+00> : vector<16x128xf32>
    %11 = tpu.matmul %9, %10, %cst_8 {dimension_numbers = #tpu.dot_dimension_numbers<[1], [0], [0], [1], [0, 0, 1, 1], [], []>} : vector<16x512xbf16>, vector<512x128xbf16>, vector<16x128xf32> -> vector<16x128xf32>
    %c0_9 = arith.constant 0 : index
    %c0_10 = arith.constant 0 : index
    %12 = vector.load %arg5[%c0_9, %c0_10] : memref<1x128xf32, #tpu.memory_space<vmem>>, vector<1x128xf32>
    %13 = vector.broadcast %12 : vector<1x128xf32> to vector<16x128xf32>
    %14 = arith.addf %11, %13 : vector<16x128xf32>
    %cst_11 = arith.constant 0.000000e+00 : f32
    %15 = vector.broadcast %cst_11 : f32 to vector<16x128xf32>
    %16 = arith.maximumf %14, %15 : vector<16x128xf32>
    %17 = arith.truncf %16 : vector<16x128xf32> to vector<16x128xbf16>
    %c0_12 = arith.constant 0 : index
    %c0_13 = arith.constant 0 : index
    %18 = vector.load %arg6[%c0_12, %c0_13] : memref<128x128xbf16, #tpu.memory_space<vmem>>, vector<128x128xbf16>
    %cst_14 = arith.constant dense<0.000000e+00> : vector<16x128xf32>
    %19 = tpu.matmul %17, %18, %cst_14 {dimension_numbers = #tpu.dot_dimension_numbers<[1], [0], [0], [1], [0, 0, 1, 1], [], []>} : vector<16x128xbf16>, vector<128x128xbf16>, vector<16x128xf32> -> vector<16x128xf32>
    %c0_15 = arith.constant 0 : index
    %c0_16 = arith.constant 0 : index
    %20 = vector.load %arg7[%c0_15, %c0_16] : memref<1x128xf32, #tpu.memory_space<vmem>>, vector<1x128xf32>
    %21 = vector.broadcast %20 : vector<1x128xf32> to vector<16x128xf32>
    %22 = arith.addf %19, %21 : vector<16x128xf32>
    %23 = arith.truncf %22 : vector<16x128xf32> to vector<16x128xbf16>
    %c0_17 = arith.constant 0 : index
    %c0_18 = arith.constant 0 : index
    %24 = vector.load %arg8[%c0_17, %c0_18] : memref<16x128xbf16, #tpu.memory_space<vmem>>, vector<16x128xbf16>
    tpu.vector_store %arg8[%c0_17, %c0_18], %23 {strides = array<i32>} : memref<16x128xbf16, #tpu.memory_space<vmem>>, vector<16x128xbf16>,
    return
  }
  func.func @transform_0(%arg0: i32) -> (i32, i32) {
    %c0_i32 = arith.constant 0 : i32
    %c0_i32_0 = arith.constant 0 : i32
    return %arg0, %c0_i32 : i32, i32
  }
  func.func @transform_1(%arg0: i32) -> (i32, i32) {
    %c0_i32 = arith.constant 0 : i32
    %c0_i32_0 = arith.constant 0 : i32
    %c0_i32_1 = arith.constant 0 : i32
    return %c0_i32, %c0_i32_0 : i32, i32
  }
  func.func @transform_2(%arg0: i32) -> (i32, i32) {
    %c0_i32 = arith.constant 0 : i32
    %c0_i32_0 = arith.constant 0 : i32
    %c0_i32_1 = arith.constant 0 : i32
    return %c0_i32, %c0_i32_0 : i32, i32
  }
  func.func @transform_3(%arg0: i32) -> (i32, i32) {
    %c0_i32 = arith.constant 0 : i32
    %c0_i32_0 = arith.constant 0 : i32
    %c0_i32_1 = arith.constant 0 : i32
    return %c0_i32, %c0_i32_0 : i32, i32
  }
  func.func @transform_4(%arg0: i32) -> (i32, i32) {
    %c0_i32 = arith.constant 0 : i32
    %c0_i32_0 = arith.constant 0 : i32
    %c0_i32_1 = arith.constant 0 : i32
    return %c0_i32, %c0_i32_0 : i32, i32
  }
  func.func @transform_5(%arg0: i32) -> (i32, i32) {
    %c0_i32 = arith.constant 0 : i32
    %c0_i32_0 = arith.constant 0 : i32
    %c0_i32_1 = arith.constant 0 : i32
    return %c0_i32, %c0_i32_0 : i32, i32
  }
  func.func @transform_6(%arg0: i32) -> (i32, i32) {
    %c0_i32 = arith.constant 0 : i32
    %c0_i32_0 = arith.constant 0 : i32
    %c0_i32_1 = arith.constant 0 : i32
    return %c0_i32, %c0_i32_0 : i32, i32
  }
  func.func @transform_7(%arg0: i32) -> (i32, i32) {
    %c0_i32 = arith.constant 0 : i32
    %c0_i32_0 = arith.constant 0 : i32
    return %arg0, %c0_i32 : i32, i32
  }
}

</mosaic_0001>

<bundles_post_ra>
// kernel: tpu_custom_call.1
= control target key start
LH: loop header
LB: loop body
LE: loop exit
PB: predicated region body
PF: predicated region fallthrough
CT: control target
= control target key end

     0   :  { %12 = vsyncpa [#allocation3], 0  ;;  %s11405_s0 = inlined_call_operand.hbm [shape: f32[16,3072], index: 0, kind: input, shape index: {}]   ;;  %s11406_s1 = inlined_call_operand.hbm [shape: bf16[3072,512], index: 1, kind: input, shape index: {}]   ;;  %s11407_s2 = inlined_call_operand.hbm [shape: f32[1,512], index: 2, kind: input, shape index: {}]   ;;  %s11408_s3 = inlined_call_operand.hbm [shape: bf16[512,128], index: 3, kind: input, shape index: {}]   ;;  %s11409_s4 = inlined_call_operand.hbm [shape: f32[1,128], index: 4, kind: input, shape index: {}]   ;;  %s11410_s5 = inlined_call_operand.hbm [shape: bf16[128,128], index: 5, kind: input, shape index: {}]   ;;  %s11411_s6 = inlined_call_operand.hbm [shape: f32[1,128], index: 6, kind: input, shape index: {}]   ;;  %s11412_s7 = inlined_call_operand.hbm [shape: bf16[16,128], index: 7, kind: output, shape index: {}]  }
   0x1   :  { %13 = vsyncpa [#allocation6], 0 }
   0x2   :  { %14 = vsyncpa [#allocation9], 0 }
   0x3   :  { %15 = vsyncpa [#allocation12], 0  ;;  %s34_s26 = sshll.u32 %s11406_s1, 4  ;;  %s35_s26 = int_to_ptr.hbm [resolvable:$true] %s34_s26 }
   0x4   :  { %16 = vsyncpa [#allocation4], 0  ;;  %s10868_s27 = smov [#allocation5]   ;;  %s58_s8 = sshll.u32 %s11408_s3, 4  ;;  %s59_s8 = int_to_ptr.hbm [resolvable:$true] %s58_s8 }
   0x5   :  { %s36_s28 = sshll.u32 %s10868_s27, 4  ;;  %s10869_s9 = smov 256   ;;  %s37_s28 = int_to_ptr.vmem [resolvable:$true] %s36_s28 }
   0x6   :  { %s10870_s10 = smov 16   ;;  %s10871_s11 = smov [#allocation8]  }
   0x7   :  { %42 = dma.hbm_to_vmem [thread:$0]  %s35_s26, 98304, %s37_s28, [#allocation6], %s10869_s9, %s10869_s9, %s10870_s10  }
   0x8   :  { %s60_s12 = sshll.u32 %s10871_s11, 4  ;;  %s10872_s13 = smov 64   ;;  %s61_s12 = int_to_ptr.vmem [resolvable:$true] %s60_s12 }
   0x9   :  { %s10873_s14 = smov 4   ;;  %s82_s16 = sshll.u32 %s11410_s5, 4  ;;  %s83_s16 = int_to_ptr.hbm [resolvable:$true] %s82_s16 }
   0xa   :  { %66 = dma.hbm_to_vmem [thread:$0]  %s59_s8, 4096, %s61_s12, [#allocation9], %s10872_s13, %s10872_s13, %s10873_s14  }
   0xb   :  { %s10874_s17 = smov [#allocation11]   ;;  %s21_s20 = sshll.u32 %s11405_s0, 4  ;;  %s22_s20 = int_to_ptr.hbm [resolvable:$true] %s21_s20 }
   0xc   :  { %s84_s3 = sshll.u32 %s10874_s17, 4  ;;  %s10875_s21 = smov [#allocation2]   ;;  %s85_s3 = int_to_ptr.vmem [resolvable:$true] %s84_s3 }
   0xd   :  { %90 = dma.hbm_to_vmem [thread:$0]  %s83_s16, 1024, %s85_s3, [#allocation12], %s10872_s13, %s10872_s13, %s10873_s14  }
   0xe   :  { %s23_s22 = sshll.u32 %s10875_s21, 4  ;;  %s10876_s23 = smov 3072   ;;  %s24_s22 = int_to_ptr.vmem [resolvable:$true] %s23_s22 }
   0xf   :  { %s10877_s24 = smov 192   ;;  %s48_s26 = sshll.u32 %s11407_s2, 4  ;;  %s49_s26 = int_to_ptr.hbm [resolvable:$true] %s48_s26 }
  0x10   :  { %29 = dma.hbm_to_vmem [thread:$0]  %s22_s20, 6144, %s24_s22, [#allocation3], %s10876_s23, %s10876_s23, %s10877_s24  }
  0x11   :  { %s10878_s27 = smov [#allocation7]   ;;  %s72_s30 = sshll.u32 %s11409_s4, 4  ;;  %s73_s30 = int_to_ptr.hbm [resolvable:$true] %s72_s30 }
  0x12   :  { %s50_s28 = sshll.u32 %s10878_s27, 4  ;;  %s10879_s8 = smov [#allocation10]   ;;  %s51_s28 = int_to_ptr.vmem [resolvable:$true] %s50_s28 }
  0x13   :  { %53 = dma.hbm_to_vmem [thread:$0]  %s49_s26, 64, %s51_s28, [#allocation6]  }
  0x14   :  { %s74_s9 = sshll.u32 %s10879_s8, 4  ;;  %s96_s12 = sshll.u32 %s11411_s6, 4  ;;  %s75_s9 = int_to_ptr.vmem [resolvable:$true] %s74_s9  ;;  %s97_s12 = int_to_ptr.hbm [resolvable:$true] %s96_s12 }
  0x15   :  { %77 = dma.hbm_to_vmem [thread:$0]  %s73_s30, 16, %s75_s9, [#allocation9]  }
  0x16   :  { %s10880_s2 = smov [#allocation13]  }
  0x17   :  { %s98_s1 = sshll.u32 %s10880_s2, 4  ;;  %s99_s1 = int_to_ptr.vmem [resolvable:$true] %s98_s1 }
  0x18   :  { %101 = dma.hbm_to_vmem [thread:$0]  %s97_s12, 16, %s99_s1, [#allocation12]  }
  0x19   :  { %10858 = dma.done.wait [#allocation3], 6144  }
  0x1a   :  { %10859 = vsyncadd [#allocation3], 4294961152 }
  0x1b   :  { %10860 = dma.done.wait [#allocation6], 98368  }
  0x1c   :  { %10861 = vsyncadd [#allocation6], 4294868928 }
  0x1d   :  { %10862 = dma.done.wait [#allocation9], 4112  }
  0x1e   :  { %10863 = vsyncadd [#allocation9], 4294963184 }
  0x1f   :  { %10864 = dma.done.wait [#allocation12], 1040  }
  0x20   :  { %10865 = vsyncadd [#allocation12], 4294966256  ;;  %v6717_v0 = vld [vmem:[#allocation5 + $0xe0] sm:$0xf]  ;;  %v9865_v1 = vld [vmem:[#allocation5 + $0xec] sm:$0xf0] }
  0x21   :  { %v6845_v2 = vld [vmem:[#allocation5 + $0x1e0] sm:$0xf]  ;;  %v6718_v3 = vor.u32 %v9865_v1, %v6717_v0  ;;  %v9897_v4 = vld [vmem:[#allocation5 + $0x1ec] sm:$0xf0]  ;;  %s10881_s4 = smov [#allocation14]   ;;  %s6587_s17 = sshll.u32 %s11412_s7, 4  ;;  %s6588_s17 = int_to_ptr.hbm [resolvable:$true] %s6587_s17 }
  0x22   :  { %v6973_v5 = vld [vmem:[#allocation5 + $0x2e0] sm:$0xf]  ;;  %v9929_v6 = vld [vmem:[#allocation5 + $0x2ec] sm:$0xf0]  ;;  %v6846_v7 = vor.u32 %v9897_v4, %v6845_v2  ;;  %s6585_s6 = sshll.u32 %s10881_s4, 4  ;;  %s6586_s6 = int_to_ptr.vmem [resolvable:$true] %s6585_s6 }
  0x23   :  { %v6974_v8 = vor.u32 %v9929_v6, %v6973_v5  ;;  %v7101_v9 = vld [vmem:[#allocation5 + $0x3e0] sm:$0xf]  ;;  %v9961_v10 = vld [vmem:[#allocation5 + $0x3ec] sm:$0xf0]  ;;  %4820 = vmatpush.bf16.msra.mxu0 %v6718_v3 }
  0x24   :  { %v6701_v11 = vld [vmem:[#allocation5 + $0xc0] sm:$0xf]  ;;  %v7102_v12 = vor.u32 %v9961_v10, %v7101_v9  ;;  %v9861_v13 = vld [vmem:[#allocation5 + $0xcc] sm:$0xf0]  ;;  %4834 = vmatpush.bf16.msra.mxu1 %v6846_v7 }
  0x25   :  { %v6829_v14 = vld [vmem:[#allocation5 + $0x1c0] sm:$0xf]  ;;  %v9893_v15 = vld [vmem:[#allocation5 + $0x1cc] sm:$0xf0]  ;;  %4848 = vmatpush.bf16.msra.mxu2 %v6974_v8  ;;  %v6702_v16 = vor.u32 %v9861_v13, %v6701_v11 }
  0x26   :  { %v6830_v17 = vor.u32 %v9893_v15, %v6829_v14  ;;  %v6957_v18 = vld [vmem:[#allocation5 + $0x2c0] sm:$0xf]  ;;  %v9925_v19 = vld [vmem:[#allocation5 + $0x2cc] sm:$0xf0]  ;;  %4862 = vmatpush.bf16.msra.mxu3 %v7102_v12 }
  0x27   :  { %v7085_v20 = vld [vmem:[#allocation5 + $0x3c0] sm:$0xf]  ;;  %v6958_v21 = vor.u32 %v9925_v19, %v6957_v18  ;;  %v9957_v22 = vld [vmem:[#allocation5 + $0x3cc] sm:$0xf0]  ;;  %4821 = vmatpush.bf16.msra.mxu0 %v6702_v16 }
  0x28   :  { %v6685_v23 = vld [vmem:[#allocation5 + $0xa0] sm:$0xf]  ;;  %v9857_v24 = vld [vmem:[#allocation5 + $0xac] sm:$0xf0]  ;;  %v7086_v25 = vor.u32 %v9957_v22, %v7085_v20  ;;  %4835 = vmatpush.bf16.msra.mxu1 %v6830_v17 }
  0x29   :  { %v6813_v26 = vld [vmem:[#allocation5 + $0x1a0] sm:$0xf]  ;;  %v9889_v27 = vld [vmem:[#allocation5 + $0x1ac] sm:$0xf0]  ;;  %v6686_v29 = vor.u32 %v9857_v24, %v6685_v23  ;;  %4849 = vmatpush.bf16.msra.mxu2 %v6958_v21 }
  0x2a   :  { %v6941_v28 = vld [vmem:[#allocation5 + $0x2a0] sm:$0xf]  ;;  %v9921_v30 = vld [vmem:[#allocation5 + $0x2ac] sm:$0xf0]  ;;  %v6814_v33 = vor.u32 %v9889_v27, %v6813_v26  ;;  %4863 = vmatpush.bf16.msra.mxu3 %v7086_v25 }
  0x2b   :  { %v7069_v31 = vld [vmem:[#allocation5 + $0x3a0] sm:$0xf]  ;;  %v9953_v32 = vld [vmem:[#allocation5 + $0x3ac] sm:$0xf0]  ;;  %v6942_v34 = vor.u32 %v9921_v30, %v6941_v28  ;;  %4822 = vmatpush.bf16.msra.mxu0 %v6686_v29 }
  0x2c   :  { %v6669_v35 = vld [vmem:[#allocation5 + $0x80] sm:$0xf]  ;;  %v9853_v36 = vld [vmem:[#allocation5 + $0x8c] sm:$0xf0]  ;;  %v7070_v38 = vor.u32 %v9953_v32, %v7069_v31  ;;  %4836 = vmatpush.bf16.msra.mxu1 %v6814_v33 }
  0x2d   :  { %v6797_v37 = vld [vmem:[#allocation5 + $0x180] sm:$0xf]  ;;  %v9885_v39 = vld [vmem:[#allocation5 + $0x18c] sm:$0xf0]  ;;  %v6670_v44 = vor.u32 %v9853_v36, %v6669_v35  ;;  %4850 = vmatpush.bf16.msra.mxu2 %v6942_v34 }
  0x2e   :  { %v6925_v40 = vld [vmem:[#allocation5 + $0x280] sm:$0xf]  ;;  %v9917_v41 = vld [vmem:[#allocation5 + $0x28c] sm:$0xf0]  ;;  %v6798_v45 = vor.u32 %v9885_v39, %v6797_v37  ;;  %4864 = vmatpush.bf16.msra.mxu3 %v7070_v38 }
  0x2f   :  { %v7053_v42 = vld [vmem:[#allocation5 + $0x380] sm:$0xf]  ;;  %v9949_v43 = vld [vmem:[#allocation5 + $0x38c] sm:$0xf0]  ;;  %v6926_v46 = vor.u32 %v9917_v41, %v6925_v40  ;;  %4823 = vmatpush.bf16.msra.mxu0 %v6670_v44 }
  0x30   :  { %v6653_v47 = vld [vmem:[#allocation5 + $0x60] sm:$0xf]  ;;  %v9849_v48 = vld [vmem:[#allocation5 + $0x6c] sm:$0xf0]  ;;  %v7054_v50 = vor.u32 %v9949_v43, %v7053_v42  ;;  %4837 = vmatpush.bf16.msra.mxu1 %v6798_v45 }
  0x31   :  { %v6781_v49 = vld [vmem:[#allocation5 + $0x160] sm:$0xf]  ;;  %v9881_v51 = vld [vmem:[#allocation5 + $0x16c] sm:$0xf0]  ;;  %v6654_v56 = vor.u32 %v9849_v48, %v6653_v47  ;;  %4851 = vmatpush.bf16.msra.mxu2 %v6926_v46 }
  0x32   :  { %v6909_v52 = vld [vmem:[#allocation5 + $0x260] sm:$0xf]  ;;  %v9913_v53 = vld [vmem:[#allocation5 + $0x26c] sm:$0xf0]  ;;  %v6782_v57 = vor.u32 %v9881_v51, %v6781_v49  ;;  %4865 = vmatpush.bf16.msra.mxu3 %v7054_v50 }
  0x33   :  { %v7037_v54 = vld [vmem:[#allocation5 + $0x360] sm:$0xf]  ;;  %v9945_v55 = vld [vmem:[#allocation5 + $0x36c] sm:$0xf0]  ;;  %v6910_v58 = vor.u32 %v9913_v53, %v6909_v52  ;;  %4824 = vmatpush.bf16.msra.mxu0 %v6654_v56 }
  0x34   :  { %v6637_v59 = vld [vmem:[#allocation5 + $0x40] sm:$0xf]  ;;  %v9845_v60 = vld [vmem:[#allocation5 + $0x4c] sm:$0xf0]  ;;  %v7038_v62 = vor.u32 %v9945_v55, %v7037_v54  ;;  %4838 = vmatpush.bf16.msra.mxu1 %v6782_v57 }
  0x35   :  { %v6765_v61 = vld [vmem:[#allocation5 + $0x140] sm:$0xf]  ;;  %v9877_v63 = vld [vmem:[#allocation5 + $0x14c] sm:$0xf0]  ;;  %v6638_v4 = vor.u32 %v9845_v60, %v6637_v59  ;;  %4852 = vmatpush.bf16.msra.mxu2 %v6910_v58 }
  0x36   :  { %v6893_v0 = vld [vmem:[#allocation5 + $0x240] sm:$0xf]  ;;  %v9909_v1 = vld [vmem:[#allocation5 + $0x24c] sm:$0xf0]  ;;  %v6766_v5 = vor.u32 %v9877_v63, %v6765_v61  ;;  %4866 = vmatpush.bf16.msra.mxu3 %v7038_v62 }
  0x37   :  { %v7021_v2 = vld [vmem:[#allocation5 + $0x340] sm:$0xf]  ;;  %v9941_v3 = vld [vmem:[#allocation5 + $0x34c] sm:$0xf0]  ;;  %v6894_v6 = vor.u32 %v9909_v1, %v6893_v0  ;;  %4825 = vmatpush.bf16.msra.mxu0 %v6638_v4 }
  0x38   :  { %v6621_v7 = vld [vmem:[#allocation5 + $0x20] sm:$0xf]  ;;  %v9841_v8 = vld [vmem:[#allocation5 + $0x2c] sm:$0xf0]  ;;  %v7022_v10 = vor.u32 %v9941_v3, %v7021_v2  ;;  %4839 = vmatpush.bf16.msra.mxu1 %v6766_v5 }
  0x39   :  { %v6749_v9 = vld [vmem:[#allocation5 + $0x120] sm:$0xf]  ;;  %v9873_v11 = vld [vmem:[#allocation5 + $0x12c] sm:$0xf0]  ;;  %v6622_v16 = vor.u32 %v9841_v8, %v6621_v7  ;;  %4853 = vmatpush.bf16.msra.mxu2 %v6894_v6  ;;  %v131_v6 = vld [vmem:[#allocation2 + $0x8] sm:$0xff] }
  0x3a   :  { %v6877_v12 = vld [vmem:[#allocation5 + $0x220] sm:$0xf]  ;;  %v9905_v13 = vld [vmem:[#allocation5 + $0x22c] sm:$0xf0]  ;;  %v6750_v19 = vor.u32 %v9873_v11, %v6749_v9  ;;  %4867 = vmatpush.bf16.msra.mxu3 %v7022_v10  ;;  %v155_v7 = vld [vmem:[#allocation2 + $0xc8] sm:$0xff] }
  0x3b   :  { %v7005_v14 = vld [vmem:[#allocation5 + $0x320] sm:$0xf]  ;;  %v9937_v15 = vld [vmem:[#allocation5 + $0x32c] sm:$0xf0]  ;;  %v6878_v20 = vor.u32 %v9905_v13, %v6877_v12  ;;  %4826 = vmatpush.bf16.msra.mxu0 %v6622_v16  ;;  %v133_v8 = vld [vmem:[#allocation2 + $0x18] sm:$0xff]  ;;  %v10955_v10 = vpack.c.bf16 %v155_v7, %v131_v6 }
  0x3c   :  { %v6605_v17 = vld [vmem:[#allocation5] sm:$0xf]  ;;  %v9837_v18 = vld [vmem:[#allocation5 + $0xc] sm:$0xf0]  ;;  %v7006_v24 = vor.u32 %v9937_v15, %v7005_v14  ;;  %4840 = vmatpush.bf16.msra.mxu1 %v6750_v19  ;;  %v157_v11 = vld [vmem:[#allocation2 + $0xd8] sm:$0xff] }
  0x3d   :  { %v6733_v21 = vld [vmem:[#allocation5 + $0x100] sm:$0xf]  ;;  %v9869_v22 = vld [vmem:[#allocation5 + $0x10c] sm:$0xf0]  ;;  %v6606_v31 = vor.u32 %v9837_v18, %v6605_v17  ;;  %4854 = vmatpush.bf16.msra.mxu2 %v6878_v20  ;;  %v10957_v17 = vpack.c.bf16 %v157_v11, %v133_v8 }
  0x3e   :  { %v6861_v23 = vld [vmem:[#allocation5 + $0x200] sm:$0xf]  ;;  %v9901_v25 = vld [vmem:[#allocation5 + $0x20c] sm:$0xf0]  ;;  %v6734_v35 = vor.u32 %v9869_v22, %v6733_v21  ;;  %4868 = vmatpush.bf16.msra.mxu3 %v7006_v24 }
  0x3f   :  { %v6989_v26 = vld [vmem:[#allocation5 + $0x300] sm:$0xf]  ;;  %v9933_v27 = vld [vmem:[#allocation5 + $0x30c] sm:$0xf0]  ;;  %v6862_v36 = vor.u32 %v9901_v25, %v6861_v23  ;;  %4827 = vmatpush.bf16.msra.mxu0 %v6606_v31 }
  0x40   :  { %v7229_v28 = vld [vmem:[#allocation5 + $0x4e0] sm:$0xf]  ;;  %v9993_v29 = vld [vmem:[#allocation5 + $0x4ec] sm:$0xf0]  ;;  %v6990_v39 = vor.u32 %v9933_v27, %v6989_v26  ;;  %4841 = vmatpush.bf16.msra.mxu1 %v6734_v35 }
  0x41   :  { %v7357_v30 = vld [vmem:[#allocation5 + $0x5e0] sm:$0xf]  ;;  %v10025_v32 = vld [vmem:[#allocation5 + $0x5ec] sm:$0xf0]  ;;  %v7230_v40 = vor.u32 %v9993_v29, %v7229_v28  ;;  %4855 = vmatpush.bf16.msra.mxu2 %v6862_v36 }
  0x42   :  { %v7485_v33 = vld [vmem:[#allocation5 + $0x6e0] sm:$0xf]  ;;  %v10057_v34 = vld [vmem:[#allocation5 + $0x6ec] sm:$0xf0]  ;;  %v7358_v43 = vor.u32 %v10025_v32, %v7357_v30  ;;  %4869 = vmatpush.bf16.msra.mxu3 %v6990_v39 }
  0x43   :  { %v7613_v37 = vld [vmem:[#allocation5 + $0x7e0] sm:$0xf]  ;;  %v10089_v38 = vld [vmem:[#allocation5 + $0x7ec] sm:$0xf0]  ;;  %v7486_v44 = vor.u32 %v10057_v34, %v7485_v33  ;;  %4876 = vmatpush.bf16.msrb.mxu0 %v7230_v40  ;;  %4842 = vmatmul.bf16.vlgmr.msra.gmra.mxu1 %v10955_v10 }
  0x44   :  { %v7213_v41 = vld [vmem:[#allocation5 + $0x4c0] sm:$0xf]  ;;  %v9989_v42 = vld [vmem:[#allocation5 + $0x4cc] sm:$0xf0]  ;;  %v7614_v48 = vor.u32 %v10089_v38, %v7613_v37  ;;  %4890 = vmatpush.bf16.msrb.mxu1 %v7358_v43 }
  0x45   :  { %v7341_v45 = vld [vmem:[#allocation5 + $0x5c0] sm:$0xf]  ;;  %v10021_v46 = vld [vmem:[#allocation5 + $0x5cc] sm:$0xf0]  ;;  %v7214_v55 = vor.u32 %v9989_v42, %v7213_v41  ;;  %4904 = vmatpush.bf16.msrb.mxu2 %v7486_v44  ;;  %4870 = vmatmul.bf16.vlgmr.msra.gmra.mxu3 %v10957_v17 }
  0x46   :  { %v7469_v47 = vld [vmem:[#allocation5 + $0x6c0] sm:$0xf]  ;;  %v10053_v49 = vld [vmem:[#allocation5 + $0x6cc] sm:$0xf0]  ;;  %v7342_v60 = vor.u32 %v10021_v46, %v7341_v45  ;;  %4918 = vmatpush.bf16.msrb.mxu3 %v7614_v48 }
  0x47   :  { %v7597_v50 = vld [vmem:[#allocation5 + $0x7c0] sm:$0xf]  ;;  %v10085_v51 = vld [vmem:[#allocation5 + $0x7cc] sm:$0xf0]  ;;  %v7470_v61 = vor.u32 %v10053_v49, %v7469_v47  ;;  %4877 = vmatpush.bf16.msrb.mxu0 %v7214_v55 }
  0x48   :  { %v130_v52 = vld [vmem:[#allocation2] sm:$0xff]  ;;  %v132_v54 = vld [vmem:[#allocation2 + $0x10] sm:$0xff]  ;;  %v7598_v2 = vor.u32 %v10085_v51, %v7597_v50  ;;  %4891 = vmatpush.bf16.msrb.mxu1 %v7342_v60 }
  0x49   :  { %v154_v53 = vld [vmem:[#allocation2 + $0xc0] sm:$0xff]  ;;  %v9985_v57 = vld [vmem:[#allocation5 + $0x4ac] sm:$0xf0]  ;;  %4905 = vmatpush.bf16.msrb.mxu2 %v7470_v61 }
  0x4a   :  { %v7197_v56 = vld [vmem:[#allocation5 + $0x4a0] sm:$0xf]  ;;  %v10949_v58 = vpack.c.bf16 %v154_v53, %v130_v52  ;;  %v156_v59 = vld [vmem:[#allocation2 + $0xd0] sm:$0xff]  ;;  %4919 = vmatpush.bf16.msrb.mxu3 %v7598_v2 }
  0x4b   :  { %v7325_v62 = vld [vmem:[#allocation5 + $0x5a0] sm:$0xf]  ;;  %v10017_v63 = vld [vmem:[#allocation5 + $0x5ac] sm:$0xf0]  ;;  %v10951_v1 = vpack.c.bf16 %v156_v59, %v132_v54  ;;  %v7198_v9 = vor.u32 %v9985_v57, %v7197_v56 }
  0x4c   :  { %v7453_v0 = vld [vmem:[#allocation5 + $0x6a0] sm:$0xf]  ;;  %v10049_v3 = vld [vmem:[#allocation5 + $0x6ac] sm:$0xf0]  ;;  %4828 = vmatmul.bf16.vlgmr.msra.gmra.mxu0 %v10949_v58  ;;  %v7326_v12 = vor.u32 %v10017_v63, %v7325_v62 }
  0x4d   :  { %v7581_v4 = vld [vmem:[#allocation5 + $0x7a0] sm:$0xf]  ;;  %v10081_v5 = vld [vmem:[#allocation5 + $0x7ac] sm:$0xf0]  ;;  %4856 = vmatmul.bf16.vlgmr.msra.gmra.mxu2 %v10951_v1  ;;  %v7454_v13 = vor.u32 %v10049_v3, %v7453_v0  ;;  %4878 = vmatpush.bf16.msrb.mxu0 %v7198_v9 }
  0x4e   :  { %v7181_v14 = vld [vmem:[#allocation5 + $0x480] sm:$0xf]  ;;  %v9981_v15 = vld [vmem:[#allocation5 + $0x48c] sm:$0xf0]  ;;  %v7582_v18 = vor.u32 %v10081_v5, %v7581_v4  ;;  %4892 = vmatpush.bf16.msrb.mxu1 %v7326_v12 }
  0x4f   :  { %v7309_v16 = vld [vmem:[#allocation5 + $0x580] sm:$0xf]  ;;  %v10013_v19 = vld [vmem:[#allocation5 + $0x58c] sm:$0xf0]  ;;  %v7182_v24 = vor.u32 %v9981_v15, %v7181_v14  ;;  %4906 = vmatpush.bf16.msrb.mxu2 %v7454_v13 }
  0x50   :  { %v7437_v20 = vld [vmem:[#allocation5 + $0x680] sm:$0xf]  ;;  %v10045_v21 = vld [vmem:[#allocation5 + $0x68c] sm:$0xf0]  ;;  %v7310_v25 = vor.u32 %v10013_v19, %v7309_v16  ;;  %4920 = vmatpush.bf16.msrb.mxu3 %v7582_v18 }
  0x51   :  { %v7565_v22 = vld [vmem:[#allocation5 + $0x780] sm:$0xf]  ;;  %v10077_v23 = vld [vmem:[#allocation5 + $0x78c] sm:$0xf0]  ;;  %v7438_v26 = vor.u32 %v10045_v21, %v7437_v20  ;;  %4879 = vmatpush.bf16.msrb.mxu0 %v7182_v24 }
  0x52   :  { %v7165_v27 = vld [vmem:[#allocation5 + $0x460] sm:$0xf]  ;;  %v9977_v28 = vld [vmem:[#allocation5 + $0x46c] sm:$0xf0]  ;;  %v7566_v30 = vor.u32 %v10077_v23, %v7565_v22  ;;  %4893 = vmatpush.bf16.msrb.mxu1 %v7310_v25 }
  0x53   :  { %v7293_v29 = vld [vmem:[#allocation5 + $0x560] sm:$0xf]  ;;  %v10009_v31 = vld [vmem:[#allocation5 + $0x56c] sm:$0xf0]  ;;  %v7166_v36 = vor.u32 %v9977_v28, %v7165_v27  ;;  %4907 = vmatpush.bf16.msrb.mxu2 %v7438_v26  ;;  %v135_v27 = vld [vmem:[#allocation2 + $0x28] sm:$0xff] }
  0x54   :  { %v7421_v32 = vld [vmem:[#allocation5 + $0x660] sm:$0xf]  ;;  %v10041_v33 = vld [vmem:[#allocation5 + $0x66c] sm:$0xf0]  ;;  %v7294_v37 = vor.u32 %v10009_v31, %v7293_v29  ;;  %4921 = vmatpush.bf16.msrb.mxu3 %v7566_v30  ;;  %v159_v30 = vld [vmem:[#allocation2 + $0xe8] sm:$0xff] }
  0x55   :  { %v7549_v34 = vld [vmem:[#allocation5 + $0x760] sm:$0xf]  ;;  %v10073_v35 = vld [vmem:[#allocation5 + $0x76c] sm:$0xf0]  ;;  %v7422_v38 = vor.u32 %v10041_v33, %v7421_v32  ;;  %4880 = vmatpush.bf16.msrb.mxu0 %v7166_v36  ;;  %v137_v31 = vld [vmem:[#allocation2 + $0x38] sm:$0xff] }
  0x56   :  { %v7149_v39 = vld [vmem:[#allocation5 + $0x440] sm:$0xf]  ;;  %v9973_v40 = vld [vmem:[#allocation5 + $0x44c] sm:$0xf0]  ;;  %v7550_v42 = vor.u32 %v10073_v35, %v7549_v34  ;;  %4894 = vmatpush.bf16.msrb.mxu1 %v7294_v37  ;;  %v161_v32 = vld [vmem:[#allocation2 + $0xf8] sm:$0xff] }
  0x57   :  { %v7277_v41 = vld [vmem:[#allocation5 + $0x540] sm:$0xf]  ;;  %v10005_v43 = vld [vmem:[#allocation5 + $0x54c] sm:$0xf0]  ;;  %v7150_v48 = vor.u32 %v9973_v40, %v7149_v39  ;;  %4908 = vmatpush.bf16.msrb.mxu2 %v7422_v38 }
  0x58   :  { %v7405_v44 = vld [vmem:[#allocation5 + $0x640] sm:$0xf]  ;;  %v10037_v45 = vld [vmem:[#allocation5 + $0x64c] sm:$0xf0]  ;;  %v7278_v50 = vor.u32 %v10005_v43, %v7277_v41  ;;  %4922 = vmatpush.bf16.msrb.mxu3 %v7550_v42 }
  0x59   :  { %v7533_v46 = vld [vmem:[#allocation5 + $0x740] sm:$0xf]  ;;  %v10069_v47 = vld [vmem:[#allocation5 + $0x74c] sm:$0xf0]  ;;  %v7406_v51 = vor.u32 %v10037_v45, %v7405_v44  ;;  %4881 = vmatpush.bf16.msrb.mxu0 %v7150_v48  ;;  %v10965_v44 = vpack.c.bf16 %v159_v30, %v135_v27 }
  0x5a   :  { %v7133_v49 = vld [vmem:[#allocation5 + $0x420] sm:$0xf]  ;;  %v9969_v52 = vld [vmem:[#allocation5 + $0x42c] sm:$0xf0]  ;;  %v7534_v55 = vor.u32 %v10069_v47, %v7533_v46  ;;  %4895 = vmatpush.bf16.msrb.mxu1 %v7278_v50  ;;  %v10967_v47 = vpack.c.bf16 %v161_v32, %v137_v31 }
  0x5b   :  { %v7261_v53 = vld [vmem:[#allocation5 + $0x520] sm:$0xf]  ;;  %v10001_v54 = vld [vmem:[#allocation5 + $0x52c] sm:$0xf0]  ;;  %v7134_v63 = vor.u32 %v9969_v52, %v7133_v49  ;;  %4909 = vmatpush.bf16.msrb.mxu2 %v7406_v51 }
  0x5c   :  { %v7389_v56 = vld [vmem:[#allocation5 + $0x620] sm:$0xf]  ;;  %v10033_v57 = vld [vmem:[#allocation5 + $0x62c] sm:$0xf0]  ;;  %v7262_v5 = vor.u32 %v10001_v54, %v7261_v53  ;;  %4923 = vmatpush.bf16.msrb.mxu3 %v7534_v55 }
  0x5d   :  { %v7517_v59 = vld [vmem:[#allocation5 + $0x720] sm:$0xf]  ;;  %v10065_v60 = vld [vmem:[#allocation5 + $0x72c] sm:$0xf0]  ;;  %v7390_v6 = vor.u32 %v10033_v57, %v7389_v56  ;;  %4882 = vmatpush.bf16.msrb.mxu0 %v7134_v63 }
  0x5e   :  { %v7117_v61 = vld [vmem:[#allocation5 + $0x400] sm:$0xf]  ;;  %v9965_v62 = vld [vmem:[#allocation5 + $0x40c] sm:$0xf0]  ;;  %v7518_v11 = vor.u32 %v10065_v60, %v7517_v59  ;;  %4896 = vmatpush.bf16.msrb.mxu1 %v7262_v5 }
  0x5f   :  { %v7245_v0 = vld [vmem:[#allocation5 + $0x500] sm:$0xf]  ;;  %v9997_v2 = vld [vmem:[#allocation5 + $0x50c] sm:$0xf0]  ;;  %v7118_v19 = vor.u32 %v9965_v62, %v7117_v61  ;;  %4910 = vmatpush.bf16.msrb.mxu2 %v7390_v6 }
  0x60   :  { %v7373_v3 = vld [vmem:[#allocation5 + $0x600] sm:$0xf]  ;;  %v10029_v4 = vld [vmem:[#allocation5 + $0x60c] sm:$0xf0]  ;;  %v7246_v23 = vor.u32 %v9997_v2, %v7245_v0  ;;  %4924 = vmatpush.bf16.msrb.mxu3 %v7518_v11 }
  0x61   :  { %v7501_v7 = vld [vmem:[#allocation5 + $0x700] sm:$0xf]  ;;  %v10061_v8 = vld [vmem:[#allocation5 + $0x70c] sm:$0xf0]  ;;  %v7374_v24 = vor.u32 %v10029_v4, %v7373_v3  ;;  %4883 = vmatpush.bf16.msrb.mxu0 %v7118_v19 }
  0x62   :  { %v7741_v9 = vld [vmem:[#allocation5 + $0x8e0] sm:$0xf]  ;;  %v10121_v12 = vld [vmem:[#allocation5 + $0x8ec] sm:$0xf0]  ;;  %v7502_v28 = vor.u32 %v10061_v8, %v7501_v7  ;;  %4897 = vmatpush.bf16.msrb.mxu1 %v7246_v23 }
  0x63   :  { %v7869_v13 = vld [vmem:[#allocation5 + $0x9e0] sm:$0xf]  ;;  %v10153_v14 = vld [vmem:[#allocation5 + $0x9ec] sm:$0xf0]  ;;  %v7742_v29 = vor.u32 %v10121_v12, %v7741_v9  ;;  %4911 = vmatpush.bf16.msrb.mxu2 %v7374_v24 }
  0x64   :  { %v7997_v15 = vld [vmem:[#allocation5 + $0xae0] sm:$0xf]  ;;  %v10185_v16 = vld [vmem:[#allocation5 + $0xaec] sm:$0xf0]  ;;  %v7870_v33 = vor.u32 %v10153_v14, %v7869_v13  ;;  %4925 = vmatpush.bf16.msrb.mxu3 %v7502_v28 }
  0x65   :  { %v8125_v18 = vld [vmem:[#allocation5 + $0xbe0] sm:$0xf]  ;;  %v10217_v20 = vld [vmem:[#allocation5 + $0xbec] sm:$0xf0]  ;;  %v7998_v34 = vor.u32 %v10185_v16, %v7997_v15  ;;  %4932 = vmatpush.bf16.msra.mxu0 %v7742_v29  ;;  %4898 = vmatmul.bf16.vlgmr.msrb.gmra.mxu1 %v10965_v44 }
  0x66   :  { %v134_v21 = vld [vmem:[#allocation2 + $0x20] sm:$0xff]  ;;  %v136_v25 = vld [vmem:[#allocation2 + $0x30] sm:$0xff]  ;;  %v8126_v38 = vor.u32 %v10217_v20, %v8125_v18  ;;  %4946 = vmatpush.bf16.msra.mxu1 %v7870_v33 }
  0x67   :  { %v158_v22 = vld [vmem:[#allocation2 + $0xe0] sm:$0xff]  ;;  %v160_v26 = vld [vmem:[#allocation2 + $0xf0] sm:$0xff]  ;;  %4960 = vmatpush.bf16.msra.mxu2 %v7998_v34  ;;  %4926 = vmatmul.bf16.vlgmr.msrb.gmra.mxu3 %v10967_v47 }
  0x68   :  { %v7725_v35 = vld [vmem:[#allocation5 + $0x8c0] sm:$0xf]  ;;  %v10117_v36 = vld [vmem:[#allocation5 + $0x8cc] sm:$0xf0]  ;;  %v10961_v39 = vpack.c.bf16 %v158_v22, %v134_v21  ;;  %v10963_v43 = vpack.c.bf16 %v160_v26, %v136_v25  ;;  %4974 = vmatpush.bf16.msra.mxu3 %v8126_v38 }
  0x69   :  { %v7853_v37 = vld [vmem:[#allocation5 + $0x9c0] sm:$0xf]  ;;  %v10149_v40 = vld [vmem:[#allocation5 + $0x9cc] sm:$0xf0]  ;;  %v7726_v48 = vor.u32 %v10117_v36, %v7725_v35 }
  0x6a   :  { %v7981_v41 = vld [vmem:[#allocation5 + $0xac0] sm:$0xf]  ;;  %v10181_v42 = vld [vmem:[#allocation5 + $0xacc] sm:$0xf0]  ;;  %v7854_v49 = vor.u32 %v10149_v40, %v7853_v37  ;;  %4884 = vmatmul.bf16.vlgmr.msrb.gmra.mxu0 %v10961_v39  ;;  %4912 = vmatmul.bf16.vlgmr.msrb.gmra.mxu2 %v10963_v43 }
  0x6b   :  { %v8109_v45 = vld [vmem:[#allocation5 + $0xbc0] sm:$0xf]  ;;  %v10213_v46 = vld [vmem:[#allocation5 + $0xbcc] sm:$0xf0]  ;;  %v7982_v50 = vor.u32 %v10181_v42, %v7981_v41  ;;  %4933 = vmatpush.bf16.msra.mxu0 %v7726_v48 }
  0x6c   :  { %v7709_v51 = vld [vmem:[#allocation5 + $0x8a0] sm:$0xf]  ;;  %v10113_v52 = vld [vmem:[#allocation5 + $0x8ac] sm:$0xf0]  ;;  %v8110_v54 = vor.u32 %v10213_v46, %v8109_v45  ;;  %4947 = vmatpush.bf16.msra.mxu1 %v7854_v49 }
  0x6d   :  { %v7837_v53 = vld [vmem:[#allocation5 + $0x9a0] sm:$0xf]  ;;  %v10145_v55 = vld [vmem:[#allocation5 + $0x9ac] sm:$0xf0]  ;;  %v7710_v61 = vor.u32 %v10113_v52, %v7709_v51  ;;  %4961 = vmatpush.bf16.msra.mxu2 %v7982_v50 }
  0x6e   :  { %v7965_v56 = vld [vmem:[#allocation5 + $0xaa0] sm:$0xf]  ;;  %v10177_v57 = vld [vmem:[#allocation5 + $0xaac] sm:$0xf0]  ;;  %v7838_v62 = vor.u32 %v10145_v55, %v7837_v53  ;;  %4975 = vmatpush.bf16.msra.mxu3 %v8110_v54 }
  0x6f   :  { %v8093_v59 = vld [vmem:[#allocation5 + $0xba0] sm:$0xf]  ;;  %v10209_v60 = vld [vmem:[#allocation5 + $0xbac] sm:$0xf0]  ;;  %v7966_v63 = vor.u32 %v10177_v57, %v7965_v56  ;;  %4934 = vmatpush.bf16.msra.mxu0 %v7710_v61 }
  0x70   :  { %v7693_v0 = vld [vmem:[#allocation5 + $0x880] sm:$0xf]  ;;  %v10109_v2 = vld [vmem:[#allocation5 + $0x88c] sm:$0xf0]  ;;  %v8094_v4 = vor.u32 %v10209_v60, %v8093_v59  ;;  %4948 = vmatpush.bf16.msra.mxu1 %v7838_v62 }
  0x71   :  { %v7821_v3 = vld [vmem:[#allocation5 + $0x980] sm:$0xf]  ;;  %v10141_v5 = vld [vmem:[#allocation5 + $0x98c] sm:$0xf0]  ;;  %v7694_v11 = vor.u32 %v10109_v2, %v7693_v0  ;;  %4962 = vmatpush.bf16.msra.mxu2 %v7966_v63 }
  0x72   :  { %v7949_v6 = vld [vmem:[#allocation5 + $0xa80] sm:$0xf]  ;;  %v10173_v7 = vld [vmem:[#allocation5 + $0xa8c] sm:$0xf0]  ;;  %v7822_v12 = vor.u32 %v10141_v5, %v7821_v3  ;;  %4976 = vmatpush.bf16.msra.mxu3 %v8094_v4 }
  0x73   :  { %v8077_v8 = vld [vmem:[#allocation5 + $0xb80] sm:$0xf]  ;;  %v10205_v9 = vld [vmem:[#allocation5 + $0xb8c] sm:$0xf0]  ;;  %v7950_v13 = vor.u32 %v10173_v7, %v7949_v6  ;;  %4935 = vmatpush.bf16.msra.mxu0 %v7694_v11 }
  0x74   :  { %v7677_v14 = vld [vmem:[#allocation5 + $0x860] sm:$0xf]  ;;  %v10105_v15 = vld [vmem:[#allocation5 + $0x86c] sm:$0xf0]  ;;  %v8078_v18 = vor.u32 %v10205_v9, %v8077_v8  ;;  %4949 = vmatpush.bf16.msra.mxu1 %v7822_v12 }
  0x75   :  { %v7805_v16 = vld [vmem:[#allocation5 + $0x960] sm:$0xf]  ;;  %v10137_v19 = vld [vmem:[#allocation5 + $0x96c] sm:$0xf0]  ;;  %v7678_v24 = vor.u32 %v10105_v15, %v7677_v14  ;;  %4963 = vmatpush.bf16.msra.mxu2 %v7950_v13 }
  0x76   :  { %v7933_v20 = vld [vmem:[#allocation5 + $0xa60] sm:$0xf]  ;;  %v10169_v21 = vld [vmem:[#allocation5 + $0xa6c] sm:$0xf0]  ;;  %v7806_v25 = vor.u32 %v10137_v19, %v7805_v16  ;;  %4977 = vmatpush.bf16.msra.mxu3 %v8078_v18  ;;  %v139_v19 = vld [vmem:[#allocation2 + $0x48] sm:$0xff] }
  0x77   :  { %v8061_v22 = vld [vmem:[#allocation5 + $0xb60] sm:$0xf]  ;;  %v10201_v23 = vld [vmem:[#allocation5 + $0xb6c] sm:$0xf0]  ;;  %v7934_v26 = vor.u32 %v10169_v21, %v7933_v20  ;;  %4936 = vmatpush.bf16.msra.mxu0 %v7678_v24  ;;  %v165_v24 = vld [vmem:[#allocation2 + $0x118] sm:$0xff] }
  0x78   :  { %v7661_v27 = vld [vmem:[#allocation5 + $0x840] sm:$0xf]  ;;  %v10101_v28 = vld [vmem:[#allocation5 + $0x84c] sm:$0xf0]  ;;  %v8062_v30 = vor.u32 %v10201_v23, %v8061_v22  ;;  %4950 = vmatpush.bf16.msra.mxu1 %v7806_v25  ;;  %v163_v22 = vld [vmem:[#allocation2 + $0x108] sm:$0xff] }
  0x79   :  { %v7789_v29 = vld [vmem:[#allocation5 + $0x940] sm:$0xf]  ;;  %v10133_v31 = vld [vmem:[#allocation5 + $0x94c] sm:$0xf0]  ;;  %v7662_v36 = vor.u32 %v10101_v28, %v7661_v27  ;;  %4964 = vmatpush.bf16.msra.mxu2 %v7934_v26  ;;  %v141_v23 = vld [vmem:[#allocation2 + $0x58] sm:$0xff] }
  0x7a   :  { %v7917_v32 = vld [vmem:[#allocation5 + $0xa40] sm:$0xf]  ;;  %v10165_v33 = vld [vmem:[#allocation5 + $0xa4c] sm:$0xf0]  ;;  %v7790_v38 = vor.u32 %v10133_v31, %v7789_v29  ;;  %4978 = vmatpush.bf16.msra.mxu3 %v8062_v30 }
  0x7b   :  { %v8045_v34 = vld [vmem:[#allocation5 + $0xb40] sm:$0xf]  ;;  %v10197_v35 = vld [vmem:[#allocation5 + $0xb4c] sm:$0xf0]  ;;  %v7918_v40 = vor.u32 %v10165_v33, %v7917_v32  ;;  %4937 = vmatpush.bf16.msra.mxu0 %v7662_v36  ;;  %v10977_v36 = vpack.c.bf16 %v163_v22, %v139_v19 }
  0x7c   :  { %v7645_v37 = vld [vmem:[#allocation5 + $0x820] sm:$0xf]  ;;  %v10097_v41 = vld [vmem:[#allocation5 + $0x82c] sm:$0xf0]  ;;  %v8046_v46 = vor.u32 %v10197_v35, %v8045_v34  ;;  %4951 = vmatpush.bf16.msra.mxu1 %v7790_v38 }
  0x7d   :  { %v7773_v42 = vld [vmem:[#allocation5 + $0x920] sm:$0xf]  ;;  %v10129_v45 = vld [vmem:[#allocation5 + $0x92c] sm:$0xf0]  ;;  %v7646_v54 = vor.u32 %v10097_v41, %v7645_v37  ;;  %4965 = vmatpush.bf16.msra.mxu2 %v7918_v40  ;;  %v10979_v40 = vpack.c.bf16 %v165_v24, %v141_v23 }
  0x7e   :  { %v7901_v48 = vld [vmem:[#allocation5 + $0xa20] sm:$0xf]  ;;  %v10161_v49 = vld [vmem:[#allocation5 + $0xa2c] sm:$0xf0]  ;;  %v7774_v60 = vor.u32 %v10129_v45, %v7773_v42  ;;  %4979 = vmatpush.bf16.msra.mxu3 %v8046_v46 }
  0x7f   :  { %v8029_v50 = vld [vmem:[#allocation5 + $0xb20] sm:$0xf]  ;;  %v10193_v51 = vld [vmem:[#allocation5 + $0xb2c] sm:$0xf0]  ;;  %v7902_v61 = vor.u32 %v10161_v49, %v7901_v48  ;;  %4938 = vmatpush.bf16.msra.mxu0 %v7646_v54 }
  0x80   :  { %v7629_v52 = vld [vmem:[#allocation5 + $0x800] sm:$0xf]  ;;  %v10093_v53 = vld [vmem:[#allocation5 + $0x80c] sm:$0xf0]  ;;  %v8030_v2 = vor.u32 %v10193_v51, %v8029_v50  ;;  %4952 = vmatpush.bf16.msra.mxu1 %v7774_v60 }
  0x81   :  { %v7757_v55 = vld [vmem:[#allocation5 + $0x900] sm:$0xf]  ;;  %v10125_v56 = vld [vmem:[#allocation5 + $0x90c] sm:$0xf0]  ;;  %v7630_v9 = vor.u32 %v10093_v53, %v7629_v52  ;;  %4966 = vmatpush.bf16.msra.mxu2 %v7902_v61 }
  0x82   :  { %v7885_v57 = vld [vmem:[#allocation5 + $0xa00] sm:$0xf]  ;;  %v10157_v59 = vld [vmem:[#allocation5 + $0xa0c] sm:$0xf0]  ;;  %v7758_v14 = vor.u32 %v10125_v56, %v7757_v55  ;;  %4980 = vmatpush.bf16.msra.mxu3 %v8030_v2 }
  0x83   :  { %v8013_v62 = vld [vmem:[#allocation5 + $0xb00] sm:$0xf]  ;;  %v10189_v63 = vld [vmem:[#allocation5 + $0xb0c] sm:$0xf0]  ;;  %v7886_v15 = vor.u32 %v10157_v59, %v7885_v57  ;;  %4939 = vmatpush.bf16.msra.mxu0 %v7630_v9 }
  0x84   :  { %v8253_v0 = vld [vmem:[#allocation5 + $0xce0] sm:$0xf]  ;;  %v10249_v3 = vld [vmem:[#allocation5 + $0xcec] sm:$0xf0]  ;;  %v8014_v20 = vor.u32 %v10189_v63, %v8013_v62  ;;  %4953 = vmatpush.bf16.msra.mxu1 %v7758_v14 }
  0x85   :  { %v8381_v4 = vld [vmem:[#allocation5 + $0xde0] sm:$0xf]  ;;  %v10281_v5 = vld [vmem:[#allocation5 + $0xdec] sm:$0xf0]  ;;  %v8254_v21 = vor.u32 %v10249_v3, %v8253_v0  ;;  %4967 = vmatpush.bf16.msra.mxu2 %v7886_v15 }
  0x86   :  { %v8509_v6 = vld [vmem:[#allocation5 + $0xee0] sm:$0xf]  ;;  %v10313_v7 = vld [vmem:[#allocation5 + $0xeec] sm:$0xf0]  ;;  %v8382_v25 = vor.u32 %v10281_v5, %v8381_v4  ;;  %4981 = vmatpush.bf16.msra.mxu3 %v8014_v20 }
  0x87   :  { %v8637_v8 = vld [vmem:[#allocation5 + $0xfe0] sm:$0xf]  ;;  %v10345_v11 = vld [vmem:[#allocation5 + $0xfec] sm:$0xf0]  ;;  %v8510_v26 = vor.u32 %v10313_v7, %v8509_v6  ;;  %4988 = vmatpush.bf16.msrb.mxu0 %v8254_v21  ;;  %4954 = vmatmul.bf16.vlgmr.msra.gmra.mxu1 %v10977_v36 }
  0x88   :  { %v138_v12 = vld [vmem:[#allocation2 + $0x40] sm:$0xff]  ;;  %v140_v16 = vld [vmem:[#allocation2 + $0x50] sm:$0xff]  ;;  %v8638_v30 = vor.u32 %v10345_v11, %v8637_v8  ;;  %5002 = vmatpush.bf16.msrb.mxu1 %v8382_v25 }
  0x89   :  { %v162_v13 = vld [vmem:[#allocation2 + $0x100] sm:$0xff]  ;;  %v164_v18 = vld [vmem:[#allocation2 + $0x110] sm:$0xff]  ;;  %5016 = vmatpush.bf16.msrb.mxu2 %v8510_v26  ;;  %4982 = vmatmul.bf16.vlgmr.msra.gmra.mxu3 %v10979_v40 }
  0x8a   :  { %v8237_v27 = vld [vmem:[#allocation5 + $0xcc0] sm:$0xf]  ;;  %v10245_v28 = vld [vmem:[#allocation5 + $0xccc] sm:$0xf0]  ;;  %v10973_v31 = vpack.c.bf16 %v162_v13, %v138_v12  ;;  %v10975_v35 = vpack.c.bf16 %v164_v18, %v140_v16  ;;  %5030 = vmatpush.bf16.msrb.mxu3 %v8638_v30 }
  0x8b   :  { %v8365_v29 = vld [vmem:[#allocation5 + $0xdc0] sm:$0xf]  ;;  %v10277_v32 = vld [vmem:[#allocation5 + $0xdcc] sm:$0xf0]  ;;  %v8238_v41 = vor.u32 %v10245_v28, %v8237_v27 }
  0x8c   :  { %v8493_v33 = vld [vmem:[#allocation5 + $0xec0] sm:$0xf]  ;;  %v10309_v34 = vld [vmem:[#allocation5 + $0xecc] sm:$0xf0]  ;;  %v8366_v42 = vor.u32 %v10277_v32, %v8365_v29  ;;  %4940 = vmatmul.bf16.vlgmr.msra.gmra.mxu0 %v10973_v31  ;;  %4968 = vmatmul.bf16.vlgmr.msra.gmra.mxu2 %v10975_v35 }
  0x8d   :  { %v8621_v37 = vld [vmem:[#allocation5 + $0xfc0] sm:$0xf]  ;;  %v10341_v38 = vld [vmem:[#allocation5 + $0xfcc] sm:$0xf0]  ;;  %v8494_v45 = vor.u32 %v10309_v34, %v8493_v33  ;;  %4989 = vmatpush.bf16.msrb.mxu0 %v8238_v41 }
  0x8e   :  { %v8221_v46 = vld [vmem:[#allocation5 + $0xca0] sm:$0xf]  ;;  %v10241_v48 = vld [vmem:[#allocation5 + $0xcac] sm:$0xf0]  ;;  %v8622_v50 = vor.u32 %v10341_v38, %v8621_v37  ;;  %5003 = vmatpush.bf16.msrb.mxu1 %v8366_v42 }
  0x8f   :  { %v8349_v49 = vld [vmem:[#allocation5 + $0xda0] sm:$0xf]  ;;  %v10273_v51 = vld [vmem:[#allocation5 + $0xdac] sm:$0xf0]  ;;  %v8222_v56 = vor.u32 %v10241_v48, %v8221_v46  ;;  %5017 = vmatpush.bf16.msrb.mxu2 %v8494_v45 }
  0x90   :  { %v8477_v52 = vld [vmem:[#allocation5 + $0xea0] sm:$0xf]  ;;  %v10305_v53 = vld [vmem:[#allocation5 + $0xeac] sm:$0xf0]  ;;  %v8350_v57 = vor.u32 %v10273_v51, %v8349_v49  ;;  %5031 = vmatpush.bf16.msrb.mxu3 %v8622_v50 }
  0x91   :  { %v8605_v54 = vld [vmem:[#allocation5 + $0xfa0] sm:$0xf]  ;;  %v10337_v55 = vld [vmem:[#allocation5 + $0xfac] sm:$0xf0]  ;;  %v8478_v59 = vor.u32 %v10305_v53, %v8477_v52  ;;  %4990 = vmatpush.bf16.msrb.mxu0 %v8222_v56 }
  0x92   :  { %v8205_v60 = vld [vmem:[#allocation5 + $0xc80] sm:$0xf]  ;;  %v10237_v61 = vld [vmem:[#allocation5 + $0xc8c] sm:$0xf0]  ;;  %v8606_v63 = vor.u32 %v10337_v55, %v8605_v54  ;;  %5004 = vmatpush.bf16.msrb.mxu1 %v8350_v57 }
  0x93   :  { %v8333_v62 = vld [vmem:[#allocation5 + $0xd80] sm:$0xf]  ;;  %v10269_v0 = vld [vmem:[#allocation5 + $0xd8c] sm:$0xf0]  ;;  %v8206_v6 = vor.u32 %v10237_v61, %v8205_v60  ;;  %5018 = vmatpush.bf16.msrb.mxu2 %v8478_v59 }
  0x94   :  { %v8461_v2 = vld [vmem:[#allocation5 + $0xe80] sm:$0xf]  ;;  %v10301_v3 = vld [vmem:[#allocation5 + $0xe8c] sm:$0xf0]  ;;  %v8334_v7 = vor.u32 %v10269_v0, %v8333_v62  ;;  %5032 = vmatpush.bf16.msrb.mxu3 %v8606_v63 }
  0x95   :  { %v8589_v4 = vld [vmem:[#allocation5 + $0xf80] sm:$0xf]  ;;  %v10333_v5 = vld [vmem:[#allocation5 + $0xf8c] sm:$0xf0]  ;;  %v8462_v8 = vor.u32 %v10301_v3, %v8461_v2  ;;  %4991 = vmatpush.bf16.msrb.mxu0 %v8206_v6 }
  0x96   :  { %v8189_v9 = vld [vmem:[#allocation5 + $0xc60] sm:$0xf]  ;;  %v10233_v11 = vld [vmem:[#allocation5 + $0xc6c] sm:$0xf0]  ;;  %v8590_v13 = vor.u32 %v10333_v5, %v8589_v4  ;;  %5005 = vmatpush.bf16.msrb.mxu1 %v8334_v7 }
  0x97   :  { %v8317_v12 = vld [vmem:[#allocation5 + $0xd60] sm:$0xf]  ;;  %v10265_v14 = vld [vmem:[#allocation5 + $0xd6c] sm:$0xf0]  ;;  %v8190_v20 = vor.u32 %v10233_v11, %v8189_v9  ;;  %5019 = vmatpush.bf16.msrb.mxu2 %v8462_v8 }
  0x98   :  { %v8445_v15 = vld [vmem:[#allocation5 + $0xe60] sm:$0xf]  ;;  %v10297_v16 = vld [vmem:[#allocation5 + $0xe6c] sm:$0xf0]  ;;  %v8318_v21 = vor.u32 %v10265_v14, %v8317_v12  ;;  %5033 = vmatpush.bf16.msrb.mxu3 %v8590_v13 }
  0x99   :  { %v8573_v18 = vld [vmem:[#allocation5 + $0xf60] sm:$0xf]  ;;  %v10329_v19 = vld [vmem:[#allocation5 + $0xf6c] sm:$0xf0]  ;;  %v8446_v22 = vor.u32 %v10297_v16, %v8445_v15  ;;  %4992 = vmatpush.bf16.msrb.mxu0 %v8190_v20 }
  0x9a   :  { %v8173_v23 = vld [vmem:[#allocation5 + $0xc40] sm:$0xf]  ;;  %v10229_v24 = vld [vmem:[#allocation5 + $0xc4c] sm:$0xf0]  ;;  %v8574_v26 = vor.u32 %v10329_v19, %v8573_v18  ;;  %5006 = vmatpush.bf16.msrb.mxu1 %v8318_v21  ;;  %v143_v19 = vld [vmem:[#allocation2 + $0x68] sm:$0xff] }
  0x9b   :  { %v8301_v25 = vld [vmem:[#allocation5 + $0xd40] sm:$0xf]  ;;  %v10261_v27 = vld [vmem:[#allocation5 + $0xd4c] sm:$0xf0]  ;;  %v8174_v33 = vor.u32 %v10229_v24, %v8173_v23  ;;  %5020 = vmatpush.bf16.msrb.mxu2 %v8446_v22  ;;  %v167_v22 = vld [vmem:[#allocation2 + $0x128] sm:$0xff] }
  0x9c   :  { %v8429_v28 = vld [vmem:[#allocation5 + $0xe40] sm:$0xf]  ;;  %v10293_v29 = vld [vmem:[#allocation5 + $0xe4c] sm:$0xf0]  ;;  %v8302_v38 = vor.u32 %v10261_v27, %v8301_v25  ;;  %5034 = vmatpush.bf16.msrb.mxu3 %v8574_v26  ;;  %v145_v23 = vld [vmem:[#allocation2 + $0x78] sm:$0xff] }
  0x9d   :  { %v8557_v30 = vld [vmem:[#allocation5 + $0xf40] sm:$0xf]  ;;  %v10325_v32 = vld [vmem:[#allocation5 + $0xf4c] sm:$0xf0]  ;;  %v8430_v41 = vor.u32 %v10293_v29, %v8429_v28  ;;  %4993 = vmatpush.bf16.msrb.mxu0 %v8174_v33  ;;  %v169_v24 = vld [vmem:[#allocation2 + $0x138] sm:$0xff] }
  0x9e   :  { %v8157_v34 = vld [vmem:[#allocation5 + $0xc20] sm:$0xf]  ;;  %v10225_v37 = vld [vmem:[#allocation5 + $0xc2c] sm:$0xf0]  ;;  %v8558_v48 = vor.u32 %v10325_v32, %v8557_v30  ;;  %5007 = vmatpush.bf16.msrb.mxu1 %v8302_v38 }
  0x9f   :  { %v8285_v42 = vld [vmem:[#allocation5 + $0xd20] sm:$0xf]  ;;  %v10257_v45 = vld [vmem:[#allocation5 + $0xd2c] sm:$0xf0]  ;;  %v8158_v54 = vor.u32 %v10225_v37, %v8157_v34  ;;  %5021 = vmatpush.bf16.msrb.mxu2 %v8430_v41  ;;  %v10989_v41 = vpack.c.bf16 %v167_v22, %v143_v19 }
  0xa0   :  { %v8413_v46 = vld [vmem:[#allocation5 + $0xe20] sm:$0xf]  ;;  %v10289_v49 = vld [vmem:[#allocation5 + $0xe2c] sm:$0xf0]  ;;  %v8286_v60 = vor.u32 %v10257_v45, %v8285_v42  ;;  %5035 = vmatpush.bf16.msrb.mxu3 %v8558_v48 }
  0xa1   :  { %v8541_v50 = vld [vmem:[#allocation5 + $0xf20] sm:$0xf]  ;;  %v10321_v51 = vld [vmem:[#allocation5 + $0xf2c] sm:$0xf0]  ;;  %v8414_v61 = vor.u32 %v10289_v49, %v8413_v46  ;;  %4994 = vmatpush.bf16.msrb.mxu0 %v8158_v54  ;;  %v10991_v46 = vpack.c.bf16 %v169_v24, %v145_v23 }
  0xa2   :  { %v8141_v52 = vld [vmem:[#allocation5 + $0xc00] sm:$0xf]  ;;  %v10221_v53 = vld [vmem:[#allocation5 + $0xc0c] sm:$0xf0]  ;;  %v8542_v2 = vor.u32 %v10321_v51, %v8541_v50  ;;  %5008 = vmatpush.bf16.msrb.mxu1 %v8286_v60 }
  0xa3   :  { %v8269_v55 = vld [vmem:[#allocation5 + $0xd00] sm:$0xf]  ;;  %v10253_v56 = vld [vmem:[#allocation5 + $0xd0c] sm:$0xf0]  ;;  %v8142_v9 = vor.u32 %v10221_v53, %v8141_v52  ;;  %5022 = vmatpush.bf16.msrb.mxu2 %v8414_v61 }
  0xa4   :  { %v8397_v57 = vld [vmem:[#allocation5 + $0xe00] sm:$0xf]  ;;  %v10285_v59 = vld [vmem:[#allocation5 + $0xe0c] sm:$0xf0]  ;;  %v8270_v14 = vor.u32 %v10253_v56, %v8269_v55  ;;  %5036 = vmatpush.bf16.msrb.mxu3 %v8542_v2 }
  0xa5   :  { %v8525_v62 = vld [vmem:[#allocation5 + $0xf00] sm:$0xf]  ;;  %v10317_v63 = vld [vmem:[#allocation5 + $0xf0c] sm:$0xf0]  ;;  %v8398_v15 = vor.u32 %v10285_v59, %v8397_v57  ;;  %4995 = vmatpush.bf16.msrb.mxu0 %v8142_v9 }
  0xa6   :  { %v8765_v0 = vld [vmem:[#allocation5 + $0x10e0] sm:$0xf]  ;;  %v10377_v3 = vld [vmem:[#allocation5 + $0x10ec] sm:$0xf0]  ;;  %v8526_v20 = vor.u32 %v10317_v63, %v8525_v62  ;;  %5009 = vmatpush.bf16.msrb.mxu1 %v8270_v14 }
  0xa7   :  { %v8893_v4 = vld [vmem:[#allocation5 + $0x11e0] sm:$0xf]  ;;  %v10409_v5 = vld [vmem:[#allocation5 + $0x11ec] sm:$0xf0]  ;;  %v8766_v21 = vor.u32 %v10377_v3, %v8765_v0  ;;  %5023 = vmatpush.bf16.msrb.mxu2 %v8398_v15 }
  0xa8   :  { %v9021_v6 = vld [vmem:[#allocation5 + $0x12e0] sm:$0xf]  ;;  %v10441_v7 = vld [vmem:[#allocation5 + $0x12ec] sm:$0xf0]  ;;  %v8894_v25 = vor.u32 %v10409_v5, %v8893_v4  ;;  %5037 = vmatpush.bf16.msrb.mxu3 %v8526_v20 }
  0xa9   :  { %v9149_v8 = vld [vmem:[#allocation5 + $0x13e0] sm:$0xf]  ;;  %v10473_v11 = vld [vmem:[#allocation5 + $0x13ec] sm:$0xf0]  ;;  %v9022_v26 = vor.u32 %v10441_v7, %v9021_v6  ;;  %5044 = vmatpush.bf16.msra.mxu0 %v8766_v21  ;;  %5010 = vmatmul.bf16.vlgmr.msrb.gmra.mxu1 %v10989_v41 }
  0xaa   :  { %v142_v12 = vld [vmem:[#allocation2 + $0x60] sm:$0xff]  ;;  %v144_v16 = vld [vmem:[#allocation2 + $0x70] sm:$0xff]  ;;  %v9150_v30 = vor.u32 %v10473_v11, %v9149_v8  ;;  %5058 = vmatpush.bf16.msra.mxu1 %v8894_v25 }
  0xab   :  { %v166_v13 = vld [vmem:[#allocation2 + $0x120] sm:$0xff]  ;;  %v168_v18 = vld [vmem:[#allocation2 + $0x130] sm:$0xff]  ;;  %5072 = vmatpush.bf16.msra.mxu2 %v9022_v26  ;;  %5038 = vmatmul.bf16.vlgmr.msrb.gmra.mxu3 %v10991_v46 }
  0xac   :  { %v8749_v27 = vld [vmem:[#allocation5 + $0x10c0] sm:$0xf]  ;;  %v10373_v28 = vld [vmem:[#allocation5 + $0x10cc] sm:$0xf0]  ;;  %v10985_v32 = vpack.c.bf16 %v166_v13, %v142_v12  ;;  %v10987_v38 = vpack.c.bf16 %v168_v18, %v144_v16  ;;  %5086 = vmatpush.bf16.msra.mxu3 %v9150_v30 }
  0xad   :  { %v8877_v29 = vld [vmem:[#allocation5 + $0x11c0] sm:$0xf]  ;;  %v10405_v33 = vld [vmem:[#allocation5 + $0x11cc] sm:$0xf0]  ;;  %v8750_v48 = vor.u32 %v10373_v28, %v8749_v27 }
  0xae   :  { %v9005_v34 = vld [vmem:[#allocation5 + $0x12c0] sm:$0xf]  ;;  %v10437_v37 = vld [vmem:[#allocation5 + $0x12cc] sm:$0xf0]  ;;  %v8878_v49 = vor.u32 %v10405_v33, %v8877_v29  ;;  %4996 = vmatmul.bf16.vlgmr.msrb.gmra.mxu0 %v10985_v32  ;;  %5024 = vmatmul.bf16.vlgmr.msrb.gmra.mxu2 %v10987_v38 }
  0xaf   :  { %v9133_v42 = vld [vmem:[#allocation5 + $0x13c0] sm:$0xf]  ;;  %v10469_v45 = vld [vmem:[#allocation5 + $0x13cc] sm:$0xf0]  ;;  %v9006_v50 = vor.u32 %v10437_v37, %v9005_v34  ;;  %5045 = vmatpush.bf16.msra.mxu0 %v8750_v48 }
  0xb0   :  { %v8733_v51 = vld [vmem:[#allocation5 + $0x10a0] sm:$0xf]  ;;  %v10369_v52 = vld [vmem:[#allocation5 + $0x10ac] sm:$0xf0]  ;;  %v9134_v54 = vor.u32 %v10469_v45, %v9133_v42  ;;  %5059 = vmatpush.bf16.msra.mxu1 %v8878_v49 }
  0xb1   :  { %v8861_v53 = vld [vmem:[#allocation5 + $0x11a0] sm:$0xf]  ;;  %v10401_v55 = vld [vmem:[#allocation5 + $0x11ac] sm:$0xf0]  ;;  %v8734_v61 = vor.u32 %v10369_v52, %v8733_v51  ;;  %5073 = vmatpush.bf16.msra.mxu2 %v9006_v50 }
  0xb2   :  { %v8989_v56 = vld [vmem:[#allocation5 + $0x12a0] sm:$0xf]  ;;  %v10433_v57 = vld [vmem:[#allocation5 + $0x12ac] sm:$0xf0]  ;;  %v8862_v62 = vor.u32 %v10401_v55, %v8861_v53  ;;  %5087 = vmatpush.bf16.msra.mxu3 %v9134_v54 }
  0xb3   :  { %v9117_v59 = vld [vmem:[#allocation5 + $0x13a0] sm:$0xf]  ;;  %v10465_v60 = vld [vmem:[#allocation5 + $0x13ac] sm:$0xf0]  ;;  %v8990_v63 = vor.u32 %v10433_v57, %v8989_v56  ;;  %5046 = vmatpush.bf16.msra.mxu0 %v8734_v61 }
  0xb4   :  { %v8717_v0 = vld [vmem:[#allocation5 + $0x1080] sm:$0xf]  ;;  %v10365_v2 = vld [vmem:[#allocation5 + $0x108c] sm:$0xf0]  ;;  %v9118_v4 = vor.u32 %v10465_v60, %v9117_v59  ;;  %5060 = vmatpush.bf16.msra.mxu1 %v8862_v62 }
  0xb5   :  { %v8845_v3 = vld [vmem:[#allocation5 + $0x1180] sm:$0xf]  ;;  %v10397_v5 = vld [vmem:[#allocation5 + $0x118c] sm:$0xf0]  ;;  %v8718_v11 = vor.u32 %v10365_v2, %v8717_v0  ;;  %5074 = vmatpush.bf16.msra.mxu2 %v8990_v63 }
  0xb6   :  { %v8973_v6 = vld [vmem:[#allocation5 + $0x1280] sm:$0xf]  ;;  %v10429_v7 = vld [vmem:[#allocation5 + $0x128c] sm:$0xf0]  ;;  %v8846_v12 = vor.u32 %v10397_v5, %v8845_v3  ;;  %5088 = vmatpush.bf16.msra.mxu3 %v9118_v4 }
  0xb7   :  { %v9101_v8 = vld [vmem:[#allocation5 + $0x1380] sm:$0xf]  ;;  %v10461_v9 = vld [vmem:[#allocation5 + $0x138c] sm:$0xf0]  ;;  %v8974_v13 = vor.u32 %v10429_v7, %v8973_v6  ;;  %5047 = vmatpush.bf16.msra.mxu0 %v8718_v11 }
  0xb8   :  { %v8701_v14 = vld [vmem:[#allocation5 + $0x1060] sm:$0xf]  ;;  %v10361_v15 = vld [vmem:[#allocation5 + $0x106c] sm:$0xf0]  ;;  %v9102_v18 = vor.u32 %v10461_v9, %v9101_v8  ;;  %5061 = vmatpush.bf16.msra.mxu1 %v8846_v12 }
  0xb9   :  { %v8829_v16 = vld [vmem:[#allocation5 + $0x1160] sm:$0xf]  ;;  %v10393_v19 = vld [vmem:[#allocation5 + $0x116c] sm:$0xf0]  ;;  %v8702_v24 = vor.u32 %v10361_v15, %v8701_v14  ;;  %5075 = vmatpush.bf16.msra.mxu2 %v8974_v13 }
  0xba   :  { %v8957_v20 = vld [vmem:[#allocation5 + $0x1260] sm:$0xf]  ;;  %v10425_v21 = vld [vmem:[#allocation5 + $0x126c] sm:$0xf0]  ;;  %v8830_v25 = vor.u32 %v10393_v19, %v8829_v16  ;;  %5089 = vmatpush.bf16.msra.mxu3 %v9102_v18 }
  0xbb   :  { %v9085_v22 = vld [vmem:[#allocation5 + $0x1360] sm:$0xf]  ;;  %v10457_v23 = vld [vmem:[#allocation5 + $0x136c] sm:$0xf0]  ;;  %v8958_v26 = vor.u32 %v10425_v21, %v8957_v20  ;;  %5048 = vmatpush.bf16.msra.mxu0 %v8702_v24 }
  0xbc   :  { %v8685_v27 = vld [vmem:[#allocation5 + $0x1040] sm:$0xf]  ;;  %v10357_v28 = vld [vmem:[#allocation5 + $0x104c] sm:$0xf0]  ;;  %v9086_v30 = vor.u32 %v10457_v23, %v9085_v22  ;;  %5062 = vmatpush.bf16.msra.mxu1 %v8830_v25 }
  0xbd   :  { %v8813_v29 = vld [vmem:[#allocation5 + $0x1140] sm:$0xf]  ;;  %v10389_v33 = vld [vmem:[#allocation5 + $0x114c] sm:$0xf0]  ;;  %v8686_v48 = vor.u32 %v10357_v28, %v8685_v27  ;;  %5076 = vmatpush.bf16.msra.mxu2 %v8958_v26  ;;  %v147_v27 = vld [vmem:[#allocation2 + $0x88] sm:$0xff] }
  0xbe   :  { %v8941_v34 = vld [vmem:[#allocation5 + $0x1240] sm:$0xf]  ;;  %v10421_v37 = vld [vmem:[#allocation5 + $0x124c] sm:$0xf0]  ;;  %v8814_v50 = vor.u32 %v10389_v33, %v8813_v29  ;;  %5090 = vmatpush.bf16.msra.mxu3 %v9086_v30  ;;  %v171_v30 = vld [vmem:[#allocation2 + $0x148] sm:$0xff] }
  0xbf   :  { %v9069_v42 = vld [vmem:[#allocation5 + $0x1340] sm:$0xf]  ;;  %v10453_v45 = vld [vmem:[#allocation5 + $0x134c] sm:$0xf0]  ;;  %v8942_v51 = vor.u32 %v10421_v37, %v8941_v34  ;;  %5049 = vmatpush.bf16.msra.mxu0 %v8686_v48  ;;  %v149_v33 = vld [vmem:[#allocation2 + $0x98] sm:$0xff] }
  0xc0   :  { %v8669_v49 = vld [vmem:[#allocation5 + $0x1020] sm:$0xf]  ;;  %v10353_v52 = vld [vmem:[#allocation5 + $0x102c] sm:$0xf0]  ;;  %v9070_v55 = vor.u32 %v10453_v45, %v9069_v42  ;;  %5063 = vmatpush.bf16.msra.mxu1 %v8814_v50  ;;  %v173_v34 = vld [vmem:[#allocation2 + $0x158] sm:$0xff] }
  0xc1   :  { %v8797_v53 = vld [vmem:[#allocation5 + $0x1120] sm:$0xf]  ;;  %v10385_v54 = vld [vmem:[#allocation5 + $0x112c] sm:$0xf0]  ;;  %v8670_v63 = vor.u32 %v10353_v52, %v8669_v49  ;;  %5077 = vmatpush.bf16.msra.mxu2 %v8942_v51 }
  0xc2   :  { %v8925_v56 = vld [vmem:[#allocation5 + $0x1220] sm:$0xf]  ;;  %v10417_v57 = vld [vmem:[#allocation5 + $0x122c] sm:$0xf0]  ;;  %v8798_v5 = vor.u32 %v10385_v54, %v8797_v53  ;;  %5091 = vmatpush.bf16.msra.mxu3 %v9070_v55 }
  0xc3   :  { %v9053_v59 = vld [vmem:[#allocation5 + $0x1320] sm:$0xf]  ;;  %v10449_v60 = vld [vmem:[#allocation5 + $0x132c] sm:$0xf0]  ;;  %v8926_v6 = vor.u32 %v10417_v57, %v8925_v56  ;;  %5050 = vmatpush.bf16.msra.mxu0 %v8670_v63  ;;  %v11001_v56 = vpack.c.bf16 %v171_v30, %v147_v27 }
  0xc4   :  { %v8653_v61 = vld [vmem:[#allocation5 + $0x1000] sm:$0xf]  ;;  %v10349_v62 = vld [vmem:[#allocation5 + $0x100c] sm:$0xf0]  ;;  %v9054_v11 = vor.u32 %v10449_v60, %v9053_v59  ;;  %5064 = vmatpush.bf16.msra.mxu1 %v8798_v5  ;;  %v11003_v60 = vpack.c.bf16 %v173_v34, %v149_v33 }
  0xc5   :  { %v8781_v0 = vld [vmem:[#allocation5 + $0x1100] sm:$0xf]  ;;  %v10381_v2 = vld [vmem:[#allocation5 + $0x110c] sm:$0xf0]  ;;  %v8654_v19 = vor.u32 %v10349_v62, %v8653_v61  ;;  %5078 = vmatpush.bf16.msra.mxu2 %v8926_v6 }
  0xc6   :  { %v8909_v3 = vld [vmem:[#allocation5 + $0x1200] sm:$0xf]  ;;  %v10413_v4 = vld [vmem:[#allocation5 + $0x120c] sm:$0xf0]  ;;  %v8782_v23 = vor.u32 %v10381_v2, %v8781_v0  ;;  %5092 = vmatpush.bf16.msra.mxu3 %v9054_v11 }
  0xc7   :  { %v9037_v7 = vld [vmem:[#allocation5 + $0x1300] sm:$0xf]  ;;  %v10445_v8 = vld [vmem:[#allocation5 + $0x130c] sm:$0xf0]  ;;  %v8910_v24 = vor.u32 %v10413_v4, %v8909_v3  ;;  %5051 = vmatpush.bf16.msra.mxu0 %v8654_v19 }
  0xc8   :  { %v9277_v9 = vld [vmem:[#allocation5 + $0x14e0] sm:$0xf]  ;;  %v10505_v12 = vld [vmem:[#allocation5 + $0x14ec] sm:$0xf0]  ;;  %v9038_v28 = vor.u32 %v10445_v8, %v9037_v7  ;;  %5065 = vmatpush.bf16.msra.mxu1 %v8782_v23 }
  0xc9   :  { %v9405_v13 = vld [vmem:[#allocation5 + $0x15e0] sm:$0xf]  ;;  %v10537_v14 = vld [vmem:[#allocation5 + $0x15ec] sm:$0xf0]  ;;  %v9278_v29 = vor.u32 %v10505_v12, %v9277_v9  ;;  %5079 = vmatpush.bf16.msra.mxu2 %v8910_v24 }
  0xca   :  { %v9533_v15 = vld [vmem:[#allocation5 + $0x16e0] sm:$0xf]  ;;  %v10569_v16 = vld [vmem:[#allocation5 + $0x16ec] sm:$0xf0]  ;;  %v9406_v37 = vor.u32 %v10537_v14, %v9405_v13  ;;  %5093 = vmatpush.bf16.msra.mxu3 %v9038_v28 }
  0xcb   :  { %v9661_v18 = vld [vmem:[#allocation5 + $0x17e0] sm:$0xf]  ;;  %v10601_v20 = vld [vmem:[#allocation5 + $0x17ec] sm:$0xf0]  ;;  %v9534_v42 = vor.u32 %v10569_v16, %v9533_v15  ;;  %5100 = vmatpush.bf16.msrb.mxu0 %v9278_v29  ;;  %5066 = vmatmul.bf16.vlgmr.msra.gmra.mxu1 %v11001_v56 }
  0xcc   :  { %v146_v21 = vld [vmem:[#allocation2 + $0x80] sm:$0xff]  ;;  %v148_v25 = vld [vmem:[#allocation2 + $0x90] sm:$0xff]  ;;  %v9662_v50 = vor.u32 %v10601_v20, %v9661_v18  ;;  %5114 = vmatpush.bf16.msrb.mxu1 %v9406_v37 }
  0xcd   :  { %v170_v22 = vld [vmem:[#allocation2 + $0x140] sm:$0xff]  ;;  %v172_v26 = vld [vmem:[#allocation2 + $0x150] sm:$0xff]  ;;  %5128 = vmatpush.bf16.msrb.mxu2 %v9534_v42  ;;  %5094 = vmatmul.bf16.vlgmr.msra.gmra.mxu3 %v11003_v60 }
  0xce   :  { %v9261_v45 = vld [vmem:[#allocation5 + $0x14c0] sm:$0xf]  ;;  %v10501_v48 = vld [vmem:[#allocation5 + $0x14cc] sm:$0xf0]  ;;  %v10997_v51 = vpack.c.bf16 %v170_v22, %v146_v21  ;;  %v10999_v55 = vpack.c.bf16 %v172_v26, %v148_v25  ;;  %5142 = vmatpush.bf16.msrb.mxu3 %v9662_v50  ;;  %v4829_v26 = vpop.f32.mrf.mxu0 }
  0xcf   :  { %v9389_v49 = vld [vmem:[#allocation5 + $0x15c0] sm:$0xf]  ;;  %v10533_v52 = vld [vmem:[#allocation5 + $0x15cc] sm:$0xf0]  ;;  %v9262_v61 = vor.u32 %v10501_v48, %v9261_v45 }
  0xd0   :  { %v9517_v53 = vld [vmem:[#allocation5 + $0x16c0] sm:$0xf]  ;;  %v10565_v54 = vld [vmem:[#allocation5 + $0x16cc] sm:$0xf0]  ;;  %v9390_v63 = vor.u32 %v10533_v52, %v9389_v49  ;;  %5052 = vmatmul.bf16.vlgmr.msra.gmra.mxu0 %v10997_v51  ;;  %5080 = vmatmul.bf16.vlgmr.msra.gmra.mxu2 %v10999_v55 }
  0xd1   :  { %v9645_v57 = vld [vmem:[#allocation5 + $0x17c0] sm:$0xf]  ;;  %v10597_v59 = vld [vmem:[#allocation5 + $0x17cc] sm:$0xf0]  ;;  %v9518_v0 = vor.u32 %v10565_v54, %v9517_v53  ;;  %5101 = vmatpush.bf16.msrb.mxu0 %v9262_v61  ;;  %v4843_v53 = vpop.f32.mrf.mxu1 }
  0xd2   :  { %v9245_v62 = vld [vmem:[#allocation5 + $0x14a0] sm:$0xf]  ;;  %v10497_v2 = vld [vmem:[#allocation5 + $0x14ac] sm:$0xf0]  ;;  %v9646_v5 = vor.u32 %v10597_v59, %v9645_v57  ;;  %5115 = vmatpush.bf16.msrb.mxu1 %v9390_v63 }
  0xd3   :  { %v9373_v3 = vld [vmem:[#allocation5 + $0x15a0] sm:$0xf]  ;;  %v10529_v6 = vld [vmem:[#allocation5 + $0x15ac] sm:$0xf0]  ;;  %v9246_v12 = vor.u32 %v10497_v2, %v9245_v62  ;;  %5129 = vmatpush.bf16.msrb.mxu2 %v9518_v0 }
  0xd4   :  { %v11005_v4 = vld [vmem:[#allocation7] sm:$0xf]  ;;  %v10561_v8 = vld [vmem:[#allocation5 + $0x16ac] sm:$0xf0]  ;;  %v9374_v14 = vor.u32 %v10529_v6, %v9373_v3  ;;  %5143 = vmatpush.bf16.msrb.mxu3 %v9646_v5 }
  0xd5   :  { %v9501_v7 = vld [vmem:[#allocation5 + $0x16a0] sm:$0xf]  ;;  %v10593_v11 = vld [vmem:[#allocation5 + $0x17ac] sm:$0xf0]  ;;  %v11413_v13 = vperm.slane %v11005_v4, 0  ;;  %5102 = vmatpush.bf16.msrb.mxu0 %v9246_v12 }
  0xd6   :  { %v9629_v9 = vld [vmem:[#allocation5 + $0x17a0] sm:$0xf]  ;;  %v9502_v15 = vor.u32 %v10561_v8, %v9501_v7  ;;  %v10493_v18 = vld [vmem:[#allocation5 + $0x148c] sm:$0xf0]  ;;  %5116 = vmatpush.bf16.msrb.mxu1 %v9374_v14  ;;  %v4857_v7 = vpop.f32.mrf.mxu2 }
  0xd7   :  { %v9229_v16 = vld [vmem:[#allocation5 + $0x1480] sm:$0xf]  ;;  %v9630_v20 = vor.u32 %v10593_v11, %v9629_v9  ;;  %v10525_v21 = vld [vmem:[#allocation5 + $0x158c] sm:$0xf0]  ;;  %v4830_v28 = vadd.f32 %v4829_v26, %v11413_v13  ;;  %v10147_v13 = vld [vmem:[#allocation5 + $0x9c4] sm:$0xf] }
  0xd8   :  { %v9357_v19 = vld [vmem:[#allocation5 + $0x1580] sm:$0xf]  ;;  %v10557_v23 = vld [vmem:[#allocation5 + $0x168c] sm:$0xf0]  ;;  %v9230_v27 = vor.u32 %v10493_v18, %v9229_v16  ;;  %5130 = vmatpush.bf16.msrb.mxu2 %v9502_v15 }
  0xd9   :  { %v9485_v22 = vld [vmem:[#allocation5 + $0x1680] sm:$0xf]  ;;  %v10589_v25 = vld [vmem:[#allocation5 + $0x178c] sm:$0xf0]  ;;  %v9358_v29 = vor.u32 %v10525_v21, %v9357_v19  ;;  %5144 = vmatpush.bf16.msrb.mxu3 %v9630_v20  ;;  %v4844_v57 = vadd.f32 %v4843_v53, %v4830_v28 }
  0xda   :  { %v9613_v24 = vld [vmem:[#allocation5 + $0x1780] sm:$0xf]  ;;  %v9486_v30 = vor.u32 %v10557_v23, %v9485_v22  ;;  %v10489_v34 = vld [vmem:[#allocation5 + $0x146c] sm:$0xf0]  ;;  %5103 = vmatpush.bf16.msrb.mxu0 %v9230_v27 }
  0xdb   :  { %v9213_v33 = vld [vmem:[#allocation5 + $0x1460] sm:$0xf]  ;;  %v9614_v42 = vor.u32 %v10589_v25, %v9613_v24  ;;  %v10521_v45 = vld [vmem:[#allocation5 + $0x156c] sm:$0xf0]  ;;  %5117 = vmatpush.bf16.msrb.mxu1 %v9358_v29  ;;  %v4858_v11 = vadd.f32 %v4857_v7, %v4844_v57  ;;  %v4871_v25 = vpop.f32.mrf.mxu3  ;;  %v9895_v57 = vld [vmem:[#allocation5 + $0x1e4] sm:$0xf] }
  0xdc   :  { %v9341_v37 = vld [vmem:[#allocation5 + $0x1560] sm:$0xf]  ;;  %v10553_v49 = vld [vmem:[#allocation5 + $0x166c] sm:$0xf0]  ;;  %v9214_v54 = vor.u32 %v10489_v34, %v9213_v33  ;;  %5131 = vmatpush.bf16.msrb.mxu2 %v9486_v30 }
  0xdd   :  { %v9469_v48 = vld [vmem:[#allocation5 + $0x1660] sm:$0xf]  ;;  %v10585_v52 = vld [vmem:[#allocation5 + $0x176c] sm:$0xf0]  ;;  %v9342_v59 = vor.u32 %v10521_v45, %v9341_v37  ;;  %5145 = vmatpush.bf16.msrb.mxu3 %v9614_v42  ;;  %v11014_v29 = vadd.f32 %v4871_v25, %v4858_v11  ;;  %v151_v11 = vld [vmem:[#allocation2 + $0xa8] sm:$0xff] }
  0xde   :  { %v9597_v50 = vld [vmem:[#allocation5 + $0x1760] sm:$0xf]  ;;  %v9470_v61 = vor.u32 %v10553_v49, %v9469_v48  ;;  %v10485_v63 = vld [vmem:[#allocation5 + $0x144c] sm:$0xf0]  ;;  %5104 = vmatpush.bf16.msrb.mxu0 %v9214_v54  ;;  %v6719_v54 = vld [vmem:[#allocation5 + $0xf0] sm:$0xf0] }
  0xdf   :  { %v9197_v62 = vld [vmem:[#allocation5 + $0x1440] sm:$0xf]  ;;  %v9598_v2 = vor.u32 %v10585_v52, %v9597_v50  ;;  %v10517_v3 = vld [vmem:[#allocation5 + $0x154c] sm:$0xf0]  ;;  %5118 = vmatpush.bf16.msrb.mxu1 %v9342_v59  ;;  %v9863_v52 = vld [vmem:[#allocation5 + $0xe4] sm:$0xf] }
  0xe0   :  { %v9325_v0 = vld [vmem:[#allocation5 + $0x1540] sm:$0xf]  ;;  %v10549_v6 = vld [vmem:[#allocation5 + $0x164c] sm:$0xf0]  ;;  %v9198_v12 = vor.u32 %v10485_v63, %v9197_v62  ;;  %5132 = vmatpush.bf16.msrb.mxu2 %v9470_v61  ;;  %v6847_v59 = vld [vmem:[#allocation5 + $0x1f0] sm:$0xf0] }
  0xe1   :  { %v9453_v5 = vld [vmem:[#allocation5 + $0x1640] sm:$0xf]  ;;  %v10581_v9 = vld [vmem:[#allocation5 + $0x174c] sm:$0xf0]  ;;  %v9326_v15 = vor.u32 %v10517_v3, %v9325_v0  ;;  %5146 = vmatpush.bf16.msrb.mxu3 %v9598_v2  ;;  %v9927_v61 = vld [vmem:[#allocation5 + $0x2e4] sm:$0xf] }
  0xe2   :  { %v9581_v8 = vld [vmem:[#allocation5 + $0x1740] sm:$0xf]  ;;  %v9454_v16 = vor.u32 %v10549_v6, %v9453_v5  ;;  %v10481_v18 = vld [vmem:[#allocation5 + $0x142c] sm:$0xf0]  ;;  %5105 = vmatpush.bf16.msrb.mxu0 %v9198_v12  ;;  %v6975_v62 = vld [vmem:[#allocation5 + $0x2f0] sm:$0xf0] }
  0xe3   :  { %v9181_v14 = vld [vmem:[#allocation5 + $0x1420] sm:$0xf]  ;;  %v10513_v20 = vld [vmem:[#allocation5 + $0x152c] sm:$0xf0]  ;;  %v9582_v21 = vor.u32 %v10581_v9, %v9581_v8  ;;  %5119 = vmatpush.bf16.msrb.mxu1 %v9326_v15  ;;  %v9959_v63 = vld [vmem:[#allocation5 + $0x3e4] sm:$0xf] }
  0xe4   :  { %v9309_v19 = vld [vmem:[#allocation5 + $0x1520] sm:$0xf]  ;;  %v10545_v23 = vld [vmem:[#allocation5 + $0x162c] sm:$0xf0]  ;;  %v9182_v30 = vor.u32 %v10481_v18, %v9181_v14  ;;  %5133 = vmatpush.bf16.msrb.mxu2 %v9454_v16  ;;  %v7103_v2 = vld [vmem:[#allocation5 + $0x3f0] sm:$0xf0]  ;;  %v6722_v14 = vor.u32 %v9863_v52, %v6719_v54 }
  0xe5   :  { %v9437_v22 = vld [vmem:[#allocation5 + $0x1620] sm:$0xf]  ;;  %v10577_v26 = vld [vmem:[#allocation5 + $0x172c] sm:$0xf0]  ;;  %v9310_v45 = vor.u32 %v10513_v20, %v9309_v19  ;;  %5147 = vmatpush.bf16.msrb.mxu3 %v9582_v21  ;;  %v175_v15 = vld [vmem:[#allocation2 + $0x168] sm:$0xff]  ;;  %v6850_v19 = vor.u32 %v9895_v57, %v6847_v59  ;;  %v6978_v20 = vor.u32 %v9927_v61, %v6975_v62  ;;  %v11016_v21 = vpop.f32.mrf.mxu0  ;;  %v7106_v25 = vor.u32 %v9959_v63, %v7103_v2 }
  0xe6   :  { %v9565_v24 = vld [vmem:[#allocation5 + $0x1720] sm:$0xf]  ;;  %v10477_v28 = vld [vmem:[#allocation5 + $0x140c] sm:$0xf0]  ;;  %v9438_v48 = vor.u32 %v10545_v23, %v9437_v22  ;;  %5106 = vmatpush.bf16.msrb.mxu0 %v9182_v30  ;;  %v153_v16 = vld [vmem:[#allocation2 + $0xb8] sm:$0xff] }
  0xe7   :  { %v9165_v27 = vld [vmem:[#allocation5 + $0x1400] sm:$0xf]  ;;  %v10509_v34 = vld [vmem:[#allocation5 + $0x150c] sm:$0xf0]  ;;  %v9566_v53 = vor.u32 %v10577_v26, %v9565_v24  ;;  %5120 = vmatpush.bf16.msrb.mxu1 %v9310_v45  ;;  %v177_v18 = vld [vmem:[#allocation2 + $0x178] sm:$0xff]  ;;  %v11024_v45 = vpop.f32.mrf.mxu1 }
  0xe8   :  { %v9293_v33 = vld [vmem:[#allocation5 + $0x1500] sm:$0xf]  ;;  %v10541_v42 = vld [vmem:[#allocation5 + $0x160c] sm:$0xf0]  ;;  %v9166_v0 = vor.u32 %v10477_v28, %v9165_v27  ;;  %5134 = vmatpush.bf16.msrb.mxu2 %v9438_v48  ;;  %v9859_v22 = vld [vmem:[#allocation5 + $0xc4] sm:$0xf]  ;;  %v11026_v48 = vpack.c.bf16 %v177_v18, %v153_v16 }
  0xe9   :  { %v9421_v37 = vld [vmem:[#allocation5 + $0x1600] sm:$0xf]  ;;  %v10573_v50 = vld [vmem:[#allocation5 + $0x170c] sm:$0xf0]  ;;  %v9294_v6 = vor.u32 %v10509_v34, %v9293_v33  ;;  %5148 = vmatpush.bf16.msrb.mxu3 %v9566_v53  ;;  %v6703_v23 = vld [vmem:[#allocation5 + $0xd0] sm:$0xf0]  ;;  %v11022_v34 = vpack.c.bf16 %v175_v15, %v151_v11 }
  0xea   :  { %v9549_v49 = vld [vmem:[#allocation5 + $0x1700] sm:$0xf]  ;;  %v9422_v7 = vor.u32 %v10541_v42, %v9421_v37  ;;  %v152_v8 = vld [vmem:[#allocation2 + $0xb0] sm:$0xff]  ;;  %v9891_v24 = vld [vmem:[#allocation5 + $0x1c4] sm:$0xf]  ;;  %5107 = vmatpush.bf16.msrb.mxu0 %v9166_v0 }
  0xeb   :  { %v150_v3 = vld [vmem:[#allocation2 + $0xa0] sm:$0xff]  ;;  %v176_v9 = vld [vmem:[#allocation2 + $0x170] sm:$0xff]  ;;  %v9550_v12 = vor.u32 %v10573_v50, %v9549_v49  ;;  %5121 = vmatpush.bf16.msrb.mxu1 %v9294_v6  ;;  %v6706_v49 = vor.u32 %v9859_v22, %v6703_v23 }
  0xec   :  { %v174_v5 = vld [vmem:[#allocation2 + $0x160] sm:$0xff]  ;;  %v6831_v27 = vld [vmem:[#allocation5 + $0x1d0] sm:$0xf0]  ;;  %5135 = vmatpush.bf16.msrb.mxu2 %v9422_v7  ;;  %v11020_v33 = vpack.c.bf16 %v176_v9, %v152_v8 }
  0xed   :  { %v11018_v26 = vpack.c.bf16 %v174_v5, %v150_v3  ;;  %v9923_v28 = vld [vmem:[#allocation5 + $0x2c4] sm:$0xf]  ;;  %v6959_v30 = vld [vmem:[#allocation5 + $0x2d0] sm:$0xf0]  ;;  %5149 = vmatpush.bf16.msrb.mxu3 %v9550_v12  ;;  %v6834_v50 = vor.u32 %v9891_v24, %v6831_v27  ;;  %v11032_v5 = vpop.f32.mrf.mxu2 }
  0xee   :  { %v9955_v37 = vld [vmem:[#allocation5 + $0x3c4] sm:$0xf]  ;;  %v7087_v42 = vld [vmem:[#allocation5 + $0x3d0] sm:$0xf0]  ;;  %5156 = vmatpush.bf16.msra.mxu0 %v6722_v14  ;;  %v6962_v52 = vor.u32 %v9923_v28, %v6959_v30  ;;  %5122 = vmatmul.bf16.vlgmr.msrb.gmra.mxu1 %v11022_v34  ;;  %v11034_v14 = vpop.f32.mrf.mxu3 }
  0xef   :  { %5170 = vmatpush.bf16.msra.mxu1 %v6850_v19  ;;  %v9855_v53 = vld [vmem:[#allocation5 + $0xa4] sm:$0xf]  ;;  %v6687_v54 = vld [vmem:[#allocation5 + $0xb0] sm:$0xf0]  ;;  %5108 = vmatmul.bf16.vlgmr.msrb.gmra.mxu0 %v11018_v26  ;;  %v7090_v59 = vor.u32 %v9955_v37, %v7087_v42  ;;  %11415 = vst [vmem:[#allocation20_spill] sm:$0xff] %v11034_v14  ;;  %v4885_v19 = vpop.f32.mrf.mxu0  ;;  %v4899_v28 = vpop.f32.mrf.mxu1 }
  0xf0   :  { %5184 = vmatpush.bf16.msra.mxu2 %v6978_v20  ;;  %v9887_v57 = vld [vmem:[#allocation5 + $0x1a4] sm:$0xf]  ;;  %v6815_v61 = vld [vmem:[#allocation5 + $0x1b0] sm:$0xf0]  ;;  %5150 = vmatmul.bf16.vlgmr.msrb.gmra.mxu3 %v11026_v48  ;;  %v6690_v3 = vor.u32 %v9855_v53, %v6687_v54  ;;  %v4886_v23 = vadd.f32 %v4885_v19, %v11014_v29  ;;  %v10054_v14 = vld [vmem:[#allocation5 + $0x6d4] sm:$0xf0] }
  0xf1   :  { %5198 = vmatpush.bf16.msra.mxu3 %v7106_v25  ;;  %v9919_v62 = vld [vmem:[#allocation5 + $0x2a4] sm:$0xf]  ;;  %v6943_v63 = vld [vmem:[#allocation5 + $0x2b0] sm:$0xf0]  ;;  %5136 = vmatmul.bf16.vlgmr.msrb.gmra.mxu2 %v11020_v33  ;;  %v6818_v6 = vor.u32 %v9887_v57, %v6815_v61 }
  0xf2   :  { %v9951_v0 = vld [vmem:[#allocation5 + $0x3a4] sm:$0xf]  ;;  %v7071_v2 = vld [vmem:[#allocation5 + $0x3b0] sm:$0xf0]  ;;  %5157 = vmatpush.bf16.msra.mxu0 %v6706_v49  ;;  %v6946_v7 = vor.u32 %v9919_v62, %v6943_v63 }
  0xf3   :  { %5171 = vmatpush.bf16.msra.mxu1 %v6834_v50  ;;  %v9851_v8 = vld [vmem:[#allocation5 + $0x84] sm:$0xf]  ;;  %v6671_v9 = vld [vmem:[#allocation5 + $0x90] sm:$0xf0]  ;;  %v7074_v12 = vor.u32 %v9951_v0, %v7071_v2  ;;  %v4900_v50 = vadd.f32 %v4899_v28, %v4886_v23 }
  0xf4   :  { %5185 = vmatpush.bf16.msra.mxu2 %v6962_v52  ;;  %v9883_v11 = vld [vmem:[#allocation5 + $0x184] sm:$0xf]  ;;  %v6799_v15 = vld [vmem:[#allocation5 + $0x190] sm:$0xf0]  ;;  %v6674_v24 = vor.u32 %v9851_v8, %v6671_v9 }
  0xf5   :  { %5199 = vmatpush.bf16.msra.mxu3 %v7090_v59  ;;  %v9915_v16 = vld [vmem:[#allocation5 + $0x284] sm:$0xf]  ;;  %v6927_v18 = vld [vmem:[#allocation5 + $0x290] sm:$0xf0]  ;;  %v6802_v25 = vor.u32 %v9883_v11, %v6799_v15 }
  0xf6   :  { %v9947_v20 = vld [vmem:[#allocation5 + $0x384] sm:$0xf]  ;;  %v7055_v22 = vld [vmem:[#allocation5 + $0x390] sm:$0xf0]  ;;  %5158 = vmatpush.bf16.msra.mxu0 %v6690_v3  ;;  %v6930_v27 = vor.u32 %v9915_v16, %v6927_v18  ;;  %v4927_v16 = vpop.f32.mrf.mxu3 }
  0xf7   :  { %5172 = vmatpush.bf16.msra.mxu1 %v6818_v6  ;;  %v9847_v30 = vld [vmem:[#allocation5 + $0x64] sm:$0xf]  ;;  %v6655_v37 = vld [vmem:[#allocation5 + $0x70] sm:$0xf0]  ;;  %v7058_v49 = vor.u32 %v9947_v20, %v7055_v22  ;;  %v4913_v6 = vpop.f32.mrf.mxu2 }
  0xf8   :  { %5186 = vmatpush.bf16.msra.mxu2 %v6946_v7  ;;  %v9879_v42 = vld [vmem:[#allocation5 + $0x164] sm:$0xf]  ;;  %v6783_v52 = vld [vmem:[#allocation5 + $0x170] sm:$0xf0]  ;;  %v6658_v61 = vor.u32 %v9847_v30, %v6655_v37  ;;  %v4914_v11 = vadd.f32 %v4913_v6, %v4900_v50 }
  0xf9   :  { %5200 = vmatpush.bf16.msra.mxu3 %v7074_v12  ;;  %v9911_v53 = vld [vmem:[#allocation5 + $0x264] sm:$0xf]  ;;  %v6911_v54 = vld [vmem:[#allocation5 + $0x270] sm:$0xf0]  ;;  %v6786_v29 = vor.u32 %v9879_v42, %v6783_v52 }
  0xfa   :  { %v9943_v57 = vld [vmem:[#allocation5 + $0x364] sm:$0xf]  ;;  %v7039_v59 = vld [vmem:[#allocation5 + $0x370] sm:$0xf0]  ;;  %5159 = vmatpush.bf16.msra.mxu0 %v6674_v24  ;;  %v6914_v62 = vor.u32 %v9911_v53, %v6911_v54  ;;  %v11037_v19 = vadd.f32 %v4927_v16, %v4914_v11 }
  0xfb   :  { %5173 = vmatpush.bf16.msra.mxu1 %v6802_v25  ;;  %v9843_v63 = vld [vmem:[#allocation5 + $0x44] sm:$0xf]  ;;  %v6639_v0 = vld [vmem:[#allocation5 + $0x50] sm:$0xf0]  ;;  %v7042_v3 = vor.u32 %v9943_v57, %v7039_v59 }
  0xfc   :  { %5187 = vmatpush.bf16.msra.mxu2 %v6930_v27  ;;  %v9875_v2 = vld [vmem:[#allocation5 + $0x144] sm:$0xf]  ;;  %v6767_v7 = vld [vmem:[#allocation5 + $0x150] sm:$0xf0]  ;;  %v6642_v18 = vor.u32 %v9843_v63, %v6639_v0 }
  0xfd   :  { %5201 = vmatpush.bf16.msra.mxu3 %v7058_v49  ;;  %v9907_v8 = vld [vmem:[#allocation5 + $0x244] sm:$0xf]  ;;  %v6895_v9 = vld [vmem:[#allocation5 + $0x250] sm:$0xf0]  ;;  %v6770_v20 = vor.u32 %v9875_v2, %v6767_v7 }
  0xfe   :  { %v9939_v12 = vld [vmem:[#allocation5 + $0x344] sm:$0xf]  ;;  %v7023_v15 = vld [vmem:[#allocation5 + $0x350] sm:$0xf0]  ;;  %5160 = vmatpush.bf16.msra.mxu0 %v6658_v61  ;;  %v6898_v22 = vor.u32 %v9907_v8, %v6895_v9 }
  0xff   :  { %5174 = vmatpush.bf16.msra.mxu1 %v6786_v29  ;;  %v9839_v23 = vld [vmem:[#allocation5 + $0x24] sm:$0xf]  ;;  %v6623_v24 = vld [vmem:[#allocation5 + $0x30] sm:$0xf0]  ;;  %v7026_v27 = vor.u32 %v9939_v12, %v7023_v15 }
 0x100   :  { %5188 = vmatpush.bf16.msra.mxu2 %v6914_v62  ;;  %v9871_v25 = vld [vmem:[#allocation5 + $0x124] sm:$0xf]  ;;  %v6751_v28 = vld [vmem:[#allocation5 + $0x130] sm:$0xf0]  ;;  %v6626_v50 = vor.u32 %v9839_v23, %v6623_v24 }
 0x101   :  { %5202 = vmatpush.bf16.msra.mxu3 %v7042_v3  ;;  %v9903_v30 = vld [vmem:[#allocation5 + $0x224] sm:$0xf]  ;;  %v6879_v37 = vld [vmem:[#allocation5 + $0x230] sm:$0xf0]  ;;  %v6754_v54 = vor.u32 %v9871_v25, %v6751_v28 }
 0x102   :  { %v9935_v42 = vld [vmem:[#allocation5 + $0x324] sm:$0xf]  ;;  %v7007_v49 = vld [vmem:[#allocation5 + $0x330] sm:$0xf0]  ;;  %5161 = vmatpush.bf16.msra.mxu0 %v6642_v18  ;;  %v6882_v57 = vor.u32 %v9903_v30, %v6879_v37 }
 0x103   :  { %v9835_v52 = vld [vmem:[#allocation5 + $0x4] sm:$0xf]  ;;  %v6607_v53 = vld [vmem:[#allocation5 + $0x10] sm:$0xf0]  ;;  %5175 = vmatpush.bf16.msra.mxu1 %v6770_v20  ;;  %v7010_v62 = vor.u32 %v9935_v42, %v7007_v49 }
 0x104   :  { %5189 = vmatpush.bf16.msra.mxu2 %v6898_v22  ;;  %v9867_v59 = vld [vmem:[#allocation5 + $0x104] sm:$0xf]  ;;  %v6735_v61 = vld [vmem:[#allocation5 + $0x110] sm:$0xf0]  ;;  %v6610_v8 = vor.u32 %v9835_v52, %v6607_v53  ;;  %v11039_v52 = vpop.f32.mrf.mxu0 }
 0x105   :  { %v9899_v29 = vld [vmem:[#allocation5 + $0x204] sm:$0xf]  ;;  %5203 = vmatpush.bf16.msra.mxu3 %v7026_v27  ;;  %v6863_v63 = vld [vmem:[#allocation5 + $0x210] sm:$0xf0]  ;;  %v6738_v15 = vor.u32 %v9867_v59, %v6735_v61  ;;  %11416 = vst [vmem:[#allocation21_spill] sm:$0xff] %v11039_v52 }
 0x106   :  { %v9931_v0 = vld [vmem:[#allocation5 + $0x304] sm:$0xf]  ;;  %v6991_v2 = vld [vmem:[#allocation5 + $0x310] sm:$0xf0]  ;;  %5162 = vmatpush.bf16.msra.mxu0 %v6626_v50  ;;  %v6866_v16 = vor.u32 %v9899_v29, %v6863_v63  ;;  %v9990_v52 = vld [vmem:[#allocation5 + $0x4d4] sm:$0xf0] }
 0x107   :  { %v9991_v3 = vld [vmem:[#allocation5 + $0x4e4] sm:$0xf]  ;;  %v7231_v6 = vld [vmem:[#allocation5 + $0x4f0] sm:$0xf0]  ;;  %5176 = vmatpush.bf16.msra.mxu1 %v6754_v54  ;;  %v6994_v22 = vor.u32 %v9931_v0, %v6991_v2 }
 0x108   :  { %v10023_v7 = vld [vmem:[#allocation5 + $0x5e4] sm:$0xf]  ;;  %v7359_v9 = vld [vmem:[#allocation5 + $0x5f0] sm:$0xf0]  ;;  %5190 = vmatpush.bf16.msra.mxu2 %v6882_v57  ;;  %v7234_v23 = vor.u32 %v9991_v3, %v7231_v6  ;;  %v11041_v57 = vpop.f32.mrf.mxu1 }
 0x109   :  { %v10055_v11 = vld [vmem:[#allocation5 + $0x6e4] sm:$0xf]  ;;  %v7487_v12 = vld [vmem:[#allocation5 + $0x6f0] sm:$0xf0]  ;;  %5204 = vmatpush.bf16.msra.mxu3 %v7010_v62  ;;  %v7362_v24 = vor.u32 %v10023_v7, %v7359_v9  ;;  %11417 = vst [vmem:[#allocation22_spill] sm:$0xff] %v11041_v57 }
 0x10a   :  { %v10087_v18 = vld [vmem:[#allocation5 + $0x7e4] sm:$0xf]  ;;  %v7615_v20 = vld [vmem:[#allocation5 + $0x7f0] sm:$0xf0]  ;;  %v7490_v25 = vor.u32 %v10055_v11, %v7487_v12  ;;  %5163 = vmatpush.bf16.msra.mxu0 %v6610_v8  ;;  %v9946_v57 = vld [vmem:[#allocation5 + $0x374] sm:$0xf0] }
 0x10b   :  { %v9987_v27 = vld [vmem:[#allocation5 + $0x4c4] sm:$0xf]  ;;  %v7215_v28 = vld [vmem:[#allocation5 + $0x4d0] sm:$0xf0]  ;;  %v7618_v37 = vor.u32 %v10087_v18, %v7615_v20  ;;  %5177 = vmatpush.bf16.msra.mxu1 %v6738_v15 }
 0x10c   :  { %v10019_v30 = vld [vmem:[#allocation5 + $0x5c4] sm:$0xf]  ;;  %v7343_v42 = vld [vmem:[#allocation5 + $0x5d0] sm:$0xf0]  ;;  %5191 = vmatpush.bf16.msra.mxu2 %v6866_v16  ;;  %v7218_v59 = vor.u32 %v9987_v27, %v7215_v28  ;;  %v11049_v28 = vpop.f32.mrf.mxu3 }
 0x10d   :  { %v10051_v49 = vld [vmem:[#allocation5 + $0x6c4] sm:$0xf]  ;;  %v7471_v50 = vld [vmem:[#allocation5 + $0x6d0] sm:$0xf0]  ;;  %5205 = vmatpush.bf16.msra.mxu3 %v6994_v22  ;;  %v7346_v61 = vor.u32 %v10019_v30, %v7343_v42  ;;  %5164 = vmatmul.bf16.vlgmr.msra.gmra.mxu0 %v10949_v58  ;;  %v11047_v22 = vpop.f32.mrf.mxu2  ;;  %11419 = vst [vmem:[#allocation24_spill] sm:$0xff] %v11049_v28  ;;  %v4941_v30 = vpop.f32.mrf.mxu0 }
 0x10e   :  { %v10083_v53 = vld [vmem:[#allocation5 + $0x7c4] sm:$0xf]  ;;  %v7599_v54 = vld [vmem:[#allocation5 + $0x7d0] sm:$0xf0]  ;;  %5212 = vmatpush.bf16.msrb.mxu0 %v7234_v23  ;;  %v7474_v29 = vor.u32 %v10051_v49, %v7471_v50  ;;  %5178 = vmatmul.bf16.vlgmr.msra.gmra.mxu1 %v10955_v10  ;;  %11418 = vst [vmem:[#allocation23_spill] sm:$0xff] %v11047_v22  ;;  %v4942_v49 = vadd.f32 %v4941_v30, %v11037_v19 }
 0x10f   :  { %5226 = vmatpush.bf16.msrb.mxu1 %v7362_v24  ;;  %v9983_v62 = vld [vmem:[#allocation5 + $0x4a4] sm:$0xf]  ;;  %v7199_v63 = vld [vmem:[#allocation5 + $0x4b0] sm:$0xf0]  ;;  %v7602_v2 = vor.u32 %v10083_v53, %v7599_v54  ;;  %5192 = vmatmul.bf16.vlgmr.msra.gmra.mxu2 %v10951_v1 }
 0x110   :  { %5240 = vmatpush.bf16.msrb.mxu2 %v7490_v25  ;;  %v10015_v0 = vld [vmem:[#allocation5 + $0x5a4] sm:$0xf]  ;;  %v7327_v3 = vld [vmem:[#allocation5 + $0x5b0] sm:$0xf0]  ;;  %v7202_v11 = vor.u32 %v9983_v62, %v7199_v63  ;;  %5206 = vmatmul.bf16.vlgmr.msra.gmra.mxu3 %v10957_v17  ;;  %v4955_v53 = vpop.f32.mrf.mxu1 }
 0x111   :  { %5254 = vmatpush.bf16.msrb.mxu3 %v7618_v37  ;;  %v10047_v6 = vld [vmem:[#allocation5 + $0x6a4] sm:$0xf]  ;;  %v7455_v7 = vld [vmem:[#allocation5 + $0x6b0] sm:$0xf0]  ;;  %v7330_v12 = vor.u32 %v10015_v0, %v7327_v3  ;;  %v4956_v0 = vadd.f32 %v4955_v53, %v4942_v49 }
 0x112   :  { %v10079_v8 = vld [vmem:[#allocation5 + $0x7a4] sm:$0xf]  ;;  %v7583_v9 = vld [vmem:[#allocation5 + $0x7b0] sm:$0xf0]  ;;  %5213 = vmatpush.bf16.msrb.mxu0 %v7218_v59  ;;  %v7458_v15 = vor.u32 %v10047_v6, %v7455_v7 }
 0x113   :  { %5227 = vmatpush.bf16.msrb.mxu1 %v7346_v61  ;;  %v9979_v16 = vld [vmem:[#allocation5 + $0x484] sm:$0xf]  ;;  %v7183_v18 = vld [vmem:[#allocation5 + $0x490] sm:$0xf0]  ;;  %v7586_v23 = vor.u32 %v10079_v8, %v7583_v9 }
 0x114   :  { %5241 = vmatpush.bf16.msrb.mxu2 %v7474_v29  ;;  %v10011_v20 = vld [vmem:[#allocation5 + $0x584] sm:$0xf]  ;;  %v7311_v24 = vld [vmem:[#allocation5 + $0x590] sm:$0xf0]  ;;  %v7186_v50 = vor.u32 %v9979_v16, %v7183_v18  ;;  %v4983_v30 = vpop.f32.mrf.mxu3 }
 0x115   :  { %5255 = vmatpush.bf16.msrb.mxu3 %v7602_v2  ;;  %v10043_v25 = vld [vmem:[#allocation5 + $0x684] sm:$0xf]  ;;  %v7439_v27 = vld [vmem:[#allocation5 + $0x690] sm:$0xf0]  ;;  %v7314_v54 = vor.u32 %v10011_v20, %v7311_v24  ;;  %v4969_v20 = vpop.f32.mrf.mxu2  ;;  %v11054_v22 = vpop.f32.mrf.mxu0 }
 0x116   :  { %v10075_v37 = vld [vmem:[#allocation5 + $0x784] sm:$0xf]  ;;  %v7567_v42 = vld [vmem:[#allocation5 + $0x790] sm:$0xf0]  ;;  %5214 = vmatpush.bf16.msrb.mxu0 %v7202_v11  ;;  %v7442_v59 = vor.u32 %v10043_v25, %v7439_v27  ;;  %v4970_v27 = vadd.f32 %v4969_v20, %v4956_v0  ;;  %11420 = vst [vmem:[#allocation25_spill] sm:$0xff] %v11054_v22 }
 0x117   :  { %5228 = vmatpush.bf16.msrb.mxu1 %v7330_v12  ;;  %v9975_v61 = vld [vmem:[#allocation5 + $0x464] sm:$0xf]  ;;  %v7167_v29 = vld [vmem:[#allocation5 + $0x470] sm:$0xf0]  ;;  %v7570_v63 = vor.u32 %v10075_v37, %v7567_v42 }
 0x118   :  { %5242 = vmatpush.bf16.msrb.mxu2 %v7458_v15  ;;  %v10007_v62 = vld [vmem:[#allocation5 + $0x564] sm:$0xf]  ;;  %v7295_v2 = vld [vmem:[#allocation5 + $0x570] sm:$0xf0]  ;;  %v7170_v9 = vor.u32 %v9975_v61, %v7167_v29 }
 0x119   :  { %5256 = vmatpush.bf16.msrb.mxu3 %v7586_v23  ;;  %v10039_v3 = vld [vmem:[#allocation5 + $0x664] sm:$0xf]  ;;  %v7423_v6 = vld [vmem:[#allocation5 + $0x670] sm:$0xf0]  ;;  %v7298_v19 = vor.u32 %v10007_v62, %v7295_v2 }
 0x11a   :  { %v10071_v7 = vld [vmem:[#allocation5 + $0x764] sm:$0xf]  ;;  %v7551_v8 = vld [vmem:[#allocation5 + $0x770] sm:$0xf0]  ;;  %5215 = vmatpush.bf16.msrb.mxu0 %v7186_v50  ;;  %v7426_v11 = vor.u32 %v10039_v3, %v7423_v6  ;;  %v11052_v50 = vadd.f32 %v4983_v30, %v4970_v27 }
 0x11b   :  { %5229 = vmatpush.bf16.msrb.mxu1 %v7314_v54  ;;  %v9971_v12 = vld [vmem:[#allocation5 + $0x444] sm:$0xf]  ;;  %v7151_v15 = vld [vmem:[#allocation5 + $0x450] sm:$0xf0]  ;;  %v7554_v18 = vor.u32 %v10071_v7, %v7551_v8 }
 0x11c   :  { %5243 = vmatpush.bf16.msrb.mxu2 %v7442_v59  ;;  %v10003_v16 = vld [vmem:[#allocation5 + $0x544] sm:$0xf]  ;;  %v7279_v23 = vld [vmem:[#allocation5 + $0x550] sm:$0xf0]  ;;  %v7154_v49 = vor.u32 %v9971_v12, %v7151_v15 }
 0x11d   :  { %5257 = vmatpush.bf16.msrb.mxu3 %v7570_v63  ;;  %v10035_v24 = vld [vmem:[#allocation5 + $0x644] sm:$0xf]  ;;  %v7407_v25 = vld [vmem:[#allocation5 + $0x650] sm:$0xf0]  ;;  %v7282_v53 = vor.u32 %v10003_v16, %v7279_v23 }
 0x11e   :  { %v10067_v37 = vld [vmem:[#allocation5 + $0x744] sm:$0xf]  ;;  %v7535_v42 = vld [vmem:[#allocation5 + $0x750] sm:$0xf0]  ;;  %5216 = vmatpush.bf16.msrb.mxu0 %v7170_v9  ;;  %v7410_v54 = vor.u32 %v10035_v24, %v7407_v25 }
 0x11f   :  { %5230 = vmatpush.bf16.msrb.mxu1 %v7298_v19  ;;  %v9967_v59 = vld [vmem:[#allocation5 + $0x424] sm:$0xf]  ;;  %v7135_v61 = vld [vmem:[#allocation5 + $0x430] sm:$0xf0]  ;;  %v7538_v62 = vor.u32 %v10067_v37, %v7535_v42 }
 0x120   :  { %5244 = vmatpush.bf16.msrb.mxu2 %v7426_v11  ;;  %v9999_v29 = vld [vmem:[#allocation5 + $0x524] sm:$0xf]  ;;  %v7263_v63 = vld [vmem:[#allocation5 + $0x530] sm:$0xf0]  ;;  %v7138_v7 = vor.u32 %v9967_v59, %v7135_v61 }
 0x121   :  { %5258 = vmatpush.bf16.msrb.mxu3 %v7554_v18  ;;  %v10031_v2 = vld [vmem:[#allocation5 + $0x624] sm:$0xf]  ;;  %v7391_v3 = vld [vmem:[#allocation5 + $0x630] sm:$0xf0]  ;;  %v7266_v19 = vor.u32 %v9999_v29, %v7263_v63 }
 0x122   :  { %v10063_v0 = vld [vmem:[#allocation5 + $0x724] sm:$0xf]  ;;  %v7519_v6 = vld [vmem:[#allocation5 + $0x730] sm:$0xf0]  ;;  %5217 = vmatpush.bf16.msrb.mxu0 %v7154_v49  ;;  %v7394_v11 = vor.u32 %v10031_v2, %v7391_v3 }
 0x123   :  { %v9963_v8 = vld [vmem:[#allocation5 + $0x404] sm:$0xf]  ;;  %v7119_v9 = vld [vmem:[#allocation5 + $0x410] sm:$0xf0]  ;;  %5231 = vmatpush.bf16.msrb.mxu1 %v7282_v53  ;;  %v7522_v20 = vor.u32 %v10063_v0, %v7519_v6 }
 0x124   :  { %5245 = vmatpush.bf16.msrb.mxu2 %v7410_v54  ;;  %v9995_v12 = vld [vmem:[#allocation5 + $0x504] sm:$0xf]  ;;  %v7247_v15 = vld [vmem:[#allocation5 + $0x510] sm:$0xf0]  ;;  %v7122_v37 = vor.u32 %v9963_v8, %v7119_v9 }
 0x125   :  { %v10027_v16 = vld [vmem:[#allocation5 + $0x604] sm:$0xf]  ;;  %5259 = vmatpush.bf16.msrb.mxu3 %v7538_v62  ;;  %v7375_v18 = vld [vmem:[#allocation5 + $0x610] sm:$0xf0]  ;;  %v7250_v53 = vor.u32 %v9995_v12, %v7247_v15  ;;  %v11056_v12 = vpop.f32.mrf.mxu1 }
 0x126   :  { %v10059_v23 = vld [vmem:[#allocation5 + $0x704] sm:$0xf]  ;;  %v7503_v24 = vld [vmem:[#allocation5 + $0x710] sm:$0xf0]  ;;  %5218 = vmatpush.bf16.msrb.mxu0 %v7138_v7  ;;  %v7378_v54 = vor.u32 %v10027_v16, %v7375_v18  ;;  %11421 = vst [vmem:[#allocation26_spill] sm:$0xff] %v11056_v12 }
 0x127   :  { %v10119_v25 = vld [vmem:[#allocation5 + $0x8e4] sm:$0xf]  ;;  %v7743_v27 = vld [vmem:[#allocation5 + $0x8f0] sm:$0xf0]  ;;  %5232 = vmatpush.bf16.msrb.mxu1 %v7266_v19  ;;  %v7506_v62 = vor.u32 %v10059_v23, %v7503_v24 }
 0x128   :  { %v10151_v30 = vld [vmem:[#allocation5 + $0x9e4] sm:$0xf]  ;;  %v7871_v42 = vld [vmem:[#allocation5 + $0x9f0] sm:$0xf0]  ;;  %5246 = vmatpush.bf16.msrb.mxu2 %v7394_v11  ;;  %v7746_v63 = vor.u32 %v10119_v25, %v7743_v27 }
 0x129   :  { %v10183_v49 = vld [vmem:[#allocation5 + $0xae4] sm:$0xf]  ;;  %v7999_v59 = vld [vmem:[#allocation5 + $0xaf0] sm:$0xf0]  ;;  %5260 = vmatpush.bf16.msrb.mxu3 %v7522_v20  ;;  %v7874_v2 = vor.u32 %v10151_v30, %v7871_v42 }
 0x12a   :  { %v10215_v61 = vld [vmem:[#allocation5 + $0xbe4] sm:$0xf]  ;;  %v8127_v29 = vld [vmem:[#allocation5 + $0xbf0] sm:$0xf0]  ;;  %v8002_v3 = vor.u32 %v10183_v49, %v7999_v59  ;;  %5219 = vmatpush.bf16.msrb.mxu0 %v7122_v37 }
 0x12b   :  { %v10115_v0 = vld [vmem:[#allocation5 + $0x8c4] sm:$0xf]  ;;  %v7727_v6 = vld [vmem:[#allocation5 + $0x8d0] sm:$0xf0]  ;;  %v8130_v7 = vor.u32 %v10215_v61, %v8127_v29  ;;  %5233 = vmatpush.bf16.msrb.mxu1 %v7250_v53  ;;  %v11062_v29 = vpop.f32.mrf.mxu2 }
 0x12c   :  { %v7855_v8 = vld [vmem:[#allocation5 + $0x9d0] sm:$0xf0]  ;;  %v10179_v9 = vld [vmem:[#allocation5 + $0xac4] sm:$0xf]  ;;  %5247 = vmatpush.bf16.msrb.mxu2 %v7378_v54  ;;  %v7730_v15 = vor.u32 %v10115_v0, %v7727_v6  ;;  %11422 = vst [vmem:[#allocation27_spill] sm:$0xff] %v11062_v29  ;;  %v11064_v0 = vpop.f32.mrf.mxu3  ;;  %v4997_v6 = vpop.f32.mrf.mxu0 }
 0x12d   :  { %v7983_v28 = vld [vmem:[#allocation5 + $0xad0] sm:$0xf0]  ;;  %v10211_v19 = vld [vmem:[#allocation5 + $0xbc4] sm:$0xf]  ;;  %5261 = vmatpush.bf16.msrb.mxu3 %v7506_v62  ;;  %v7858_v16 = vor.u32 %v10147_v13, %v7855_v8  ;;  %5220 = vmatmul.bf16.vlgmr.msrb.gmra.mxu0 %v10961_v39  ;;  %11423 = vst [vmem:[#allocation28_spill] sm:$0xff] %v11064_v0 }
 0x12e   :  { %v8111_v11 = vld [vmem:[#allocation5 + $0xbd0] sm:$0xf0]  ;;  %5268 = vmatpush.bf16.msra.mxu0 %v7746_v63  ;;  %v7986_v20 = vor.u32 %v10179_v9, %v7983_v28  ;;  %v10111_v18 = vld [vmem:[#allocation5 + $0x8a4] sm:$0xf]  ;;  %5234 = vmatmul.bf16.vlgmr.msrb.gmra.mxu1 %v10965_v44  ;;  %v4998_v9 = vadd.f32 %v4997_v6, %v11052_v50 }
 0x12f   :  { %5282 = vmatpush.bf16.msra.mxu1 %v7874_v2  ;;  %v7711_v23 = vld [vmem:[#allocation5 + $0x8b0] sm:$0xf0]  ;;  %v10143_v24 = vld [vmem:[#allocation5 + $0x9a4] sm:$0xf]  ;;  %v8114_v25 = vor.u32 %v10211_v19, %v8111_v11  ;;  %5248 = vmatmul.bf16.vlgmr.msrb.gmra.mxu2 %v10963_v43  ;;  %v5011_v11 = vpop.f32.mrf.mxu1 }
 0x130   :  { %5296 = vmatpush.bf16.msra.mxu2 %v8002_v3  ;;  %v7839_v27 = vld [vmem:[#allocation5 + $0x9b0] sm:$0xf0]  ;;  %v10175_v30 = vld [vmem:[#allocation5 + $0xaa4] sm:$0xf]  ;;  %5262 = vmatmul.bf16.vlgmr.msrb.gmra.mxu3 %v10967_v47  ;;  %v7714_v13 = vor.u32 %v10111_v18, %v7711_v23 }
 0x131   :  { %5310 = vmatpush.bf16.msra.mxu3 %v8130_v7  ;;  %v7967_v37 = vld [vmem:[#allocation5 + $0xab0] sm:$0xf0]  ;;  %v10207_v42 = vld [vmem:[#allocation5 + $0xba4] sm:$0xf]  ;;  %v7842_v28 = vor.u32 %v10143_v24, %v7839_v27 }
 0x132   :  { %v8095_v49 = vld [vmem:[#allocation5 + $0xbb0] sm:$0xf0]  ;;  %5269 = vmatpush.bf16.msra.mxu0 %v7730_v15  ;;  %v7970_v59 = vor.u32 %v10175_v30, %v7967_v37  ;;  %v10107_v53 = vld [vmem:[#allocation5 + $0x884] sm:$0xf] }
 0x133   :  { %5283 = vmatpush.bf16.msra.mxu1 %v7858_v16  ;;  %v7695_v54 = vld [vmem:[#allocation5 + $0x890] sm:$0xf0]  ;;  %v10139_v61 = vld [vmem:[#allocation5 + $0x984] sm:$0xf]  ;;  %v8098_v62 = vor.u32 %v10207_v42, %v8095_v49 }
 0x134   :  { %5297 = vmatpush.bf16.msra.mxu2 %v7986_v20  ;;  %v7823_v63 = vld [vmem:[#allocation5 + $0x990] sm:$0xf0]  ;;  %v10171_v2 = vld [vmem:[#allocation5 + $0xa84] sm:$0xf]  ;;  %v7698_v19 = vor.u32 %v10107_v53, %v7695_v54  ;;  %v11069_v22 = vpop.f32.mrf.mxu0 }
 0x135   :  { %5311 = vmatpush.bf16.msra.mxu3 %v8114_v25  ;;  %v7951_v3 = vld [vmem:[#allocation5 + $0xa90] sm:$0xf0]  ;;  %v10203_v7 = vld [vmem:[#allocation5 + $0xb84] sm:$0xf]  ;;  %v7826_v15 = vor.u32 %v10139_v61, %v7823_v63  ;;  %v5012_v25 = vadd.f32 %v5011_v11, %v4998_v9  ;;  %v5025_v63 = vpop.f32.mrf.mxu2  ;;  %11424 = vst [vmem:[#allocation29_spill] sm:$0xff] %v11069_v22 }
 0x136   :  { %v8079_v8 = vld [vmem:[#allocation5 + $0xb90] sm:$0xf0]  ;;  %5270 = vmatpush.bf16.msra.mxu0 %v7714_v13  ;;  %v7954_v16 = vor.u32 %v10171_v2, %v7951_v3  ;;  %v10103_v20 = vld [vmem:[#allocation5 + $0x864] sm:$0xf] }
 0x137   :  { %5284 = vmatpush.bf16.msra.mxu1 %v7842_v28  ;;  %v7679_v18 = vld [vmem:[#allocation5 + $0x870] sm:$0xf0]  ;;  %v10135_v23 = vld [vmem:[#allocation5 + $0x964] sm:$0xf]  ;;  %v8082_v24 = vor.u32 %v10203_v7, %v8079_v8  ;;  %v5026_v6 = vadd.f32 %v5025_v63, %v5012_v25  ;;  %v5039_v7 = vpop.f32.mrf.mxu3 }
 0x138   :  { %5298 = vmatpush.bf16.msra.mxu2 %v7970_v59  ;;  %v7807_v27 = vld [vmem:[#allocation5 + $0x970] sm:$0xf0]  ;;  %v10167_v30 = vld [vmem:[#allocation5 + $0xa64] sm:$0xf]  ;;  %v7682_v13 = vor.u32 %v10103_v20, %v7679_v18 }
 0x139   :  { %5312 = vmatpush.bf16.msra.mxu3 %v8098_v62  ;;  %v7935_v37 = vld [vmem:[#allocation5 + $0xa70] sm:$0xf0]  ;;  %v10199_v42 = vld [vmem:[#allocation5 + $0xb64] sm:$0xf]  ;;  %v7810_v50 = vor.u32 %v10135_v23, %v7807_v27  ;;  %v11067_v11 = vadd.f32 %v5039_v7, %v5026_v6 }
 0x13a   :  { %v8063_v49 = vld [vmem:[#allocation5 + $0xb70] sm:$0xf0]  ;;  %5271 = vmatpush.bf16.msra.mxu0 %v7698_v19  ;;  %v7938_v28 = vor.u32 %v10167_v30, %v7935_v37  ;;  %v10099_v59 = vld [vmem:[#allocation5 + $0x844] sm:$0xf] }
 0x13b   :  { %5285 = vmatpush.bf16.msra.mxu1 %v7826_v15  ;;  %v7663_v53 = vld [vmem:[#allocation5 + $0x850] sm:$0xf0]  ;;  %v10131_v54 = vld [vmem:[#allocation5 + $0x944] sm:$0xf]  ;;  %v8066_v61 = vor.u32 %v10199_v42, %v8063_v49 }
 0x13c   :  { %5299 = vmatpush.bf16.msra.mxu2 %v7954_v16  ;;  %v7791_v62 = vld [vmem:[#allocation5 + $0x950] sm:$0xf0]  ;;  %v10163_v2 = vld [vmem:[#allocation5 + $0xa44] sm:$0xf]  ;;  %v7666_v19 = vor.u32 %v10099_v59, %v7663_v53 }
 0x13d   :  { %5313 = vmatpush.bf16.msra.mxu3 %v8082_v24  ;;  %v7919_v3 = vld [vmem:[#allocation5 + $0xa50] sm:$0xf0]  ;;  %v10195_v8 = vld [vmem:[#allocation5 + $0xb44] sm:$0xf]  ;;  %v7794_v15 = vor.u32 %v10131_v54, %v7791_v62 }
 0x13e   :  { %v8047_v9 = vld [vmem:[#allocation5 + $0xb50] sm:$0xf0]  ;;  %5272 = vmatpush.bf16.msra.mxu0 %v7682_v13  ;;  %v7922_v16 = vor.u32 %v10163_v2, %v7919_v3  ;;  %v10095_v20 = vld [vmem:[#allocation5 + $0x824] sm:$0xf] }
 0x13f   :  { %5286 = vmatpush.bf16.msra.mxu1 %v7810_v50  ;;  %v7647_v18 = vld [vmem:[#allocation5 + $0x830] sm:$0xf0]  ;;  %v10127_v23 = vld [vmem:[#allocation5 + $0x924] sm:$0xf]  ;;  %v8050_v24 = vor.u32 %v10195_v8, %v8047_v9 }
 0x140   :  { %5300 = vmatpush.bf16.msra.mxu2 %v7938_v28  ;;  %v7775_v27 = vld [vmem:[#allocation5 + $0x930] sm:$0xf0]  ;;  %v10159_v30 = vld [vmem:[#allocation5 + $0xa24] sm:$0xf]  ;;  %v7650_v49 = vor.u32 %v10095_v20, %v7647_v18 }
 0x141   :  { %5314 = vmatpush.bf16.msra.mxu3 %v8066_v61  ;;  %v7903_v37 = vld [vmem:[#allocation5 + $0xa30] sm:$0xf0]  ;;  %v10191_v25 = vld [vmem:[#allocation5 + $0xb24] sm:$0xf]  ;;  %v7778_v50 = vor.u32 %v10127_v23, %v7775_v27 }
 0x142   :  { %v8031_v42 = vld [vmem:[#allocation5 + $0xb30] sm:$0xf0]  ;;  %5273 = vmatpush.bf16.msra.mxu0 %v7666_v19  ;;  %v10091_v13 = vld [vmem:[#allocation5 + $0x804] sm:$0xf]  ;;  %v7906_v28 = vor.u32 %v10159_v30, %v7903_v37 }
 0x143   :  { %v7631_v59 = vld [vmem:[#allocation5 + $0x810] sm:$0xf0]  ;;  %5287 = vmatpush.bf16.msra.mxu1 %v7794_v15  ;;  %v10123_v53 = vld [vmem:[#allocation5 + $0x904] sm:$0xf]  ;;  %v8034_v62 = vor.u32 %v10191_v25, %v8031_v42 }
 0x144   :  { %5301 = vmatpush.bf16.msra.mxu2 %v7922_v16  ;;  %v7759_v54 = vld [vmem:[#allocation5 + $0x910] sm:$0xf0]  ;;  %v10155_v63 = vld [vmem:[#allocation5 + $0xa04] sm:$0xf]  ;;  %v7634_v9 = vor.u32 %v10091_v13, %v7631_v59 }
 0x145   :  { %5315 = vmatpush.bf16.msra.mxu3 %v8050_v24  ;;  %v7887_v61 = vld [vmem:[#allocation5 + $0xa10] sm:$0xf0]  ;;  %v10187_v2 = vld [vmem:[#allocation5 + $0xb04] sm:$0xf]  ;;  %v7762_v15 = vor.u32 %v10123_v53, %v7759_v54  ;;  %v11071_v53 = vpop.f32.mrf.mxu1 }
 0x146   :  { %v8015_v3 = vld [vmem:[#allocation5 + $0xb10] sm:$0xf0]  ;;  %v10247_v6 = vld [vmem:[#allocation5 + $0xce4] sm:$0xf]  ;;  %5274 = vmatpush.bf16.msra.mxu0 %v7650_v49  ;;  %v7890_v16 = vor.u32 %v10155_v63, %v7887_v61  ;;  %11425 = vst [vmem:[#allocation30_spill] sm:$0xff] %v11071_v53 }
 0x147   :  { %v8255_v7 = vld [vmem:[#allocation5 + $0xcf0] sm:$0xf0]  ;;  %v10279_v8 = vld [vmem:[#allocation5 + $0xde4] sm:$0xf]  ;;  %5288 = vmatpush.bf16.msra.mxu1 %v7778_v50  ;;  %v8018_v24 = vor.u32 %v10187_v2, %v8015_v3 }
 0x148   :  { %v8383_v19 = vld [vmem:[#allocation5 + $0xdf0] sm:$0xf0]  ;;  %v10311_v20 = vld [vmem:[#allocation5 + $0xee4] sm:$0xf]  ;;  %5302 = vmatpush.bf16.msra.mxu2 %v7906_v28  ;;  %v8258_v30 = vor.u32 %v10247_v6, %v8255_v7 }
 0x149   :  { %v8511_v18 = vld [vmem:[#allocation5 + $0xef0] sm:$0xf0]  ;;  %v10343_v23 = vld [vmem:[#allocation5 + $0xfe4] sm:$0xf]  ;;  %5316 = vmatpush.bf16.msra.mxu3 %v8034_v62  ;;  %v8386_v37 = vor.u32 %v10279_v8, %v8383_v19 }
 0x14a   :  { %v8639_v27 = vld [vmem:[#allocation5 + $0xff0] sm:$0xf0]  ;;  %v8514_v25 = vor.u32 %v10311_v20, %v8511_v18  ;;  %v10243_v42 = vld [vmem:[#allocation5 + $0xcc4] sm:$0xf]  ;;  %5275 = vmatpush.bf16.msra.mxu0 %v7634_v9 }
 0x14b   :  { %v8239_v0 = vld [vmem:[#allocation5 + $0xcd0] sm:$0xf0]  ;;  %v10275_v29 = vld [vmem:[#allocation5 + $0xdc4] sm:$0xf]  ;;  %v8642_v49 = vor.u32 %v10343_v23, %v8639_v27  ;;  %5289 = vmatpush.bf16.msra.mxu1 %v7762_v15  ;;  %v11077_v23 = vpop.f32.mrf.mxu2 }
 0x14c   :  { %v8367_v13 = vld [vmem:[#allocation5 + $0xdd0] sm:$0xf0]  ;;  %v10307_v59 = vld [vmem:[#allocation5 + $0xec4] sm:$0xf]  ;;  %5303 = vmatpush.bf16.msra.mxu2 %v7890_v16  ;;  %v8242_v54 = vor.u32 %v10243_v42, %v8239_v0  ;;  %11426 = vst [vmem:[#allocation31_spill] sm:$0xff] %v11077_v23 }
 0x14d   :  { %v8495_v12 = vld [vmem:[#allocation5 + $0xed0] sm:$0xf0]  ;;  %v10339_v50 = vld [vmem:[#allocation5 + $0xfc4] sm:$0xf]  ;;  %5317 = vmatpush.bf16.msra.mxu3 %v8018_v24  ;;  %v8370_v63 = vor.u32 %v10275_v29, %v8367_v13  ;;  %5276 = vmatmul.bf16.vlgmr.msra.gmra.mxu0 %v10973_v31  ;;  %v5053_v42 = vpop.f32.mrf.mxu0 }
 0x14e   :  { %v8623_v28 = vld [vmem:[#allocation5 + $0xfd0] sm:$0xf0]  ;;  %5324 = vmatpush.bf16.msrb.mxu0 %v8258_v30  ;;  %v8498_v62 = vor.u32 %v10307_v59, %v8495_v12  ;;  %v10239_v61 = vld [vmem:[#allocation5 + $0xca4] sm:$0xf]  ;;  %5290 = vmatmul.bf16.vlgmr.msra.gmra.mxu1 %v10977_v36  ;;  %v5054_v59 = vadd.f32 %v5053_v42, %v11067_v11 }
 0x14f   :  { %5338 = vmatpush.bf16.msrb.mxu1 %v8386_v37  ;;  %v8223_v2 = vld [vmem:[#allocation5 + $0xcb0] sm:$0xf0]  ;;  %v10271_v3 = vld [vmem:[#allocation5 + $0xda4] sm:$0xf]  ;;  %v8626_v6 = vor.u32 %v10339_v50, %v8623_v28  ;;  %5304 = vmatmul.bf16.vlgmr.msra.gmra.mxu2 %v10975_v35  ;;  %v5067_v28 = vpop.f32.mrf.mxu1 }
 0x150   :  { %5352 = vmatpush.bf16.msrb.mxu2 %v8514_v25  ;;  %v8351_v7 = vld [vmem:[#allocation5 + $0xdb0] sm:$0xf0]  ;;  %v10303_v8 = vld [vmem:[#allocation5 + $0xea4] sm:$0xf]  ;;  %5318 = vmatmul.bf16.vlgmr.msra.gmra.mxu3 %v10979_v40  ;;  %v8226_v12 = vor.u32 %v10239_v61, %v8223_v2  ;;  %v11079_v25 = vpop.f32.mrf.mxu3 }
 0x151   :  { %5366 = vmatpush.bf16.msrb.mxu3 %v8642_v49  ;;  %v8479_v9 = vld [vmem:[#allocation5 + $0xeb0] sm:$0xf0]  ;;  %v10335_v19 = vld [vmem:[#allocation5 + $0xfa4] sm:$0xf]  ;;  %v8354_v29 = vor.u32 %v10271_v3, %v8351_v7  ;;  %11427 = vst [vmem:[#allocation32_spill] sm:$0xff] %v11079_v25 }
 0x152   :  { %v8607_v0 = vld [vmem:[#allocation5 + $0xfb0] sm:$0xf0]  ;;  %5325 = vmatpush.bf16.msrb.mxu0 %v8242_v54  ;;  %v8482_v20 = vor.u32 %v10303_v8, %v8479_v9  ;;  %v10235_v18 = vld [vmem:[#allocation5 + $0xc84] sm:$0xf] }
 0x153   :  { %5339 = vmatpush.bf16.msrb.mxu1 %v8370_v63  ;;  %v8207_v15 = vld [vmem:[#allocation5 + $0xc90] sm:$0xf0]  ;;  %v10267_v16 = vld [vmem:[#allocation5 + $0xd84] sm:$0xf]  ;;  %v8610_v27 = vor.u32 %v10335_v19, %v8607_v0 }
 0x154   :  { %5353 = vmatpush.bf16.msrb.mxu2 %v8498_v62  ;;  %v8335_v24 = vld [vmem:[#allocation5 + $0xd90] sm:$0xf0]  ;;  %v10299_v30 = vld [vmem:[#allocation5 + $0xe84] sm:$0xf]  ;;  %v8210_v50 = vor.u32 %v10235_v18, %v8207_v15 }
 0x155   :  { %5367 = vmatpush.bf16.msrb.mxu3 %v8626_v6  ;;  %v8463_v37 = vld [vmem:[#allocation5 + $0xe90] sm:$0xf0]  ;;  %v10331_v49 = vld [vmem:[#allocation5 + $0xf84] sm:$0xf]  ;;  %v8338_v54 = vor.u32 %v10267_v16, %v8335_v24  ;;  %v5068_v6 = vadd.f32 %v5067_v28, %v5054_v59  ;;  %v5081_v24 = vpop.f32.mrf.mxu2  ;;  %v11084_v22 = vpop.f32.mrf.mxu0 }
 0x156   :  { %v8591_v13 = vld [vmem:[#allocation5 + $0xf90] sm:$0xf0]  ;;  %5326 = vmatpush.bf16.msrb.mxu0 %v8226_v12  ;;  %v8466_v63 = vor.u32 %v10299_v30, %v8463_v37  ;;  %v10231_v62 = vld [vmem:[#allocation5 + $0xc64] sm:$0xf]  ;;  %11428 = vst [vmem:[#allocation33_spill] sm:$0xff] %v11084_v22 }
 0x157   :  { %5340 = vmatpush.bf16.msrb.mxu1 %v8354_v29  ;;  %v8191_v61 = vld [vmem:[#allocation5 + $0xc70] sm:$0xf0]  ;;  %v10263_v2 = vld [vmem:[#allocation5 + $0xd64] sm:$0xf]  ;;  %v8594_v3 = vor.u32 %v10331_v49, %v8591_v13  ;;  %v5082_v42 = vadd.f32 %v5081_v24, %v5068_v6  ;;  %v6965_v22 = vld [vmem:[#allocation5 + $0x2c8] sm:$0xf] }
 0x158   :  { %5354 = vmatpush.bf16.msrb.mxu2 %v8482_v20  ;;  %v8319_v7 = vld [vmem:[#allocation5 + $0xd70] sm:$0xf0]  ;;  %v10295_v8 = vld [vmem:[#allocation5 + $0xe64] sm:$0xf]  ;;  %v8194_v12 = vor.u32 %v10231_v62, %v8191_v61  ;;  %v5095_v49 = vpop.f32.mrf.mxu3 }
 0x159   :  { %5368 = vmatpush.bf16.msrb.mxu3 %v8610_v27  ;;  %v8447_v9 = vld [vmem:[#allocation5 + $0xe70] sm:$0xf0]  ;;  %v10327_v19 = vld [vmem:[#allocation5 + $0xf64] sm:$0xf]  ;;  %v8322_v11 = vor.u32 %v10263_v2, %v8319_v7  ;;  %v11082_v28 = vadd.f32 %v5095_v49, %v5082_v42 }
 0x15a   :  { %v8575_v0 = vld [vmem:[#allocation5 + $0xf70] sm:$0xf0]  ;;  %5327 = vmatpush.bf16.msrb.mxu0 %v8210_v50  ;;  %v8450_v29 = vor.u32 %v10295_v8, %v8447_v9  ;;  %v10227_v20 = vld [vmem:[#allocation5 + $0xc44] sm:$0xf] }
 0x15b   :  { %5341 = vmatpush.bf16.msrb.mxu1 %v8338_v54  ;;  %v8175_v18 = vld [vmem:[#allocation5 + $0xc50] sm:$0xf0]  ;;  %v10259_v15 = vld [vmem:[#allocation5 + $0xd44] sm:$0xf]  ;;  %v8578_v16 = vor.u32 %v10327_v19, %v8575_v0 }
 0x15c   :  { %5355 = vmatpush.bf16.msrb.mxu2 %v8466_v63  ;;  %v8303_v27 = vld [vmem:[#allocation5 + $0xd50] sm:$0xf0]  ;;  %v10291_v30 = vld [vmem:[#allocation5 + $0xe44] sm:$0xf]  ;;  %v8178_v50 = vor.u32 %v10227_v20, %v8175_v18 }
 0x15d   :  { %5369 = vmatpush.bf16.msrb.mxu3 %v8594_v3  ;;  %v8431_v37 = vld [vmem:[#allocation5 + $0xe50] sm:$0xf0]  ;;  %v10323_v13 = vld [vmem:[#allocation5 + $0xf44] sm:$0xf]  ;;  %v8306_v54 = vor.u32 %v10259_v15, %v8303_v27 }
 0x15e   :  { %v8559_v59 = vld [vmem:[#allocation5 + $0xf50] sm:$0xf0]  ;;  %5328 = vmatpush.bf16.msrb.mxu0 %v8194_v12  ;;  %v8434_v63 = vor.u32 %v10291_v30, %v8431_v37  ;;  %v10223_v62 = vld [vmem:[#allocation5 + $0xc24] sm:$0xf] }
 0x15f   :  { %5342 = vmatpush.bf16.msrb.mxu1 %v8322_v11  ;;  %v8159_v61 = vld [vmem:[#allocation5 + $0xc30] sm:$0xf0]  ;;  %v10255_v2 = vld [vmem:[#allocation5 + $0xd24] sm:$0xf]  ;;  %v8562_v3 = vor.u32 %v10323_v13, %v8559_v59 }
 0x160   :  { %5356 = vmatpush.bf16.msrb.mxu2 %v8450_v29  ;;  %v8287_v7 = vld [vmem:[#allocation5 + $0xd30] sm:$0xf0]  ;;  %v10287_v8 = vld [vmem:[#allocation5 + $0xe24] sm:$0xf]  ;;  %v8162_v0 = vor.u32 %v10223_v62, %v8159_v61 }
 0x161   :  { %5370 = vmatpush.bf16.msrb.mxu3 %v8578_v16  ;;  %v8415_v9 = vld [vmem:[#allocation5 + $0xe30] sm:$0xf0]  ;;  %v10319_v6 = vld [vmem:[#allocation5 + $0xf24] sm:$0xf]  ;;  %v8290_v11 = vor.u32 %v10255_v2, %v8287_v7 }
 0x162   :  { %v8543_v19 = vld [vmem:[#allocation5 + $0xf30] sm:$0xf0]  ;;  %5329 = vmatpush.bf16.msrb.mxu0 %v8178_v50  ;;  %v10219_v12 = vld [vmem:[#allocation5 + $0xc04] sm:$0xf]  ;;  %v8418_v29 = vor.u32 %v10287_v8, %v8415_v9 }
 0x163   :  { %v8143_v20 = vld [vmem:[#allocation5 + $0xc10] sm:$0xf0]  ;;  %5343 = vmatpush.bf16.msrb.mxu1 %v8306_v54  ;;  %v10251_v18 = vld [vmem:[#allocation5 + $0xd04] sm:$0xf]  ;;  %v8546_v27 = vor.u32 %v10319_v6, %v8543_v19 }
 0x164   :  { %5357 = vmatpush.bf16.msrb.mxu2 %v8434_v63  ;;  %v8271_v15 = vld [vmem:[#allocation5 + $0xd10] sm:$0xf0]  ;;  %v10283_v24 = vld [vmem:[#allocation5 + $0xe04] sm:$0xf]  ;;  %v8146_v59 = vor.u32 %v10219_v12, %v8143_v20 }
 0x165   :  { %5371 = vmatpush.bf16.msrb.mxu3 %v8562_v3  ;;  %v8399_v16 = vld [vmem:[#allocation5 + $0xe10] sm:$0xf0]  ;;  %v10315_v30 = vld [vmem:[#allocation5 + $0xf04] sm:$0xf]  ;;  %v8274_v54 = vor.u32 %v10251_v18, %v8271_v15  ;;  %v11086_v18 = vpop.f32.mrf.mxu1 }
 0x166   :  { %v8527_v37 = vld [vmem:[#allocation5 + $0xf10] sm:$0xf0]  ;;  %v10375_v42 = vld [vmem:[#allocation5 + $0x10e4] sm:$0xf]  ;;  %5330 = vmatpush.bf16.msrb.mxu0 %v8162_v0  ;;  %v8402_v63 = vor.u32 %v10283_v24, %v8399_v16  ;;  %11429 = vst [vmem:[#allocation34_spill] sm:$0xff] %v11086_v18 }
 0x167   :  { %v8767_v49 = vld [vmem:[#allocation5 + $0x10f0] sm:$0xf0]  ;;  %v10407_v13 = vld [vmem:[#allocation5 + $0x11e4] sm:$0xf]  ;;  %5344 = vmatpush.bf16.msrb.mxu1 %v8290_v11  ;;  %v8530_v3 = vor.u32 %v10315_v30, %v8527_v37 }
 0x168   :  { %v8895_v50 = vld [vmem:[#allocation5 + $0x11f0] sm:$0xf0]  ;;  %v10439_v62 = vld [vmem:[#allocation5 + $0x12e4] sm:$0xf]  ;;  %5358 = vmatpush.bf16.msrb.mxu2 %v8418_v29  ;;  %v8770_v8 = vor.u32 %v10375_v42, %v8767_v49 }
 0x169   :  { %v9023_v61 = vld [vmem:[#allocation5 + $0x12f0] sm:$0xf0]  ;;  %v10471_v2 = vld [vmem:[#allocation5 + $0x13e4] sm:$0xf]  ;;  %5372 = vmatpush.bf16.msrb.mxu3 %v8546_v27  ;;  %v8898_v9 = vor.u32 %v10407_v13, %v8895_v50 }
 0x16a   :  { %v9151_v7 = vld [vmem:[#allocation5 + $0x13f0] sm:$0xf0]  ;;  %v9026_v6 = vor.u32 %v10439_v62, %v9023_v61  ;;  %v10371_v19 = vld [vmem:[#allocation5 + $0x10c4] sm:$0xf]  ;;  %5331 = vmatpush.bf16.msrb.mxu0 %v8146_v59 }
 0x16b   :  { %v8751_v25 = vld [vmem:[#allocation5 + $0x10d0] sm:$0xf0]  ;;  %v10403_v23 = vld [vmem:[#allocation5 + $0x11c4] sm:$0xf]  ;;  %v9154_v0 = vor.u32 %v10471_v2, %v9151_v7  ;;  %5345 = vmatpush.bf16.msrb.mxu1 %v8274_v54  ;;  %v11092_v2 = vpop.f32.mrf.mxu2 }
 0x16c   :  { %v8879_v12 = vld [vmem:[#allocation5 + $0x11d0] sm:$0xf0]  ;;  %v10435_v20 = vld [vmem:[#allocation5 + $0x12c4] sm:$0xf]  ;;  %5359 = vmatpush.bf16.msrb.mxu2 %v8402_v63  ;;  %v8754_v15 = vor.u32 %v10371_v19, %v8751_v25  ;;  %11430 = vst [vmem:[#allocation35_spill] sm:$0xff] %v11092_v2  ;;  %v5109_v19 = vpop.f32.mrf.mxu0 }
 0x16d   :  { %v9007_v53 = vld [vmem:[#allocation5 + $0x12d0] sm:$0xf0]  ;;  %v10467_v11 = vld [vmem:[#allocation5 + $0x13c4] sm:$0xf]  ;;  %5373 = vmatpush.bf16.msrb.mxu3 %v8530_v3  ;;  %v8882_v24 = vor.u32 %v10403_v23, %v8879_v12  ;;  %5332 = vmatmul.bf16.vlgmr.msrb.gmra.mxu0 %v10985_v32 }
 0x16e   :  { %v9135_v29 = vld [vmem:[#allocation5 + $0x13d0] sm:$0xf0]  ;;  %5380 = vmatpush.bf16.msra.mxu0 %v8770_v8  ;;  %v9010_v27 = vor.u32 %v10435_v20, %v9007_v53  ;;  %v10367_v16 = vld [vmem:[#allocation5 + $0x10a4] sm:$0xf]  ;;  %5346 = vmatmul.bf16.vlgmr.msrb.gmra.mxu1 %v10989_v41  ;;  %v5110_v20 = vadd.f32 %v5109_v19, %v11082_v28 }
 0x16f   :  { %5394 = vmatpush.bf16.msra.mxu1 %v8898_v9  ;;  %v8735_v30 = vld [vmem:[#allocation5 + $0x10b0] sm:$0xf0]  ;;  %v10399_v37 = vld [vmem:[#allocation5 + $0x11a4] sm:$0xf]  ;;  %v9138_v42 = vor.u32 %v10467_v11, %v9135_v29  ;;  %5360 = vmatmul.bf16.vlgmr.msrb.gmra.mxu2 %v10987_v38  ;;  %v5123_v29 = vpop.f32.mrf.mxu1 }
 0x170   :  { %5408 = vmatpush.bf16.msra.mxu2 %v9026_v6  ;;  %v8863_v49 = vld [vmem:[#allocation5 + $0x11b0] sm:$0xf0]  ;;  %v10431_v13 = vld [vmem:[#allocation5 + $0x12a4] sm:$0xf]  ;;  %5374 = vmatmul.bf16.vlgmr.msrb.gmra.mxu3 %v10991_v46  ;;  %v8738_v53 = vor.u32 %v10367_v16, %v8735_v30  ;;  %v11094_v6 = vpop.f32.mrf.mxu3 }
 0x171   :  { %5422 = vmatpush.bf16.msra.mxu3 %v9154_v0  ;;  %v8991_v59 = vld [vmem:[#allocation5 + $0x12b0] sm:$0xf0]  ;;  %v10463_v50 = vld [vmem:[#allocation5 + $0x13a4] sm:$0xf]  ;;  %v8866_v23 = vor.u32 %v10399_v37, %v8863_v49  ;;  %11431 = vst [vmem:[#allocation36_spill] sm:$0xff] %v11094_v6 }
 0x172   :  { %v9119_v25 = vld [vmem:[#allocation5 + $0x13b0] sm:$0xf0]  ;;  %5381 = vmatpush.bf16.msra.mxu0 %v8754_v15  ;;  %v8994_v62 = vor.u32 %v10431_v13, %v8991_v59  ;;  %v10363_v61 = vld [vmem:[#allocation5 + $0x1084] sm:$0xf] }
 0x173   :  { %5395 = vmatpush.bf16.msra.mxu1 %v8882_v24  ;;  %v8719_v54 = vld [vmem:[#allocation5 + $0x1090] sm:$0xf0]  ;;  %v10395_v63 = vld [vmem:[#allocation5 + $0x1184] sm:$0xf]  ;;  %v9122_v7 = vor.u32 %v10463_v50, %v9119_v25 }
 0x174   :  { %5409 = vmatpush.bf16.msra.mxu2 %v9010_v27  ;;  %v8847_v3 = vld [vmem:[#allocation5 + $0x1190] sm:$0xf0]  ;;  %v10427_v8 = vld [vmem:[#allocation5 + $0x1284] sm:$0xf]  ;;  %v8722_v11 = vor.u32 %v10363_v61, %v8719_v54  ;;  %v11099_v18 = vpop.f32.mrf.mxu0 }
 0x175   :  { %5423 = vmatpush.bf16.msra.mxu3 %v9138_v42  ;;  %v8975_v9 = vld [vmem:[#allocation5 + $0x1290] sm:$0xf0]  ;;  %v10459_v0 = vld [vmem:[#allocation5 + $0x1384] sm:$0xf]  ;;  %v8850_v15 = vor.u32 %v10395_v63, %v8847_v3  ;;  %v5124_v42 = vadd.f32 %v5123_v29, %v5110_v20  ;;  %v5137_v3 = vpop.f32.mrf.mxu2  ;;  %11433 = vst [vmem:[#allocation38_spill] sm:$0xff] %v11099_v18 }
 0x176   :  { %v9103_v12 = vld [vmem:[#allocation5 + $0x1390] sm:$0xf0]  ;;  %5382 = vmatpush.bf16.msra.mxu0 %v8738_v53  ;;  %v8978_v24 = vor.u32 %v10427_v8, %v8975_v9  ;;  %v10359_v27 = vld [vmem:[#allocation5 + $0x1064] sm:$0xf]  ;;  %v9862_v18 = vld [vmem:[#allocation5 + $0xd4] sm:$0xf0] }
 0x177   :  { %5396 = vmatpush.bf16.msra.mxu1 %v8866_v23  ;;  %v8703_v16 = vld [vmem:[#allocation5 + $0x1070] sm:$0xf0]  ;;  %v10391_v30 = vld [vmem:[#allocation5 + $0x1164] sm:$0xf]  ;;  %v9106_v37 = vor.u32 %v10459_v0, %v9103_v12  ;;  %v5138_v19 = vadd.f32 %v5137_v3, %v5124_v42 }
 0x178   :  { %5410 = vmatpush.bf16.msra.mxu2 %v8994_v62  ;;  %v8831_v49 = vld [vmem:[#allocation5 + $0x1170] sm:$0xf0]  ;;  %v10423_v13 = vld [vmem:[#allocation5 + $0x1264] sm:$0xf]  ;;  %v8706_v53 = vor.u32 %v10359_v27, %v8703_v16  ;;  %v5151_v0 = vpop.f32.mrf.mxu3 }
 0x179   :  { %5424 = vmatpush.bf16.msra.mxu3 %v9122_v7  ;;  %v8959_v59 = vld [vmem:[#allocation5 + $0x1270] sm:$0xf0]  ;;  %v10455_v50 = vld [vmem:[#allocation5 + $0x1364] sm:$0xf]  ;;  %v8834_v28 = vor.u32 %v10391_v30, %v8831_v49  ;;  %v11097_v29 = vadd.f32 %v5151_v0, %v5138_v19 }
 0x17a   :  { %v9087_v25 = vld [vmem:[#allocation5 + $0x1370] sm:$0xf0]  ;;  %5383 = vmatpush.bf16.msra.mxu0 %v8722_v11  ;;  %v8962_v23 = vor.u32 %v10423_v13, %v8959_v59  ;;  %v10355_v62 = vld [vmem:[#allocation5 + $0x1044] sm:$0xf] }
 0x17b   :  { %5397 = vmatpush.bf16.msra.mxu1 %v8850_v15  ;;  %v8687_v61 = vld [vmem:[#allocation5 + $0x1050] sm:$0xf0]  ;;  %v10387_v54 = vld [vmem:[#allocation5 + $0x1144] sm:$0xf]  ;;  %v9090_v63 = vor.u32 %v10455_v50, %v9087_v25  ;;  %11432 = vst [vmem:[#allocation37_spill] sm:$0xff] %v11097_v29 }
 0x17c   :  { %5411 = vmatpush.bf16.msra.mxu2 %v8978_v24  ;;  %v8815_v7 = vld [vmem:[#allocation5 + $0x1150] sm:$0xf0]  ;;  %v10419_v8 = vld [vmem:[#allocation5 + $0x1244] sm:$0xf]  ;;  %v8690_v11 = vor.u32 %v10355_v62, %v8687_v61 }
 0x17d   :  { %5425 = vmatpush.bf16.msra.mxu3 %v9106_v37  ;;  %v8943_v9 = vld [vmem:[#allocation5 + $0x1250] sm:$0xf0]  ;;  %v10451_v12 = vld [vmem:[#allocation5 + $0x1344] sm:$0xf]  ;;  %v8818_v15 = vor.u32 %v10387_v54, %v8815_v7 }
 0x17e   :  { %v9071_v20 = vld [vmem:[#allocation5 + $0x1350] sm:$0xf0]  ;;  %5384 = vmatpush.bf16.msra.mxu0 %v8706_v53  ;;  %v8946_v24 = vor.u32 %v10419_v8, %v8943_v9  ;;  %v10351_v27 = vld [vmem:[#allocation5 + $0x1024] sm:$0xf] }
 0x17f   :  { %5398 = vmatpush.bf16.msra.mxu1 %v8834_v28  ;;  %v8671_v16 = vld [vmem:[#allocation5 + $0x1030] sm:$0xf0]  ;;  %v10383_v30 = vld [vmem:[#allocation5 + $0x1124] sm:$0xf]  ;;  %v9074_v37 = vor.u32 %v10451_v12, %v9071_v20 }
 0x180   :  { %5412 = vmatpush.bf16.msra.mxu2 %v8962_v23  ;;  %v8799_v49 = vld [vmem:[#allocation5 + $0x1130] sm:$0xf0]  ;;  %v10415_v13 = vld [vmem:[#allocation5 + $0x1224] sm:$0xf]  ;;  %v8674_v25 = vor.u32 %v10351_v27, %v8671_v16 }
 0x181   :  { %5426 = vmatpush.bf16.msra.mxu3 %v9090_v63  ;;  %v8927_v59 = vld [vmem:[#allocation5 + $0x1230] sm:$0xf0]  ;;  %v10447_v42 = vld [vmem:[#allocation5 + $0x1324] sm:$0xf]  ;;  %v8802_v28 = vor.u32 %v10383_v30, %v8799_v49 }
 0x182   :  { %v9055_v50 = vld [vmem:[#allocation5 + $0x1330] sm:$0xf0]  ;;  %5385 = vmatpush.bf16.msra.mxu0 %v8690_v11  ;;  %v10347_v53 = vld [vmem:[#allocation5 + $0x1004] sm:$0xf]  ;;  %v8930_v23 = vor.u32 %v10415_v13, %v8927_v59 }
 0x183   :  { %v8655_v62 = vld [vmem:[#allocation5 + $0x1010] sm:$0xf0]  ;;  %5399 = vmatpush.bf16.msra.mxu1 %v8818_v15  ;;  %v10379_v61 = vld [vmem:[#allocation5 + $0x1104] sm:$0xf]  ;;  %v9058_v7 = vor.u32 %v10447_v42, %v9055_v50 }
 0x184   :  { %5413 = vmatpush.bf16.msra.mxu2 %v8946_v24  ;;  %v8783_v54 = vld [vmem:[#allocation5 + $0x1110] sm:$0xf0]  ;;  %v10411_v3 = vld [vmem:[#allocation5 + $0x1204] sm:$0xf]  ;;  %v8658_v20 = vor.u32 %v10347_v53, %v8655_v62 }
 0x185   :  { %5427 = vmatpush.bf16.msra.mxu3 %v9074_v37  ;;  %v8911_v63 = vld [vmem:[#allocation5 + $0x1210] sm:$0xf0]  ;;  %v10443_v8 = vld [vmem:[#allocation5 + $0x1304] sm:$0xf]  ;;  %v8786_v15 = vor.u32 %v10379_v61, %v8783_v54  ;;  %v11101_v54 = vpop.f32.mrf.mxu1 }
 0x186   :  { %v9039_v9 = vld [vmem:[#allocation5 + $0x1310] sm:$0xf0]  ;;  %v10503_v19 = vld [vmem:[#allocation5 + $0x14e4] sm:$0xf]  ;;  %5386 = vmatpush.bf16.msra.mxu0 %v8674_v25  ;;  %v8914_v24 = vor.u32 %v10411_v3, %v8911_v63  ;;  %11434 = vst [vmem:[#allocation39_spill] sm:$0xff] %v11101_v54 }
 0x187   :  { %v9279_v0 = vld [vmem:[#allocation5 + $0x14f0] sm:$0xf0]  ;;  %v10535_v12 = vld [vmem:[#allocation5 + $0x15e4] sm:$0xf]  ;;  %5400 = vmatpush.bf16.msra.mxu1 %v8802_v28  ;;  %v9042_v37 = vor.u32 %v10443_v8, %v9039_v9  ;;  %v6709_v54 = vld [vmem:[#allocation5 + $0xc8] sm:$0xf] }
 0x188   :  { %v9407_v11 = vld [vmem:[#allocation5 + $0x15f0] sm:$0xf0]  ;;  %v10567_v27 = vld [vmem:[#allocation5 + $0x16e4] sm:$0xf]  ;;  %5414 = vmatpush.bf16.msra.mxu2 %v8930_v23  ;;  %v9282_v13 = vor.u32 %v10503_v19, %v9279_v0 }
 0x189   :  { %v9535_v16 = vld [vmem:[#allocation5 + $0x16f0] sm:$0xf0]  ;;  %v10599_v30 = vld [vmem:[#allocation5 + $0x17e4] sm:$0xf]  ;;  %5428 = vmatpush.bf16.msra.mxu3 %v9058_v7  ;;  %v9410_v59 = vor.u32 %v10535_v12, %v9407_v11 }
 0x18a   :  { %v9663_v49 = vld [vmem:[#allocation5 + $0x17f0] sm:$0xf0]  ;;  %v9538_v42 = vor.u32 %v10567_v27, %v9535_v16  ;;  %v10499_v50 = vld [vmem:[#allocation5 + $0x14c4] sm:$0xf]  ;;  %5387 = vmatpush.bf16.msra.mxu0 %v8658_v20 }
 0x18b   :  { %v9263_v29 = vld [vmem:[#allocation5 + $0x14d0] sm:$0xf0]  ;;  %v10531_v6 = vld [vmem:[#allocation5 + $0x15c4] sm:$0xf]  ;;  %v9666_v25 = vor.u32 %v10599_v30, %v9663_v49  ;;  %5401 = vmatpush.bf16.msra.mxu1 %v8786_v15 }
 0x18c   :  { %v9391_v53 = vld [vmem:[#allocation5 + $0x15d0] sm:$0xf0]  ;;  %v10563_v62 = vld [vmem:[#allocation5 + $0x16c4] sm:$0xf]  ;;  %5415 = vmatpush.bf16.msra.mxu2 %v8914_v24  ;;  %v9266_v61 = vor.u32 %v10499_v50, %v9263_v29 }
 0x18d   :  { %v9519_v2 = vld [vmem:[#allocation5 + $0x16d0] sm:$0xf0]  ;;  %v10595_v28 = vld [vmem:[#allocation5 + $0x17c4] sm:$0xf]  ;;  %5429 = vmatpush.bf16.msra.mxu3 %v9042_v37  ;;  %v9394_v3 = vor.u32 %v10531_v6, %v9391_v53  ;;  %5388 = vmatmul.bf16.vlgmr.msra.gmra.mxu0 %v10997_v51  ;;  %v11107_v6 = vld [vmem:[#allocation7] sm:$0xf]  ;;  %v11110_v37 = vpop.f32.mrf.mxu2 }
 0x18e   :  { %v9647_v23 = vld [vmem:[#allocation5 + $0x17d0] sm:$0xf0]  ;;  %5436 = vmatpush.bf16.msrb.mxu0 %v9282_v13  ;;  %v9522_v7 = vor.u32 %v10563_v62, %v9519_v2  ;;  %v10495_v63 = vld [vmem:[#allocation5 + $0x14a4] sm:$0xf]  ;;  %5402 = vmatmul.bf16.vlgmr.msra.gmra.mxu1 %v11001_v56  ;;  %v11414_v27 = vperm.slane %v11107_v6, 1  ;;  %11435 = vst [vmem:[#allocation40_spill] sm:$0xff] %v11110_v37  ;;  %v5165_v62 = vpop.f32.mrf.mxu0 }
 0x18f   :  { %5450 = vmatpush.bf16.msrb.mxu1 %v9410_v59  ;;  %v9247_v8 = vld [vmem:[#allocation5 + $0x14b0] sm:$0xf0]  ;;  %v10527_v9 = vld [vmem:[#allocation5 + $0x15a4] sm:$0xf]  ;;  %v9650_v19 = vor.u32 %v10595_v28, %v9647_v23  ;;  %5416 = vmatmul.bf16.vlgmr.msra.gmra.mxu2 %v10999_v55  ;;  %v11112_v28 = vpop.f32.mrf.mxu3 }
 0x190   :  { %5464 = vmatpush.bf16.msrb.mxu2 %v9538_v42  ;;  %v9375_v0 = vld [vmem:[#allocation5 + $0x15b0] sm:$0xf0]  ;;  %v10559_v12 = vld [vmem:[#allocation5 + $0x16a4] sm:$0xf]  ;;  %5430 = vmatmul.bf16.vlgmr.msra.gmra.mxu3 %v11003_v60  ;;  %v9250_v2 = vor.u32 %v10495_v63, %v9247_v8  ;;  %11436 = vst [vmem:[#allocation41_spill] sm:$0xff] %v11112_v28 }
 0x191   :  { %5478 = vmatpush.bf16.msrb.mxu3 %v9666_v25  ;;  %v9503_v20 = vld [vmem:[#allocation5 + $0x16b0] sm:$0xf0]  ;;  %v10591_v29 = vld [vmem:[#allocation5 + $0x17a4] sm:$0xf]  ;;  %v9378_v16 = vor.u32 %v10527_v9, %v9375_v0 }
 0x192   :  { %v9631_v11 = vld [vmem:[#allocation5 + $0x17b0] sm:$0xf0]  ;;  %5437 = vmatpush.bf16.msrb.mxu0 %v9266_v61  ;;  %v9506_v15 = vor.u32 %v10559_v12, %v9503_v20  ;;  %v10491_v24 = vld [vmem:[#allocation5 + $0x1484] sm:$0xf]  ;;  %v5166_v61 = vadd.f32 %v5165_v62, %v11414_v27 }
 0x193   :  { %5451 = vmatpush.bf16.msrb.mxu1 %v9394_v3  ;;  %v9231_v30 = vld [vmem:[#allocation5 + $0x1490] sm:$0xf0]  ;;  %v10523_v49 = vld [vmem:[#allocation5 + $0x1584] sm:$0xf]  ;;  %v9634_v13 = vor.u32 %v10591_v29, %v9631_v11 }
 0x194   :  { %5465 = vmatpush.bf16.msrb.mxu2 %v9522_v7  ;;  %v9359_v59 = vld [vmem:[#allocation5 + $0x1590] sm:$0xf0]  ;;  %v10555_v42 = vld [vmem:[#allocation5 + $0x1684] sm:$0xf]  ;;  %v9234_v23 = vor.u32 %v10491_v24, %v9231_v30 }
 0x195   :  { %5479 = vmatpush.bf16.msrb.mxu3 %v9650_v19  ;;  %v9487_v50 = vld [vmem:[#allocation5 + $0x1690] sm:$0xf0]  ;;  %v10587_v25 = vld [vmem:[#allocation5 + $0x1784] sm:$0xf]  ;;  %v9362_v3 = vor.u32 %v10523_v49, %v9359_v59  ;;  %v5179_v19 = vpop.f32.mrf.mxu1 }
 0x196   :  { %v9615_v53 = vld [vmem:[#allocation5 + $0x1790] sm:$0xf0]  ;;  %5438 = vmatpush.bf16.msrb.mxu0 %v9250_v2  ;;  %v9490_v7 = vor.u32 %v10555_v42, %v9487_v50  ;;  %v10487_v63 = vld [vmem:[#allocation5 + $0x1464] sm:$0xf]  ;;  %v5180_v11 = vadd.f32 %v5179_v19, %v5166_v61 }
 0x197   :  { %5452 = vmatpush.bf16.msrb.mxu1 %v9378_v16  ;;  %v9215_v8 = vld [vmem:[#allocation5 + $0x1470] sm:$0xf0]  ;;  %v10519_v9 = vld [vmem:[#allocation5 + $0x1564] sm:$0xf]  ;;  %v9618_v0 = vor.u32 %v10587_v25, %v9615_v53  ;;  %v5193_v53 = vpop.f32.mrf.mxu2 }
 0x198   :  { %5466 = vmatpush.bf16.msrb.mxu2 %v9506_v15  ;;  %v9343_v12 = vld [vmem:[#allocation5 + $0x1570] sm:$0xf0]  ;;  %v10551_v20 = vld [vmem:[#allocation5 + $0x1664] sm:$0xf]  ;;  %v9218_v24 = vor.u32 %v10487_v63, %v9215_v8  ;;  %v5194_v61 = vadd.f32 %v5193_v53, %v5180_v11  ;;  %v6725_v53 = vld [vmem:[#allocation5 + $0xe8] sm:$0xf] }
 0x199   :  { %5480 = vmatpush.bf16.msrb.mxu3 %v9634_v13  ;;  %v9471_v29 = vld [vmem:[#allocation5 + $0x1670] sm:$0xf0]  ;;  %v10583_v28 = vld [vmem:[#allocation5 + $0x1764] sm:$0xf]  ;;  %v9346_v16 = vor.u32 %v10519_v9, %v9343_v12 }
 0x19a   :  { %v9599_v2 = vld [vmem:[#allocation5 + $0x1770] sm:$0xf0]  ;;  %5439 = vmatpush.bf16.msrb.mxu0 %v9234_v23  ;;  %v9474_v15 = vor.u32 %v10551_v20, %v9471_v29  ;;  %v10483_v30 = vld [vmem:[#allocation5 + $0x1444] sm:$0xf]  ;;  %v5207_v23 = vpop.f32.mrf.mxu3 }
 0x19b   :  { %5453 = vmatpush.bf16.msrb.mxu1 %v9362_v3  ;;  %v9199_v49 = vld [vmem:[#allocation5 + $0x1450] sm:$0xf0]  ;;  %v10515_v59 = vld [vmem:[#allocation5 + $0x1544] sm:$0xf]  ;;  %v9602_v42 = vor.u32 %v10583_v28, %v9599_v2  ;;  %v11116_v12 = vadd.f32 %v5207_v23, %v5194_v61  ;;  %v6853_v61 = vld [vmem:[#allocation5 + $0x1e8] sm:$0xf] }
 0x19c   :  { %5467 = vmatpush.bf16.msrb.mxu2 %v9490_v7  ;;  %v9327_v50 = vld [vmem:[#allocation5 + $0x1550] sm:$0xf0]  ;;  %v10547_v13 = vld [vmem:[#allocation5 + $0x1644] sm:$0xf]  ;;  %v9202_v19 = vor.u32 %v10483_v30, %v9199_v49  ;;  %v9898_v23 = vld [vmem:[#allocation5 + $0x1f4] sm:$0xf0] }
 0x19d   :  { %5481 = vmatpush.bf16.msrb.mxu3 %v9618_v0  ;;  %v9455_v25 = vld [vmem:[#allocation5 + $0x1650] sm:$0xf0]  ;;  %v10579_v62 = vld [vmem:[#allocation5 + $0x1744] sm:$0xf]  ;;  %v9330_v3 = vor.u32 %v10515_v59, %v9327_v50 }
 0x19e   :  { %v9583_v27 = vld [vmem:[#allocation5 + $0x1750] sm:$0xf0]  ;;  %5440 = vmatpush.bf16.msrb.mxu0 %v9218_v24  ;;  %v9458_v7 = vor.u32 %v10547_v13, %v9455_v25  ;;  %v10479_v63 = vld [vmem:[#allocation5 + $0x1424] sm:$0xf] }
 0x19f   :  { %5454 = vmatpush.bf16.msrb.mxu1 %v9346_v16  ;;  %v9183_v8 = vld [vmem:[#allocation5 + $0x1430] sm:$0xf0]  ;;  %v10511_v9 = vld [vmem:[#allocation5 + $0x1524] sm:$0xf]  ;;  %v9586_v28 = vor.u32 %v10579_v62, %v9583_v27  ;;  %v9866_v62 = vld [vmem:[#allocation5 + $0xf4] sm:$0xf0] }
 0x1a0   :  { %5468 = vmatpush.bf16.msrb.mxu2 %v9474_v15  ;;  %v9311_v0 = vld [vmem:[#allocation5 + $0x1530] sm:$0xf0]  ;;  %v10543_v20 = vld [vmem:[#allocation5 + $0x1624] sm:$0xf]  ;;  %v9186_v11 = vor.u32 %v10479_v63, %v9183_v8  ;;  %v6981_v63 = vld [vmem:[#allocation5 + $0x2e8] sm:$0xf] }
 0x1a1   :  { %5482 = vmatpush.bf16.msrb.mxu3 %v9602_v42  ;;  %v9439_v29 = vld [vmem:[#allocation5 + $0x1630] sm:$0xf0]  ;;  %v10575_v2 = vld [vmem:[#allocation5 + $0x1724] sm:$0xf]  ;;  %v9314_v16 = vor.u32 %v10511_v9, %v9311_v0  ;;  %v9930_v8 = vld [vmem:[#allocation5 + $0x2f4] sm:$0xf0] }
 0x1a2   :  { %v9567_v37 = vld [vmem:[#allocation5 + $0x1730] sm:$0xf0]  ;;  %5441 = vmatpush.bf16.msrb.mxu0 %v9202_v19  ;;  %v10475_v24 = vld [vmem:[#allocation5 + $0x1404] sm:$0xf]  ;;  %v9442_v15 = vor.u32 %v10543_v20, %v9439_v29  ;;  %v7109_v9 = vld [vmem:[#allocation5 + $0x3e8] sm:$0xf]  ;;  %v6854_v20 = vor.u32 %v9898_v23, %v6853_v61  ;;  %v6982_v29 = vor.u32 %v9930_v8, %v6981_v63 }
 0x1a3   :  { %v9167_v30 = vld [vmem:[#allocation5 + $0x1410] sm:$0xf0]  ;;  %5455 = vmatpush.bf16.msrb.mxu1 %v9330_v3  ;;  %v10507_v49 = vld [vmem:[#allocation5 + $0x1504] sm:$0xf]  ;;  %v9570_v13 = vor.u32 %v10575_v2, %v9567_v37  ;;  %v9962_v0 = vld [vmem:[#allocation5 + $0x3f4] sm:$0xf0]  ;;  %v6726_v37 = vor.u32 %v9866_v62, %v6725_v53  ;;  %v11118_v2 = vpop.f32.mrf.mxu0 }
 0x1a4   :  { %5469 = vmatpush.bf16.msrb.mxu2 %v9458_v7  ;;  %v9295_v59 = vld [vmem:[#allocation5 + $0x1510] sm:$0xf0]  ;;  %v10539_v50 = vld [vmem:[#allocation5 + $0x1604] sm:$0xf]  ;;  %v9170_v19 = vor.u32 %v10475_v24, %v9167_v30  ;;  %v7110_v24 = vor.u32 %v9962_v0, %v7109_v9  ;;  %v9894_v30 = vld [vmem:[#allocation5 + $0x1d4] sm:$0xf0] }
 0x1a5   :  { %5483 = vmatpush.bf16.msrb.mxu3 %v9586_v28  ;;  %v9423_v42 = vld [vmem:[#allocation5 + $0x1610] sm:$0xf0]  ;;  %v10571_v27 = vld [vmem:[#allocation5 + $0x1704] sm:$0xf]  ;;  %v9298_v3 = vor.u32 %v10507_v49, %v9295_v59  ;;  %v9958_v49 = vld [vmem:[#allocation5 + $0x3d4] sm:$0xf0]  ;;  %v11120_v59 = vpop.f32.mrf.mxu1 }
 0x1a6   :  { %v9551_v25 = vld [vmem:[#allocation5 + $0x1710] sm:$0xf0]  ;;  %5442 = vmatpush.bf16.msrb.mxu0 %v9186_v11  ;;  %v9426_v7 = vor.u32 %v10539_v50, %v9423_v42  ;;  %v6837_v11 = vld [vmem:[#allocation5 + $0x1c8] sm:$0xf]  ;;  %v6710_v50 = vor.u32 %v9862_v18, %v6709_v54  ;;  %v9890_v61 = vld [vmem:[#allocation5 + $0x1b4] sm:$0xf0]  ;;  %v11126_v54 = vpop.f32.mrf.mxu2 }
 0x1a7   :  { %5456 = vmatpush.bf16.msrb.mxu1 %v9314_v16  ;;  %v9554_v28 = vor.u32 %v10571_v27, %v9551_v25  ;;  %v9926_v16 = vld [vmem:[#allocation5 + $0x2d4] sm:$0xf0]  ;;  %v6693_v27 = vld [vmem:[#allocation5 + $0xa8] sm:$0xf]  ;;  %11437 = vst [vmem:[#allocation42_spill] sm:$0xff] %v11126_v54 }
 0x1a8   :  { %5470 = vmatpush.bf16.msrb.mxu2 %v9442_v15  ;;  %v7093_v15 = vld [vmem:[#allocation5 + $0x3c8] sm:$0xf]  ;;  %v6966_v42 = vor.u32 %v9926_v16, %v6965_v22  ;;  %v9858_v25 = vld [vmem:[#allocation5 + $0xb4] sm:$0xf0] }
 0x1a9   :  { %5484 = vmatpush.bf16.msrb.mxu3 %v9570_v13  ;;  %v6838_v13 = vor.u32 %v9894_v30, %v6837_v11  ;;  %v6821_v53 = vld [vmem:[#allocation5 + $0x1a8] sm:$0xf]  ;;  %v7094_v62 = vor.u32 %v9958_v49, %v7093_v15  ;;  %v9922_v23 = vld [vmem:[#allocation5 + $0x2b4] sm:$0xf0]  ;;  %v6694_v22 = vor.u32 %v9858_v25, %v6693_v27 }
 0x1aa   :  { %5443 = vmatpush.bf16.msrb.mxu0 %v9170_v19  ;;  %v6949_v19 = vld [vmem:[#allocation5 + $0x2a8] sm:$0xf]  ;;  %v9954_v18 = vld [vmem:[#allocation5 + $0x3b4] sm:$0xf0]  ;;  %v6822_v8 = vor.u32 %v9890_v61, %v6821_v53 }
 0x1ab   :  { %5457 = vmatpush.bf16.msrb.mxu1 %v9298_v3  ;;  %v7077_v63 = vld [vmem:[#allocation5 + $0x3a8] sm:$0xf]  ;;  %v6950_v3 = vor.u32 %v9922_v23, %v6949_v19  ;;  %v9854_v9 = vld [vmem:[#allocation5 + $0x94] sm:$0xf0] }
 0x1ac   :  { %5471 = vmatpush.bf16.msrb.mxu2 %v9426_v7  ;;  %v6677_v7 = vld [vmem:[#allocation5 + $0x88] sm:$0xf]  ;;  %v9918_v11 = vld [vmem:[#allocation5 + $0x294] sm:$0xf0] }
 0x1ad   :  { %5485 = vmatpush.bf16.msrb.mxu3 %v9554_v28  ;;  %5444 = vmatmul.bf16.vlgmr.msrb.gmra.mxu0 %v11018_v26  ;;  %v6805_v0 = vld [vmem:[#allocation5 + $0x188] sm:$0xf]  ;;  %v7078_v28 = vor.u32 %v9954_v18, %v7077_v63  ;;  %v9950_v16 = vld [vmem:[#allocation5 + $0x394] sm:$0xf0]  ;;  %v6678_v49 = vor.u32 %v9854_v9, %v6677_v7 }
 0x1ae   :  { %5492 = vmatpush.bf16.msra.mxu0 %v6726_v37  ;;  %5458 = vmatmul.bf16.vlgmr.msrb.gmra.mxu1 %v11022_v34  ;;  %v11128_v37 = vpop.f32.mrf.mxu3  ;;  %v7061_v30 = vld [vmem:[#allocation5 + $0x388] sm:$0xf]  ;;  %v9850_v25 = vld [vmem:[#allocation5 + $0x74] sm:$0xf0] }
 0x1af   :  { %5506 = vmatpush.bf16.msra.mxu1 %v6854_v20  ;;  %5472 = vmatmul.bf16.vlgmr.msrb.gmra.mxu2 %v11020_v33  ;;  %11438 = vst [vmem:[#allocation43_spill] sm:$0xff] %v11128_v37  ;;  %v9886_v20 = vld [vmem:[#allocation5 + $0x194] sm:$0xf0]  ;;  %v6661_v27 = vld [vmem:[#allocation5 + $0x68] sm:$0xf] }
 0x1b0   :  { %5520 = vmatpush.bf16.msra.mxu2 %v6982_v29  ;;  %5486 = vmatmul.bf16.vlgmr.msrb.gmra.mxu3 %v11026_v48  ;;  %v6933_v29 = vld [vmem:[#allocation5 + $0x288] sm:$0xf]  ;;  %v9882_v19 = vld [vmem:[#allocation5 + $0x174] sm:$0xf0] }
 0x1b1   :  { %5534 = vmatpush.bf16.msra.mxu3 %v7110_v24  ;;  %v5221_v24 = vpop.f32.mrf.mxu0  ;;  %v6789_v53 = vld [vmem:[#allocation5 + $0x168] sm:$0xf]  ;;  %v9914_v63 = vld [vmem:[#allocation5 + $0x274] sm:$0xf0] }
 0x1b2   :  { %5493 = vmatpush.bf16.msra.mxu0 %v6710_v50  ;;  %v5222_v15 = vadd.f32 %v5221_v24, %v11116_v12  ;;  %v6806_v50 = vor.u32 %v9886_v20, %v6805_v0  ;;  %v6917_v23 = vld [vmem:[#allocation5 + $0x268] sm:$0xf]  ;;  %v6790_v12 = vor.u32 %v9882_v19, %v6789_v53  ;;  %v9846_v7 = vld [vmem:[#allocation5 + $0x54] sm:$0xf0]  ;;  %v5249_v20 = vpop.f32.mrf.mxu2 }
 0x1b3   :  { %5507 = vmatpush.bf16.msra.mxu1 %v6838_v13  ;;  %v6934_v13 = vor.u32 %v9918_v11, %v6933_v29  ;;  %v7045_v18 = vld [vmem:[#allocation5 + $0x368] sm:$0xf]  ;;  %v9910_v11 = vld [vmem:[#allocation5 + $0x254] sm:$0xf0] }
 0x1b4   :  { %5521 = vmatpush.bf16.msra.mxu2 %v6966_v42  ;;  %v5235_v42 = vpop.f32.mrf.mxu1  ;;  %v6773_v9 = vld [vmem:[#allocation5 + $0x148] sm:$0xf]  ;;  %v7046_v0 = vor.u32 %v9946_v57, %v7045_v18 }
 0x1b5   :  { %5535 = vmatpush.bf16.msra.mxu3 %v7094_v62  ;;  %v7062_v62 = vor.u32 %v9950_v16, %v7061_v30  ;;  %v5236_v61 = vadd.f32 %v5235_v42, %v5222_v15  ;;  %v6901_v29 = vld [vmem:[#allocation5 + $0x248] sm:$0xf]  ;;  %v9942_v16 = vld [vmem:[#allocation5 + $0x354] sm:$0xf0] }
 0x1b6   :  { %5494 = vmatpush.bf16.msra.mxu0 %v6694_v22  ;;  %v6662_v22 = vor.u32 %v9850_v25, %v6661_v27  ;;  %v7029_v30 = vld [vmem:[#allocation5 + $0x348] sm:$0xf]  ;;  %v5263_v15 = vpop.f32.mrf.mxu3  ;;  %v6902_v42 = vor.u32 %v9910_v11, %v6901_v29  ;;  %v9842_v25 = vld [vmem:[#allocation5 + $0x34] sm:$0xf0] }
 0x1b7   :  { %5508 = vmatpush.bf16.msra.mxu1 %v6822_v8  ;;  %v6918_v8 = vor.u32 %v9914_v63, %v6917_v23  ;;  %v5250_v24 = vadd.f32 %v5249_v20, %v5236_v61  ;;  %v6629_v27 = vld [vmem:[#allocation5 + $0x28] sm:$0xf]  ;;  %v7030_v57 = vor.u32 %v9942_v16, %v7029_v30  ;;  %v9906_v23 = vld [vmem:[#allocation5 + $0x234] sm:$0xf0] }
 0x1b8   :  { %5522 = vmatpush.bf16.msra.mxu2 %v6950_v3  ;;  %v6645_v3 = vld [vmem:[#allocation5 + $0x48] sm:$0xf]  ;;  %v9938_v63 = vld [vmem:[#allocation5 + $0x334] sm:$0xf0]  ;;  %v6630_v18 = vor.u32 %v9842_v25, %v6629_v27 }
 0x1b9   :  { %5536 = vmatpush.bf16.msra.mxu3 %v7078_v28  ;;  %v9878_v28 = vld [vmem:[#allocation5 + $0x154] sm:$0xf0]  ;;  %v6757_v53 = vld [vmem:[#allocation5 + $0x128] sm:$0xf]  ;;  %v11133_v54 = vpop.f32.mrf.mxu0 }
 0x1ba   :  { %5495 = vmatpush.bf16.msra.mxu0 %v6678_v49  ;;  %v6646_v49 = vor.u32 %v9846_v7, %v6645_v3  ;;  %v6885_v19 = vld [vmem:[#allocation5 + $0x228] sm:$0xf]  ;;  %v9838_v3 = vld [vmem:[#allocation5 + $0x14] sm:$0xf0]  ;;  %11439 = vst [vmem:[#allocation44_spill] sm:$0xff] %v11133_v54 }
 0x1bb   :  { %5509 = vmatpush.bf16.msra.mxu1 %v6806_v50  ;;  %v11131_v50 = vadd.f32 %v5263_v15, %v5250_v24  ;;  %v7013_v61 = vld [vmem:[#allocation5 + $0x328] sm:$0xf]  ;;  %v9934_v11 = vld [vmem:[#allocation5 + $0x314] sm:$0xf0] }
 0x1bc   :  { %5523 = vmatpush.bf16.msra.mxu2 %v6934_v13  ;;  %v6774_v13 = vor.u32 %v9878_v28, %v6773_v9  ;;  %v6741_v7 = vld [vmem:[#allocation5 + $0x108] sm:$0xf]  ;;  %v9870_v9 = vld [vmem:[#allocation5 + $0x114] sm:$0xf0]  ;;  %v7014_v28 = vor.u32 %v9938_v63, %v7013_v61 }
 0x1bd   :  { %5537 = vmatpush.bf16.msra.mxu3 %v7062_v62  ;;  %v9874_v62 = vld [vmem:[#allocation5 + $0x134] sm:$0xf0]  ;;  %v6869_v20 = vld [vmem:[#allocation5 + $0x208] sm:$0xf] }
 0x1be   :  { %5496 = vmatpush.bf16.msra.mxu0 %v6662_v22  ;;  %v6613_v22 = vld [vmem:[#allocation5 + $0x8] sm:$0xf]  ;;  %v9994_v30 = vld [vmem:[#allocation5 + $0x4f4] sm:$0xf0] }
 0x1bf   :  { %5510 = vmatpush.bf16.msra.mxu1 %v6790_v12  ;;  %v6758_v12 = vor.u32 %v9874_v62, %v6757_v53  ;;  %v6997_v29 = vld [vmem:[#allocation5 + $0x308] sm:$0xf]  ;;  %v6614_v15 = vor.u32 %v9838_v3, %v6613_v22  ;;  %v10058_v25 = vld [vmem:[#allocation5 + $0x6f4] sm:$0xf0] }
 0x1c0   :  { %5524 = vmatpush.bf16.msra.mxu2 %v6918_v8  ;;  %v6886_v8 = vor.u32 %v9906_v23, %v6885_v19  ;;  %v7237_v24 = vld [vmem:[#allocation5 + $0x4e8] sm:$0xf]  ;;  %v10090_v62 = vld [vmem:[#allocation5 + $0x7f4] sm:$0xf0] }
 0x1c1   :  { %5538 = vmatpush.bf16.msra.mxu3 %v7046_v0  ;;  %v9902_v0 = vld [vmem:[#allocation5 + $0x214] sm:$0xf0]  ;;  %v7365_v16 = vld [vmem:[#allocation5 + $0x5e8] sm:$0xf]  ;;  %v7238_v19 = vor.u32 %v9994_v30, %v7237_v24 }
 0x1c2   :  { %5497 = vmatpush.bf16.msra.mxu0 %v6646_v49  ;;  %v10026_v49 = vld [vmem:[#allocation5 + $0x5f4] sm:$0xf0]  ;;  %v7493_v27 = vld [vmem:[#allocation5 + $0x6e8] sm:$0xf] }
 0x1c3   :  { %5511 = vmatpush.bf16.msra.mxu1 %v6774_v13  ;;  %v6742_v13 = vor.u32 %v9870_v9, %v6741_v7  ;;  %v7621_v53 = vld [vmem:[#allocation5 + $0x7e8] sm:$0xf]  ;;  %v7366_v23 = vor.u32 %v10026_v49, %v7365_v16  ;;  %v7494_v61 = vor.u32 %v10058_v25, %v7493_v27  ;;  %v10022_v22 = vld [vmem:[#allocation5 + $0x5d4] sm:$0xf0]  ;;  %v11135_v7 = vpop.f32.mrf.mxu1 }
 0x1c4   :  { %5525 = vmatpush.bf16.msra.mxu2 %v6902_v42  ;;  %v6870_v42 = vor.u32 %v9902_v0, %v6869_v20  ;;  %v7221_v63 = vld [vmem:[#allocation5 + $0x4c8] sm:$0xf]  ;;  %11440 = vst [vmem:[#allocation45_spill] sm:$0xff] %v11135_v7  ;;  %v10018_v30 = vld [vmem:[#allocation5 + $0x5b4] sm:$0xf0] }
 0x1c5   :  { %5539 = vmatpush.bf16.msra.mxu3 %v7030_v57  ;;  %v6998_v57 = vor.u32 %v9934_v11, %v6997_v29  ;;  %v7349_v37 = vld [vmem:[#allocation5 + $0x5c8] sm:$0xf]  ;;  %v7222_v9 = vor.u32 %v9990_v52, %v7221_v63  ;;  %v9986_v29 = vld [vmem:[#allocation5 + $0x4b4] sm:$0xf0] }
 0x1c6   :  { %5498 = vmatpush.bf16.msra.mxu0 %v6630_v18  ;;  %v7622_v18 = vor.u32 %v10090_v62, %v7621_v53  ;;  %v7477_v3 = vld [vmem:[#allocation5 + $0x6c8] sm:$0xf]  ;;  %v7350_v20 = vor.u32 %v10022_v22, %v7349_v37  ;;  %v10082_v27 = vld [vmem:[#allocation5 + $0x7b4] sm:$0xf0]  ;;  %v11141_v53 = vpop.f32.mrf.mxu2 }
 0x1c7   :  { %5512 = vmatpush.bf16.msra.mxu1 %v6758_v12  ;;  %v7605_v12 = vld [vmem:[#allocation5 + $0x7c8] sm:$0xf]  ;;  %11441 = vst [vmem:[#allocation46_spill] sm:$0xff] %v11141_v53  ;;  %v10078_v22 = vld [vmem:[#allocation5 + $0x794] sm:$0xf0] }
 0x1c8   :  { %5526 = vmatpush.bf16.msra.mxu2 %v6886_v8  ;;  %v10086_v8 = vld [vmem:[#allocation5 + $0x7d4] sm:$0xf0]  ;;  %v7205_v0 = vld [vmem:[#allocation5 + $0x4a8] sm:$0xf] }
 0x1c9   :  { %5540 = vmatpush.bf16.msra.mxu3 %v7014_v28  ;;  %v7478_v28 = vor.u32 %v10054_v14, %v7477_v3  ;;  %v7333_v11 = vld [vmem:[#allocation5 + $0x5a8] sm:$0xf]  ;;  %v7606_v24 = vor.u32 %v10086_v8, %v7605_v12  ;;  %v7206_v52 = vor.u32 %v9986_v29, %v7205_v0  ;;  %v9978_v0 = vld [vmem:[#allocation5 + $0x474] sm:$0xf0] }
 0x1ca   :  { %5499 = vmatpush.bf16.msra.mxu0 %v6614_v15  ;;  %v7461_v16 = vld [vmem:[#allocation5 + $0x6a8] sm:$0xf]  ;;  %v10050_v15 = vld [vmem:[#allocation5 + $0x6b4] sm:$0xf0]  ;;  %v7334_v14 = vor.u32 %v10018_v30, %v7333_v11  ;;  %v5277_v63 = vpop.f32.mrf.mxu0 }
 0x1cb   :  { %5513 = vmatpush.bf16.msra.mxu1 %v6742_v13  ;;  %v7589_v49 = vld [vmem:[#allocation5 + $0x7a8] sm:$0xf]  ;;  %v7462_v37 = vor.u32 %v10050_v15, %v7461_v16  ;;  %v9982_v13 = vld [vmem:[#allocation5 + $0x494] sm:$0xf0]  ;;  %v5278_v3 = vadd.f32 %v5277_v63, %v11131_v50  ;;  %v5291_v8 = vpop.f32.mrf.mxu1 }
 0x1cc   :  { %5527 = vmatpush.bf16.msra.mxu2 %v6870_v42  ;;  %v7189_v25 = vld [vmem:[#allocation5 + $0x488] sm:$0xf]  ;;  %v7590_v62 = vor.u32 %v10082_v27, %v7589_v49  ;;  %v10010_v30 = vld [vmem:[#allocation5 + $0x574] sm:$0xf0] }
 0x1cd   :  { %5541 = vmatpush.bf16.msra.mxu3 %v6998_v57  ;;  %5500 = vmatmul.bf16.vlgmr.msra.gmra.mxu0 %v10949_v58  ;;  %v7317_v42 = vld [vmem:[#allocation5 + $0x588] sm:$0xf]  ;;  %v10014_v57 = vld [vmem:[#allocation5 + $0x594] sm:$0xf0]  ;;  %v7190_v12 = vor.u32 %v9982_v13, %v7189_v25 }
 0x1ce   :  { %5548 = vmatpush.bf16.msrb.mxu0 %v7238_v19  ;;  %5514 = vmatmul.bf16.vlgmr.msra.gmra.mxu1 %v10955_v10  ;;  %v7445_v19 = vld [vmem:[#allocation5 + $0x688] sm:$0xf]  ;;  %v10042_v15 = vld [vmem:[#allocation5 + $0x674] sm:$0xf0] }
 0x1cf   :  { %5562 = vmatpush.bf16.msrb.mxu1 %v7366_v23  ;;  %5528 = vmatmul.bf16.vlgmr.msra.gmra.mxu2 %v10951_v1  ;;  %v10046_v23 = vld [vmem:[#allocation5 + $0x694] sm:$0xf0]  ;;  %v7301_v29 = vld [vmem:[#allocation5 + $0x568] sm:$0xf] }
 0x1d0   :  { %5576 = vmatpush.bf16.msrb.mxu2 %v7494_v61  ;;  %5542 = vmatmul.bf16.vlgmr.msra.gmra.mxu3 %v10957_v17  ;;  %v11143_v61 = vpop.f32.mrf.mxu3  ;;  %v7429_v16 = vld [vmem:[#allocation5 + $0x668] sm:$0xf]  ;;  %v10074_v27 = vld [vmem:[#allocation5 + $0x774] sm:$0xf0]  ;;  %v7302_v50 = vor.u32 %v10010_v30, %v7301_v29 }
 0x1d1   :  { %5590 = vmatpush.bf16.msrb.mxu3 %v7622_v18  ;;  %11442 = vst [vmem:[#allocation47_spill] sm:$0xff] %v11143_v61  ;;  %v7573_v18 = vld [vmem:[#allocation5 + $0x788] sm:$0xf]  ;;  %v9974_v25 = vld [vmem:[#allocation5 + $0x454] sm:$0xf0] }
 0x1d2   :  { %5549 = vmatpush.bf16.msrb.mxu0 %v7222_v9  ;;  %v7318_v9 = vor.u32 %v10014_v57, %v7317_v42  ;;  %v7574_v11 = vor.u32 %v10078_v22, %v7573_v18  ;;  %v7557_v49 = vld [vmem:[#allocation5 + $0x768] sm:$0xf]  ;;  %v5305_v57 = vpop.f32.mrf.mxu2  ;;  %v10002_v30 = vld [vmem:[#allocation5 + $0x534] sm:$0xf0]  ;;  %v11148_v54 = vpop.f32.mrf.mxu0 }
 0x1d3   :  { %5563 = vmatpush.bf16.msrb.mxu1 %v7350_v20  ;;  %v7446_v20 = vor.u32 %v10046_v23, %v7445_v19  ;;  %v7285_v13 = vld [vmem:[#allocation5 + $0x548] sm:$0xf]  ;;  %v7558_v42 = vor.u32 %v10074_v27, %v7557_v49  ;;  %v10038_v23 = vld [vmem:[#allocation5 + $0x654] sm:$0xf0]  ;;  %11443 = vst [vmem:[#allocation48_spill] sm:$0xff] %v11148_v54 }
 0x1d4   :  { %5577 = vmatpush.bf16.msrb.mxu2 %v7478_v28  ;;  %v7173_v28 = vld [vmem:[#allocation5 + $0x468] sm:$0xf]  ;;  %v10066_v49 = vld [vmem:[#allocation5 + $0x734] sm:$0xf0] }
 0x1d5   :  { %5591 = vmatpush.bf16.msrb.mxu3 %v7606_v24  ;;  %v5292_v24 = vadd.f32 %v5291_v8, %v5278_v3  ;;  %v7413_v19 = vld [vmem:[#allocation5 + $0x648] sm:$0xf]  ;;  %v10070_v3 = vld [vmem:[#allocation5 + $0x754] sm:$0xf0] }
 0x1d6   :  { %5550 = vmatpush.bf16.msrb.mxu0 %v7206_v52  ;;  %v7174_v52 = vor.u32 %v9978_v0, %v7173_v28  ;;  %v7541_v22 = vld [vmem:[#allocation5 + $0x748] sm:$0xf]  ;;  %v9970_v0 = vld [vmem:[#allocation5 + $0x434] sm:$0xf0] }
 0x1d7   :  { %5564 = vmatpush.bf16.msrb.mxu1 %v7334_v14  ;;  %v7430_v14 = vor.u32 %v10042_v15, %v7429_v16  ;;  %v5306_v63 = vadd.f32 %v5305_v57, %v5292_v24  ;;  %v7141_v28 = vld [vmem:[#allocation5 + $0x428] sm:$0xf]  ;;  %v10034_v15 = vld [vmem:[#allocation5 + $0x634] sm:$0xf0] }
 0x1d8   :  { %5578 = vmatpush.bf16.msrb.mxu2 %v7462_v37  ;;  %v7157_v37 = vld [vmem:[#allocation5 + $0x448] sm:$0xf]  ;;  %v5319_v18 = vpop.f32.mrf.mxu3  ;;  %v7142_v27 = vor.u32 %v9970_v0, %v7141_v28  ;;  %v10186_v0 = vld [vmem:[#allocation5 + $0xaf4] sm:$0xf0] }
 0x1d9   :  { %5592 = vmatpush.bf16.msrb.mxu3 %v7590_v62  ;;  %v10006_v62 = vld [vmem:[#allocation5 + $0x554] sm:$0xf0]  ;;  %v11146_v8 = vadd.f32 %v5319_v18, %v5306_v63  ;;  %v7269_v29 = vld [vmem:[#allocation5 + $0x528] sm:$0xf] }
 0x1da   :  { %5551 = vmatpush.bf16.msrb.mxu0 %v7190_v12  ;;  %v7158_v12 = vor.u32 %v9974_v25, %v7157_v37  ;;  %v7397_v16 = vld [vmem:[#allocation5 + $0x628] sm:$0xf]  ;;  %v9966_v37 = vld [vmem:[#allocation5 + $0x414] sm:$0xf0] }
 0x1db   :  { %5565 = vmatpush.bf16.msrb.mxu1 %v7318_v9  ;;  %v7286_v9 = vor.u32 %v10006_v62, %v7285_v13  ;;  %v7525_v24 = vld [vmem:[#allocation5 + $0x728] sm:$0xf]  ;;  %v9998_v13 = vld [vmem:[#allocation5 + $0x514] sm:$0xf0] }
 0x1dc   :  { %5579 = vmatpush.bf16.msrb.mxu2 %v7446_v20  ;;  %v7414_v20 = vor.u32 %v10038_v23, %v7413_v19  ;;  %v7253_v25 = vld [vmem:[#allocation5 + $0x508] sm:$0xf]  ;;  %v7526_v62 = vor.u32 %v10066_v49, %v7525_v24  ;;  %v10062_v23 = vld [vmem:[#allocation5 + $0x714] sm:$0xf0] }
 0x1dd   :  { %5593 = vmatpush.bf16.msrb.mxu3 %v7574_v11  ;;  %v7542_v11 = vor.u32 %v10070_v3, %v7541_v22  ;;  %v7381_v57 = vld [vmem:[#allocation5 + $0x608] sm:$0xf]  ;;  %v10122_v18 = vld [vmem:[#allocation5 + $0x8f4] sm:$0xf0] }
 0x1de   :  { %5552 = vmatpush.bf16.msrb.mxu0 %v7174_v52  ;;  %v7125_v52 = vld [vmem:[#allocation5 + $0x408] sm:$0xf]  ;;  %v10118_v61 = vld [vmem:[#allocation5 + $0x8d4] sm:$0xf0] }
 0x1df   :  { %5566 = vmatpush.bf16.msrb.mxu1 %v7302_v50  ;;  %v7270_v50 = vor.u32 %v10002_v30, %v7269_v29  ;;  %v7509_v19 = vld [vmem:[#allocation5 + $0x708] sm:$0xf]  ;;  %v7126_v3 = vor.u32 %v9966_v37, %v7125_v52  ;;  %v10218_v30 = vld [vmem:[#allocation5 + $0xbf4] sm:$0xf0] }
 0x1e0   :  { %5580 = vmatpush.bf16.msrb.mxu2 %v7430_v14  ;;  %v7398_v14 = vor.u32 %v10034_v15, %v7397_v16  ;;  %v7749_v63 = vld [vmem:[#allocation5 + $0x8e8] sm:$0xf]  ;;  %v10150_v52 = vld [vmem:[#allocation5 + $0x9d4] sm:$0xf0] }
 0x1e1   :  { %5594 = vmatpush.bf16.msrb.mxu3 %v7558_v42  ;;  %v10030_v42 = vld [vmem:[#allocation5 + $0x614] sm:$0xf0]  ;;  %v7877_v22 = vld [vmem:[#allocation5 + $0x9e8] sm:$0xf]  ;;  %v7750_v16 = vor.u32 %v10122_v18, %v7749_v63 }
 0x1e2   :  { %5553 = vmatpush.bf16.msrb.mxu0 %v7158_v12  ;;  %v10154_v12 = vld [vmem:[#allocation5 + $0x9f4] sm:$0xf0]  ;;  %v8005_v28 = vld [vmem:[#allocation5 + $0xae8] sm:$0xf] }
 0x1e3   :  { %5567 = vmatpush.bf16.msrb.mxu1 %v7286_v9  ;;  %v7254_v9 = vor.u32 %v9998_v13, %v7253_v25  ;;  %v8133_v29 = vld [vmem:[#allocation5 + $0xbe8] sm:$0xf]  ;;  %v7878_v15 = vor.u32 %v10154_v12, %v7877_v22  ;;  %v8006_v24 = vor.u32 %v10186_v0, %v8005_v28  ;;  %v10182_v7 = vld [vmem:[#allocation5 + $0xad4] sm:$0xf0]  ;;  %v11150_v25 = vpop.f32.mrf.mxu1 }
 0x1e4   :  { %5581 = vmatpush.bf16.msrb.mxu2 %v7414_v20  ;;  %v7382_v20 = vor.u32 %v10030_v42, %v7381_v57  ;;  %v7733_v49 = vld [vmem:[#allocation5 + $0x8c8] sm:$0xf]  ;;  %11444 = vst [vmem:[#allocation49_spill] sm:$0xff] %v11150_v25  ;;  %v10146_v18 = vld [vmem:[#allocation5 + $0x9b4] sm:$0xf0] }
 0x1e5   :  { %5595 = vmatpush.bf16.msrb.mxu3 %v7542_v11  ;;  %v7510_v11 = vor.u32 %v10062_v23, %v7509_v19  ;;  %v7861_v53 = vld [vmem:[#allocation5 + $0x9c8] sm:$0xf]  ;;  %v7734_v13 = vor.u32 %v10118_v61, %v7733_v49  ;;  %v10114_v19 = vld [vmem:[#allocation5 + $0x8b4] sm:$0xf0] }
 0x1e6   :  { %5554 = vmatpush.bf16.msrb.mxu0 %v7142_v27  ;;  %v8134_v27 = vor.u32 %v10218_v30, %v8133_v29  ;;  %v7989_v37 = vld [vmem:[#allocation5 + $0xac8] sm:$0xf]  ;;  %v7862_v57 = vor.u32 %v10150_v52, %v7861_v53  ;;  %v10210_v61 = vld [vmem:[#allocation5 + $0xbb4] sm:$0xf0]  ;;  %v11156_v29 = vpop.f32.mrf.mxu2 }
 0x1e7   :  { %5568 = vmatpush.bf16.msrb.mxu1 %v7270_v50  ;;  %v8117_v50 = vld [vmem:[#allocation5 + $0xbc8] sm:$0xf]  ;;  %11445 = vst [vmem:[#allocation50_spill] sm:$0xff] %v11156_v29  ;;  %v10206_v52 = vld [vmem:[#allocation5 + $0xb94] sm:$0xf0] }
 0x1e8   :  { %5582 = vmatpush.bf16.msrb.mxu2 %v7398_v14  ;;  %v10214_v14 = vld [vmem:[#allocation5 + $0xbd4] sm:$0xf0]  ;;  %v7717_v42 = vld [vmem:[#allocation5 + $0x8a8] sm:$0xf] }
 0x1e9   :  { %5596 = vmatpush.bf16.msrb.mxu3 %v7526_v62  ;;  %v7990_v62 = vor.u32 %v10182_v7, %v7989_v37  ;;  %v7845_v23 = vld [vmem:[#allocation5 + $0x9a8] sm:$0xf]  ;;  %v8118_v63 = vor.u32 %v10214_v14, %v8117_v50  ;;  %v7718_v7 = vor.u32 %v10114_v19, %v7717_v42  ;;  %v10106_v42 = vld [vmem:[#allocation5 + $0x874] sm:$0xf0] }
 0x1ea   :  { %5555 = vmatpush.bf16.msrb.mxu0 %v7126_v3  ;;  %v7973_v22 = vld [vmem:[#allocation5 + $0xaa8] sm:$0xf]  ;;  %v10178_v3 = vld [vmem:[#allocation5 + $0xab4] sm:$0xf0]  ;;  %v7846_v53 = vor.u32 %v10146_v18, %v7845_v23  ;;  %v5333_v49 = vpop.f32.mrf.mxu0 }
 0x1eb   :  { %5569 = vmatpush.bf16.msrb.mxu1 %v7254_v9  ;;  %v8101_v12 = vld [vmem:[#allocation5 + $0xba8] sm:$0xf]  ;;  %v7974_v28 = vor.u32 %v10178_v3, %v7973_v22  ;;  %v10110_v9 = vld [vmem:[#allocation5 + $0x894] sm:$0xf0]  ;;  %v5334_v37 = vadd.f32 %v5333_v49, %v11146_v8  ;;  %v5347_v14 = vpop.f32.mrf.mxu1 }
 0x1ec   :  { %5583 = vmatpush.bf16.msrb.mxu2 %v7382_v20  ;;  %v7701_v0 = vld [vmem:[#allocation5 + $0x888] sm:$0xf]  ;;  %v8102_v30 = vor.u32 %v10210_v61, %v8101_v12  ;;  %v10138_v18 = vld [vmem:[#allocation5 + $0x974] sm:$0xf0] }
 0x1ed   :  { %5597 = vmatpush.bf16.msrb.mxu3 %v7510_v11  ;;  %5556 = vmatmul.bf16.vlgmr.msrb.gmra.mxu0 %v10961_v39  ;;  %v7829_v20 = vld [vmem:[#allocation5 + $0x988] sm:$0xf]  ;;  %v10142_v11 = vld [vmem:[#allocation5 + $0x994] sm:$0xf0]  ;;  %v7702_v50 = vor.u32 %v10110_v9, %v7701_v0 }
 0x1ee   :  { %5604 = vmatpush.bf16.msra.mxu0 %v7750_v16  ;;  %5570 = vmatmul.bf16.vlgmr.msrb.gmra.mxu1 %v10965_v44  ;;  %v7957_v16 = vld [vmem:[#allocation5 + $0xa88] sm:$0xf]  ;;  %v10170_v3 = vld [vmem:[#allocation5 + $0xa74] sm:$0xf0] }
 0x1ef   :  { %5618 = vmatpush.bf16.msra.mxu1 %v7878_v15  ;;  %5584 = vmatmul.bf16.vlgmr.msrb.gmra.mxu2 %v10963_v43  ;;  %v10174_v15 = vld [vmem:[#allocation5 + $0xa94] sm:$0xf0]  ;;  %v7813_v19 = vld [vmem:[#allocation5 + $0x968] sm:$0xf] }
 0x1f0   :  { %5632 = vmatpush.bf16.msra.mxu2 %v8006_v24  ;;  %5598 = vmatmul.bf16.vlgmr.msrb.gmra.mxu3 %v10967_v47  ;;  %v11158_v24 = vpop.f32.mrf.mxu3  ;;  %v7941_v22 = vld [vmem:[#allocation5 + $0xa68] sm:$0xf]  ;;  %v10202_v61 = vld [vmem:[#allocation5 + $0xb74] sm:$0xf0]  ;;  %v7814_v8 = vor.u32 %v10138_v18, %v7813_v19 }
 0x1f1   :  { %5646 = vmatpush.bf16.msra.mxu3 %v8134_v27  ;;  %11446 = vst [vmem:[#allocation51_spill] sm:$0xff] %v11158_v24  ;;  %v8085_v27 = vld [vmem:[#allocation5 + $0xb88] sm:$0xf]  ;;  %v10102_v0 = vld [vmem:[#allocation5 + $0x854] sm:$0xf0] }
 0x1f2   :  { %5605 = vmatpush.bf16.msra.mxu0 %v7734_v13  ;;  %v7830_v13 = vor.u32 %v10142_v11, %v7829_v20  ;;  %v8086_v23 = vor.u32 %v10206_v52, %v8085_v27  ;;  %v8069_v12 = vld [vmem:[#allocation5 + $0xb68] sm:$0xf]  ;;  %v5361_v11 = vpop.f32.mrf.mxu2  ;;  %v10130_v18 = vld [vmem:[#allocation5 + $0x934] sm:$0xf0]  ;;  %v11163_v54 = vpop.f32.mrf.mxu0 }
 0x1f3   :  { %5619 = vmatpush.bf16.msra.mxu1 %v7862_v57  ;;  %v7958_v57 = vor.u32 %v10174_v15, %v7957_v16  ;;  %v7797_v9 = vld [vmem:[#allocation5 + $0x948] sm:$0xf]  ;;  %v8070_v20 = vor.u32 %v10202_v61, %v8069_v12  ;;  %v10166_v15 = vld [vmem:[#allocation5 + $0xa54] sm:$0xf0]  ;;  %11447 = vst [vmem:[#allocation52_spill] sm:$0xff] %v11163_v54 }
 0x1f4   :  { %5633 = vmatpush.bf16.msra.mxu2 %v7990_v62  ;;  %v7685_v62 = vld [vmem:[#allocation5 + $0x868] sm:$0xf]  ;;  %v10194_v12 = vld [vmem:[#allocation5 + $0xb34] sm:$0xf0] }
 0x1f5   :  { %5647 = vmatpush.bf16.msra.mxu3 %v8118_v63  ;;  %v5348_v63 = vadd.f32 %v5347_v14, %v5334_v37  ;;  %v7925_v16 = vld [vmem:[#allocation5 + $0xa48] sm:$0xf]  ;;  %v10198_v37 = vld [vmem:[#allocation5 + $0xb54] sm:$0xf0] }
 0x1f6   :  { %5606 = vmatpush.bf16.msra.mxu0 %v7718_v7  ;;  %v7686_v7 = vor.u32 %v10106_v42, %v7685_v62  ;;  %v8053_v52 = vld [vmem:[#allocation5 + $0xb48] sm:$0xf]  ;;  %v10098_v42 = vld [vmem:[#allocation5 + $0x834] sm:$0xf0] }
 0x1f7   :  { %5620 = vmatpush.bf16.msra.mxu1 %v7846_v53  ;;  %v7942_v53 = vor.u32 %v10170_v3, %v7941_v22  ;;  %v5362_v49 = vadd.f32 %v5361_v11, %v5348_v63  ;;  %v7653_v62 = vld [vmem:[#allocation5 + $0x828] sm:$0xf]  ;;  %v10162_v3 = vld [vmem:[#allocation5 + $0xa34] sm:$0xf0] }
 0x1f8   :  { %5634 = vmatpush.bf16.msra.mxu2 %v7974_v28  ;;  %v7669_v28 = vld [vmem:[#allocation5 + $0x848] sm:$0xf]  ;;  %v5375_v27 = vpop.f32.mrf.mxu3  ;;  %v7654_v61 = vor.u32 %v10098_v42, %v7653_v62  ;;  %v10314_v42 = vld [vmem:[#allocation5 + $0xef4] sm:$0xf0] }
 0x1f9   :  { %5648 = vmatpush.bf16.msra.mxu3 %v8102_v30  ;;  %v10134_v30 = vld [vmem:[#allocation5 + $0x954] sm:$0xf0]  ;;  %v11161_v14 = vadd.f32 %v5375_v27, %v5362_v49  ;;  %v7781_v19 = vld [vmem:[#allocation5 + $0x928] sm:$0xf] }
 0x1fa   :  { %5607 = vmatpush.bf16.msra.mxu0 %v7702_v50  ;;  %v7670_v50 = vor.u32 %v10102_v0, %v7669_v28  ;;  %v7909_v22 = vld [vmem:[#allocation5 + $0xa28] sm:$0xf]  ;;  %v10094_v28 = vld [vmem:[#allocation5 + $0x814] sm:$0xf0] }
 0x1fb   :  { %5621 = vmatpush.bf16.msra.mxu1 %v7830_v13  ;;  %v7798_v13 = vor.u32 %v10134_v30, %v7797_v9  ;;  %v8037_v63 = vld [vmem:[#allocation5 + $0xb28] sm:$0xf]  ;;  %v10126_v9 = vld [vmem:[#allocation5 + $0x914] sm:$0xf0] }
 0x1fc   :  { %5635 = vmatpush.bf16.msra.mxu2 %v7958_v57  ;;  %v7926_v57 = vor.u32 %v10166_v15, %v7925_v16  ;;  %v7765_v0 = vld [vmem:[#allocation5 + $0x908] sm:$0xf]  ;;  %v8038_v30 = vor.u32 %v10194_v12, %v8037_v63  ;;  %v10190_v15 = vld [vmem:[#allocation5 + $0xb14] sm:$0xf0] }
 0x1fd   :  { %5649 = vmatpush.bf16.msra.mxu3 %v8086_v23  ;;  %v8054_v23 = vor.u32 %v10198_v37, %v8053_v52  ;;  %v7893_v11 = vld [vmem:[#allocation5 + $0xa08] sm:$0xf]  ;;  %v10250_v27 = vld [vmem:[#allocation5 + $0xcf4] sm:$0xf0] }
 0x1fe   :  { %5608 = vmatpush.bf16.msra.mxu0 %v7686_v7  ;;  %v7637_v7 = vld [vmem:[#allocation5 + $0x808] sm:$0xf]  ;;  %v10246_v24 = vld [vmem:[#allocation5 + $0xcd4] sm:$0xf0] }
 0x1ff   :  { %5622 = vmatpush.bf16.msra.mxu1 %v7814_v8  ;;  %v7782_v8 = vor.u32 %v10130_v18, %v7781_v19  ;;  %v8021_v16 = vld [vmem:[#allocation5 + $0xb08] sm:$0xf]  ;;  %v7638_v37 = vor.u32 %v10094_v28, %v7637_v7  ;;  %v10346_v18 = vld [vmem:[#allocation5 + $0xff4] sm:$0xf0] }
 0x200   :  { %5636 = vmatpush.bf16.msra.mxu2 %v7942_v53  ;;  %v7910_v53 = vor.u32 %v10162_v3, %v7909_v22  ;;  %v8261_v49 = vld [vmem:[#allocation5 + $0xce8] sm:$0xf]  ;;  %v10278_v7 = vld [vmem:[#allocation5 + $0xdd4] sm:$0xf0] }
 0x201   :  { %5650 = vmatpush.bf16.msra.mxu3 %v8070_v20  ;;  %v10158_v20 = vld [vmem:[#allocation5 + $0xa14] sm:$0xf0]  ;;  %v8389_v52 = vld [vmem:[#allocation5 + $0xde8] sm:$0xf]  ;;  %v8262_v22 = vor.u32 %v10250_v27, %v8261_v49 }
 0x202   :  { %5609 = vmatpush.bf16.msra.mxu0 %v7670_v50  ;;  %v10282_v50 = vld [vmem:[#allocation5 + $0xdf4] sm:$0xf0]  ;;  %v8517_v62 = vld [vmem:[#allocation5 + $0xee8] sm:$0xf] }
 0x203   :  { %5623 = vmatpush.bf16.msra.mxu1 %v7798_v13  ;;  %v7766_v13 = vor.u32 %v10126_v9, %v7765_v0  ;;  %v8645_v19 = vld [vmem:[#allocation5 + $0xfe8] sm:$0xf]  ;;  %v8390_v3 = vor.u32 %v10282_v50, %v8389_v52  ;;  %v8518_v63 = vor.u32 %v10314_v42, %v8517_v62  ;;  %v10310_v25 = vld [vmem:[#allocation5 + $0xed4] sm:$0xf0]  ;;  %v11165_v0 = vpop.f32.mrf.mxu1 }
 0x204   :  { %5637 = vmatpush.bf16.msra.mxu2 %v7926_v57  ;;  %v7894_v57 = vor.u32 %v10158_v20, %v7893_v11  ;;  %v8245_v12 = vld [vmem:[#allocation5 + $0xcc8] sm:$0xf]  ;;  %11448 = vst [vmem:[#allocation53_spill] sm:$0xff] %v11165_v0  ;;  %v10274_v27 = vld [vmem:[#allocation5 + $0xdb4] sm:$0xf0] }
 0x205   :  { %5651 = vmatpush.bf16.msra.mxu3 %v8054_v23  ;;  %v8022_v23 = vor.u32 %v10190_v15, %v8021_v16  ;;  %v8373_v29 = vld [vmem:[#allocation5 + $0xdc8] sm:$0xf]  ;;  %v8246_v9 = vor.u32 %v10246_v24, %v8245_v12  ;;  %v10242_v16 = vld [vmem:[#allocation5 + $0xcb4] sm:$0xf0] }
 0x206   :  { %5610 = vmatpush.bf16.msra.mxu0 %v7654_v61  ;;  %v8646_v61 = vor.u32 %v10346_v18, %v8645_v19  ;;  %v8501_v28 = vld [vmem:[#allocation5 + $0xec8] sm:$0xf]  ;;  %v8374_v11 = vor.u32 %v10278_v7, %v8373_v29  ;;  %v10338_v24 = vld [vmem:[#allocation5 + $0xfb4] sm:$0xf0]  ;;  %v11171_v19 = vpop.f32.mrf.mxu2 }
 0x207   :  { %5624 = vmatpush.bf16.msra.mxu1 %v7782_v8  ;;  %v8629_v8 = vld [vmem:[#allocation5 + $0xfc8] sm:$0xf]  ;;  %11449 = vst [vmem:[#allocation54_spill] sm:$0xff] %v11171_v19  ;;  %v10334_v7 = vld [vmem:[#allocation5 + $0xf94] sm:$0xf0] }
 0x208   :  { %5638 = vmatpush.bf16.msra.mxu2 %v7910_v53  ;;  %v10342_v53 = vld [vmem:[#allocation5 + $0xfd4] sm:$0xf0]  ;;  %v8229_v20 = vld [vmem:[#allocation5 + $0xca8] sm:$0xf] }
 0x209   :  { %5652 = vmatpush.bf16.msra.mxu3 %v8038_v30  ;;  %v8502_v30 = vor.u32 %v10310_v25, %v8501_v28  ;;  %v8357_v15 = vld [vmem:[#allocation5 + $0xda8] sm:$0xf]  ;;  %v8630_v49 = vor.u32 %v10342_v53, %v8629_v8  ;;  %v8230_v25 = vor.u32 %v10242_v16, %v8229_v20  ;;  %v10234_v20 = vld [vmem:[#allocation5 + $0xc74] sm:$0xf0] }
 0x20a   :  { %5611 = vmatpush.bf16.msra.mxu0 %v7638_v37  ;;  %v8485_v52 = vld [vmem:[#allocation5 + $0xea8] sm:$0xf]  ;;  %v10306_v37 = vld [vmem:[#allocation5 + $0xeb4] sm:$0xf0]  ;;  %v8358_v29 = vor.u32 %v10274_v27, %v8357_v15  ;;  %v5389_v12 = vpop.f32.mrf.mxu0 }
 0x20b   :  { %5625 = vmatpush.bf16.msra.mxu1 %v7766_v13  ;;  %v8613_v50 = vld [vmem:[#allocation5 + $0xfa8] sm:$0xf]  ;;  %v8486_v62 = vor.u32 %v10306_v37, %v8485_v52  ;;  %v10238_v13 = vld [vmem:[#allocation5 + $0xc94] sm:$0xf0]  ;;  %v5390_v28 = vadd.f32 %v5389_v12, %v11161_v14  ;;  %v5403_v53 = vpop.f32.mrf.mxu1 }
 0x20c   :  { %5639 = vmatpush.bf16.msra.mxu2 %v7894_v57  ;;  %v8213_v42 = vld [vmem:[#allocation5 + $0xc88] sm:$0xf]  ;;  %v8614_v18 = vor.u32 %v10338_v24, %v8613_v50  ;;  %v10266_v27 = vld [vmem:[#allocation5 + $0xd74] sm:$0xf0] }
 0x20d   :  { %5653 = vmatpush.bf16.msra.mxu3 %v8022_v23  ;;  %5612 = vmatmul.bf16.vlgmr.msra.gmra.mxu0 %v10973_v31  ;;  %v8341_v57 = vld [vmem:[#allocation5 + $0xd88] sm:$0xf]  ;;  %v10270_v23 = vld [vmem:[#allocation5 + $0xd94] sm:$0xf0]  ;;  %v8214_v8 = vor.u32 %v10238_v13, %v8213_v42 }
 0x20e   :  { %5660 = vmatpush.bf16.msrb.mxu0 %v8262_v22  ;;  %5626 = vmatmul.bf16.vlgmr.msra.gmra.mxu1 %v10977_v36  ;;  %v8469_v22 = vld [vmem:[#allocation5 + $0xe88] sm:$0xf]  ;;  %v10298_v37 = vld [vmem:[#allocation5 + $0xe74] sm:$0xf0] }
 0x20f   :  { %5674 = vmatpush.bf16.msrb.mxu1 %v8390_v3  ;;  %5640 = vmatmul.bf16.vlgmr.msra.gmra.mxu2 %v10975_v35  ;;  %v10302_v3 = vld [vmem:[#allocation5 + $0xe94] sm:$0xf0]  ;;  %v8325_v16 = vld [vmem:[#allocation5 + $0xd68] sm:$0xf] }
 0x210   :  { %5688 = vmatpush.bf16.msrb.mxu2 %v8518_v63  ;;  %5654 = vmatmul.bf16.vlgmr.msra.gmra.mxu3 %v10979_v40  ;;  %v11173_v63 = vpop.f32.mrf.mxu3  ;;  %v8453_v52 = vld [vmem:[#allocation5 + $0xe68] sm:$0xf]  ;;  %v10330_v24 = vld [vmem:[#allocation5 + $0xf74] sm:$0xf0]  ;;  %v8326_v14 = vor.u32 %v10266_v27, %v8325_v16 }
 0x211   :  { %5702 = vmatpush.bf16.msrb.mxu3 %v8646_v61  ;;  %11450 = vst [vmem:[#allocation55_spill] sm:$0xff] %v11173_v63  ;;  %v8597_v61 = vld [vmem:[#allocation5 + $0xf88] sm:$0xf]  ;;  %v10230_v42 = vld [vmem:[#allocation5 + $0xc54] sm:$0xf0] }
 0x212   :  { %5661 = vmatpush.bf16.msrb.mxu0 %v8246_v9  ;;  %v8342_v9 = vor.u32 %v10270_v23, %v8341_v57  ;;  %v8598_v15 = vor.u32 %v10334_v7, %v8597_v61  ;;  %v8581_v50 = vld [vmem:[#allocation5 + $0xf68] sm:$0xf]  ;;  %v5417_v23 = vpop.f32.mrf.mxu2  ;;  %v10258_v27 = vld [vmem:[#allocation5 + $0xd34] sm:$0xf0]  ;;  %v11178_v54 = vpop.f32.mrf.mxu0 }
 0x213   :  { %5675 = vmatpush.bf16.msrb.mxu1 %v8374_v11  ;;  %v8470_v11 = vor.u32 %v10302_v3, %v8469_v22  ;;  %v8309_v13 = vld [vmem:[#allocation5 + $0xd48] sm:$0xf]  ;;  %v8582_v57 = vor.u32 %v10330_v24, %v8581_v50  ;;  %v10294_v3 = vld [vmem:[#allocation5 + $0xe54] sm:$0xf0] }
 0x214   :  { %5689 = vmatpush.bf16.msrb.mxu2 %v8502_v30  ;;  %v8197_v30 = vld [vmem:[#allocation5 + $0xc68] sm:$0xf]  ;;  %v10322_v50 = vld [vmem:[#allocation5 + $0xf34] sm:$0xf0] }
 0x215   :  { %5703 = vmatpush.bf16.msrb.mxu3 %v8630_v49  ;;  %v5404_v49 = vadd.f32 %v5403_v53, %v5390_v28  ;;  %v8437_v22 = vld [vmem:[#allocation5 + $0xe48] sm:$0xf]  ;;  %v10326_v28 = vld [vmem:[#allocation5 + $0xf54] sm:$0xf0] }
 0x216   :  { %5662 = vmatpush.bf16.msrb.mxu0 %v8230_v25  ;;  %v8198_v25 = vor.u32 %v10234_v20, %v8197_v30  ;;  %v8565_v7 = vld [vmem:[#allocation5 + $0xf48] sm:$0xf]  ;;  %v10226_v20 = vld [vmem:[#allocation5 + $0xc34] sm:$0xf0] }
 0x217   :  { %5676 = vmatpush.bf16.msrb.mxu1 %v8358_v29  ;;  %v8454_v29 = vor.u32 %v10298_v37, %v8453_v52  ;;  %v5418_v12 = vadd.f32 %v5417_v23, %v5404_v49  ;;  %v8165_v30 = vld [vmem:[#allocation5 + $0xc28] sm:$0xf]  ;;  %v10290_v37 = vld [vmem:[#allocation5 + $0xe34] sm:$0xf0] }
 0x218   :  { %5690 = vmatpush.bf16.msrb.mxu2 %v8486_v62  ;;  %v8181_v62 = vld [vmem:[#allocation5 + $0xc48] sm:$0xf]  ;;  %v5431_v61 = vpop.f32.mrf.mxu3  ;;  %v8166_v24 = vor.u32 %v10226_v20, %v8165_v30  ;;  %v10442_v20 = vld [vmem:[#allocation5 + $0x12f4] sm:$0xf0] }
 0x219   :  { %5704 = vmatpush.bf16.msrb.mxu3 %v8614_v18  ;;  %v10262_v18 = vld [vmem:[#allocation5 + $0xd54] sm:$0xf0]  ;;  %v11176_v53 = vadd.f32 %v5431_v61, %v5418_v12  ;;  %v8293_v16 = vld [vmem:[#allocation5 + $0xd28] sm:$0xf] }
 0x21a   :  { %5663 = vmatpush.bf16.msrb.mxu0 %v8214_v8  ;;  %v8182_v8 = vor.u32 %v10230_v42, %v8181_v62  ;;  %v8421_v52 = vld [vmem:[#allocation5 + $0xe28] sm:$0xf]  ;;  %v10222_v62 = vld [vmem:[#allocation5 + $0xc14] sm:$0xf0] }
 0x21b   :  { %5677 = vmatpush.bf16.msrb.mxu1 %v8342_v9  ;;  %v8310_v9 = vor.u32 %v10262_v18, %v8309_v13  ;;  %v8549_v49 = vld [vmem:[#allocation5 + $0xf28] sm:$0xf]  ;;  %v10254_v13 = vld [vmem:[#allocation5 + $0xd14] sm:$0xf0] }
 0x21c   :  { %5691 = vmatpush.bf16.msrb.mxu2 %v8470_v11  ;;  %v8438_v11 = vor.u32 %v10294_v3, %v8437_v22  ;;  %v8277_v42 = vld [vmem:[#allocation5 + $0xd08] sm:$0xf]  ;;  %v8550_v18 = vor.u32 %v10322_v50, %v8549_v49  ;;  %v10318_v3 = vld [vmem:[#allocation5 + $0xf14] sm:$0xf0] }
 0x21d   :  { %5705 = vmatpush.bf16.msrb.mxu3 %v8598_v15  ;;  %v8566_v15 = vor.u32 %v10326_v28, %v8565_v7  ;;  %v8405_v23 = vld [vmem:[#allocation5 + $0xe08] sm:$0xf]  ;;  %v10378_v61 = vld [vmem:[#allocation5 + $0x10f4] sm:$0xf0] }
 0x21e   :  { %5664 = vmatpush.bf16.msrb.mxu0 %v8198_v25  ;;  %v8149_v25 = vld [vmem:[#allocation5 + $0xc08] sm:$0xf]  ;;  %v10374_v63 = vld [vmem:[#allocation5 + $0x10d4] sm:$0xf0] }
 0x21f   :  { %5678 = vmatpush.bf16.msrb.mxu1 %v8326_v14  ;;  %v8294_v14 = vor.u32 %v10258_v27, %v8293_v16  ;;  %v8533_v22 = vld [vmem:[#allocation5 + $0xf08] sm:$0xf]  ;;  %v8150_v28 = vor.u32 %v10222_v62, %v8149_v25  ;;  %v10474_v27 = vld [vmem:[#allocation5 + $0x13f4] sm:$0xf0] }
 0x220   :  { %5692 = vmatpush.bf16.msrb.mxu2 %v8454_v29  ;;  %v8422_v29 = vor.u32 %v10290_v37, %v8421_v52  ;;  %v8773_v12 = vld [vmem:[#allocation5 + $0x10e8] sm:$0xf]  ;;  %v10406_v25 = vld [vmem:[#allocation5 + $0x11d4] sm:$0xf0] }
 0x221   :  { %5706 = vmatpush.bf16.msrb.mxu3 %v8582_v57  ;;  %v10286_v57 = vld [vmem:[#allocation5 + $0xe14] sm:$0xf0]  ;;  %v8901_v7 = vld [vmem:[#allocation5 + $0x11e8] sm:$0xf]  ;;  %v8774_v52 = vor.u32 %v10378_v61, %v8773_v12 }
 0x222   :  { %5665 = vmatpush.bf16.msrb.mxu0 %v8182_v8  ;;  %v10410_v8 = vld [vmem:[#allocation5 + $0x11f4] sm:$0xf0]  ;;  %v9029_v30 = vld [vmem:[#allocation5 + $0x12e8] sm:$0xf] }
 0x223   :  { %5679 = vmatpush.bf16.msrb.mxu1 %v8310_v9  ;;  %v8278_v9 = vor.u32 %v10254_v13, %v8277_v42  ;;  %v9157_v16 = vld [vmem:[#allocation5 + $0x13e8] sm:$0xf]  ;;  %v8902_v37 = vor.u32 %v10410_v8, %v8901_v7  ;;  %v9030_v49 = vor.u32 %v10442_v20, %v9029_v30  ;;  %v10438_v0 = vld [vmem:[#allocation5 + $0x12d4] sm:$0xf0]  ;;  %v11180_v42 = vpop.f32.mrf.mxu1 }
 0x224   :  { %5693 = vmatpush.bf16.msrb.mxu2 %v8438_v11  ;;  %v8406_v11 = vor.u32 %v10286_v57, %v8405_v23  ;;  %v8757_v50 = vld [vmem:[#allocation5 + $0x10c8] sm:$0xf]  ;;  %v10402_v61 = vld [vmem:[#allocation5 + $0x11b4] sm:$0xf0] }
 0x225   :  { %5707 = vmatpush.bf16.msrb.mxu3 %v8566_v15  ;;  %v8534_v15 = vor.u32 %v10318_v3, %v8533_v22  ;;  %v8885_v19 = vld [vmem:[#allocation5 + $0x11c8] sm:$0xf]  ;;  %v8758_v13 = vor.u32 %v10374_v63, %v8757_v50  ;;  %v10370_v22 = vld [vmem:[#allocation5 + $0x10b4] sm:$0xf0] }
 0x226   :  { %5666 = vmatpush.bf16.msrb.mxu0 %v8166_v24  ;;  %v9158_v24 = vor.u32 %v10474_v27, %v9157_v16  ;;  %v9013_v62 = vld [vmem:[#allocation5 + $0x12c8] sm:$0xf]  ;;  %v8886_v23 = vor.u32 %v10406_v25, %v8885_v19  ;;  %v10466_v63 = vld [vmem:[#allocation5 + $0x13b4] sm:$0xf0]  ;;  %v11186_v16 = vpop.f32.mrf.mxu2 }
 0x227   :  { %5680 = vmatpush.bf16.msrb.mxu1 %v8294_v14  ;;  %v9141_v14 = vld [vmem:[#allocation5 + $0x13c8] sm:$0xf]  ;;  %11451 = vst [vmem:[#allocation56_spill] sm:$0xff] %v11186_v16  ;;  %v10462_v25 = vld [vmem:[#allocation5 + $0x1394] sm:$0xf0] }
 0x228   :  { %5694 = vmatpush.bf16.msrb.mxu2 %v8422_v29  ;;  %v10470_v29 = vld [vmem:[#allocation5 + $0x13d4] sm:$0xf0]  ;;  %v8741_v57 = vld [vmem:[#allocation5 + $0x10a8] sm:$0xf] }
 0x229   :  { %5708 = vmatpush.bf16.msrb.mxu3 %v8550_v18  ;;  %v9014_v18 = vor.u32 %v10438_v0, %v9013_v62  ;;  %v8869_v3 = vld [vmem:[#allocation5 + $0x11a8] sm:$0xf]  ;;  %v9142_v12 = vor.u32 %v10470_v29, %v9141_v14  ;;  %v8742_v0 = vor.u32 %v10370_v22, %v8741_v57  ;;  %v10362_v57 = vld [vmem:[#allocation5 + $0x1074] sm:$0xf0] }
 0x22a   :  { %5667 = vmatpush.bf16.msrb.mxu0 %v8150_v28  ;;  %v8997_v7 = vld [vmem:[#allocation5 + $0x12a8] sm:$0xf]  ;;  %v10434_v28 = vld [vmem:[#allocation5 + $0x12b4] sm:$0xf0]  ;;  %v8870_v19 = vor.u32 %v10402_v61, %v8869_v3  ;;  %v5445_v50 = vpop.f32.mrf.mxu0 }
 0x22b   :  { %5681 = vmatpush.bf16.msrb.mxu1 %v8278_v9  ;;  %v9125_v8 = vld [vmem:[#allocation5 + $0x13a8] sm:$0xf]  ;;  %v8998_v30 = vor.u32 %v10434_v28, %v8997_v7  ;;  %v10366_v9 = vld [vmem:[#allocation5 + $0x1094] sm:$0xf0]  ;;  %v5446_v62 = vadd.f32 %v5445_v50, %v11176_v53  ;;  %v5459_v29 = vpop.f32.mrf.mxu1 }
 0x22c   :  { %5695 = vmatpush.bf16.msrb.mxu2 %v8406_v11  ;;  %v8725_v20 = vld [vmem:[#allocation5 + $0x1088] sm:$0xf]  ;;  %v9126_v27 = vor.u32 %v10466_v63, %v9125_v8  ;;  %v10394_v61 = vld [vmem:[#allocation5 + $0x1174] sm:$0xf0] }
 0x22d   :  { %5709 = vmatpush.bf16.msrb.mxu3 %v8534_v15  ;;  %5668 = vmatmul.bf16.vlgmr.msrb.gmra.mxu0 %v10985_v32  ;;  %v8853_v11 = vld [vmem:[#allocation5 + $0x1188] sm:$0xf]  ;;  %v10398_v15 = vld [vmem:[#allocation5 + $0x1194] sm:$0xf0]  ;;  %v8726_v14 = vor.u32 %v10366_v9, %v8725_v20 }
 0x22e   :  { %5716 = vmatpush.bf16.msra.mxu0 %v8774_v52  ;;  %5682 = vmatmul.bf16.vlgmr.msrb.gmra.mxu1 %v10989_v41  ;;  %v8981_v52 = vld [vmem:[#allocation5 + $0x1288] sm:$0xf]  ;;  %v10426_v28 = vld [vmem:[#allocation5 + $0x1274] sm:$0xf0] }
 0x22f   :  { %5730 = vmatpush.bf16.msra.mxu1 %v8902_v37  ;;  %5696 = vmatmul.bf16.vlgmr.msrb.gmra.mxu2 %v10987_v38  ;;  %v10430_v37 = vld [vmem:[#allocation5 + $0x1294] sm:$0xf0]  ;;  %v8837_v22 = vld [vmem:[#allocation5 + $0x1168] sm:$0xf] }
 0x230   :  { %5744 = vmatpush.bf16.msra.mxu2 %v9030_v49  ;;  %5710 = vmatmul.bf16.vlgmr.msrb.gmra.mxu3 %v10991_v46  ;;  %v11188_v49 = vpop.f32.mrf.mxu3  ;;  %v8965_v7 = vld [vmem:[#allocation5 + $0x1268] sm:$0xf]  ;;  %v10458_v63 = vld [vmem:[#allocation5 + $0x1374] sm:$0xf0]  ;;  %v8838_v53 = vor.u32 %v10394_v61, %v8837_v22 }
 0x231   :  { %5758 = vmatpush.bf16.msra.mxu3 %v9158_v24  ;;  %11452 = vst [vmem:[#allocation57_spill] sm:$0xff] %v11188_v49  ;;  %v9109_v24 = vld [vmem:[#allocation5 + $0x1388] sm:$0xf]  ;;  %v10358_v20 = vld [vmem:[#allocation5 + $0x1054] sm:$0xf0] }
 0x232   :  { %5717 = vmatpush.bf16.msra.mxu0 %v8758_v13  ;;  %v8854_v13 = vor.u32 %v10398_v15, %v8853_v11  ;;  %v9110_v3 = vor.u32 %v10462_v25, %v9109_v24  ;;  %v9093_v8 = vld [vmem:[#allocation5 + $0x1368] sm:$0xf]  ;;  %v5473_v15 = vpop.f32.mrf.mxu2  ;;  %v10386_v61 = vld [vmem:[#allocation5 + $0x1134] sm:$0xf0] }
 0x233   :  { %5731 = vmatpush.bf16.msra.mxu1 %v8886_v23  ;;  %v8982_v23 = vor.u32 %v10430_v37, %v8981_v52  ;;  %v8821_v9 = vld [vmem:[#allocation5 + $0x1148] sm:$0xf]  ;;  %v9094_v11 = vor.u32 %v10458_v63, %v9093_v8  ;;  %v10422_v37 = vld [vmem:[#allocation5 + $0x1254] sm:$0xf0] }
 0x234   :  { %5745 = vmatpush.bf16.msra.mxu2 %v9014_v18  ;;  %v8709_v18 = vld [vmem:[#allocation5 + $0x1068] sm:$0xf]  ;;  %v10450_v8 = vld [vmem:[#allocation5 + $0x1334] sm:$0xf0] }
 0x235   :  { %5759 = vmatpush.bf16.msra.mxu3 %v9142_v12  ;;  %v5460_v12 = vadd.f32 %v5459_v29, %v5446_v62  ;;  %v8949_v52 = vld [vmem:[#allocation5 + $0x1248] sm:$0xf]  ;;  %v10454_v62 = vld [vmem:[#allocation5 + $0x1354] sm:$0xf0] }
 0x236   :  { %5718 = vmatpush.bf16.msra.mxu0 %v8742_v0  ;;  %v8710_v0 = vor.u32 %v10362_v57, %v8709_v18  ;;  %v9077_v25 = vld [vmem:[#allocation5 + $0x1348] sm:$0xf]  ;;  %v10354_v57 = vld [vmem:[#allocation5 + $0x1034] sm:$0xf0] }
 0x237   :  { %5732 = vmatpush.bf16.msra.mxu1 %v8870_v19  ;;  %v8966_v19 = vor.u32 %v10426_v28, %v8965_v7  ;;  %v5474_v50 = vadd.f32 %v5473_v15, %v5460_v12  ;;  %v8677_v18 = vld [vmem:[#allocation5 + $0x1028] sm:$0xf]  ;;  %v10418_v28 = vld [vmem:[#allocation5 + $0x1234] sm:$0xf0] }
 0x238   :  { %5746 = vmatpush.bf16.msra.mxu2 %v8998_v30  ;;  %v8693_v30 = vld [vmem:[#allocation5 + $0x1048] sm:$0xf]  ;;  %v5487_v24 = vpop.f32.mrf.mxu3  ;;  %v8678_v63 = vor.u32 %v10354_v57, %v8677_v18  ;;  %v10570_v57 = vld [vmem:[#allocation5 + $0x16f4] sm:$0xf0] }
 0x239   :  { %5760 = vmatpush.bf16.msra.mxu3 %v9126_v27  ;;  %v10390_v27 = vld [vmem:[#allocation5 + $0x1154] sm:$0xf0]  ;;  %v11191_v29 = vadd.f32 %v5487_v24, %v5474_v50  ;;  %v8805_v22 = vld [vmem:[#allocation5 + $0x1128] sm:$0xf] }
 0x23a   :  { %5719 = vmatpush.bf16.msra.mxu0 %v8726_v14  ;;  %v8694_v14 = vor.u32 %v10358_v20, %v8693_v30  ;;  %v8933_v7 = vld [vmem:[#allocation5 + $0x1228] sm:$0xf]  ;;  %v10350_v30 = vld [vmem:[#allocation5 + $0x1014] sm:$0xf0] }
 0x23b   :  { %5733 = vmatpush.bf16.msra.mxu1 %v8854_v13  ;;  %11453 = vst [vmem:[#allocation58_spill] sm:$0xff] %v11191_v29  ;;  %v8822_v13 = vor.u32 %v10390_v27, %v8821_v9  ;;  %v9061_v12 = vld [vmem:[#allocation5 + $0x1328] sm:$0xf]  ;;  %v10382_v9 = vld [vmem:[#allocation5 + $0x1114] sm:$0xf0] }
 0x23c   :  { %5747 = vmatpush.bf16.msra.mxu2 %v8982_v23  ;;  %v8950_v23 = vor.u32 %v10422_v37, %v8949_v52  ;;  %v8789_v20 = vld [vmem:[#allocation5 + $0x1108] sm:$0xf]  ;;  %v9062_v27 = vor.u32 %v10450_v8, %v9061_v12  ;;  %v10446_v37 = vld [vmem:[#allocation5 + $0x1314] sm:$0xf0] }
 0x23d   :  { %5761 = vmatpush.bf16.msra.mxu3 %v9110_v3  ;;  %v9078_v3 = vor.u32 %v10454_v62, %v9077_v25  ;;  %v8917_v15 = vld [vmem:[#allocation5 + $0x1208] sm:$0xf]  ;;  %v10506_v24 = vld [vmem:[#allocation5 + $0x14f4] sm:$0xf0] }
 0x23e   :  { %5720 = vmatpush.bf16.msra.mxu0 %v8710_v0  ;;  %v8661_v0 = vld [vmem:[#allocation5 + $0x1008] sm:$0xf]  ;;  %v10502_v29 = vld [vmem:[#allocation5 + $0x14d4] sm:$0xf0] }
 0x23f   :  { %5734 = vmatpush.bf16.msra.mxu1 %v8838_v53  ;;  %v8806_v53 = vor.u32 %v10386_v61, %v8805_v22  ;;  %v9045_v52 = vld [vmem:[#allocation5 + $0x1308] sm:$0xf]  ;;  %v8662_v62 = vor.u32 %v10350_v30, %v8661_v0  ;;  %v10602_v61 = vld [vmem:[#allocation5 + $0x17f4] sm:$0xf0] }
 0x240   :  { %5748 = vmatpush.bf16.msra.mxu2 %v8966_v19  ;;  %v8934_v19 = vor.u32 %v10418_v28, %v8933_v7  ;;  %v9285_v50 = vld [vmem:[#allocation5 + $0x14e8] sm:$0xf]  ;;  %v10534_v0 = vld [vmem:[#allocation5 + $0x15d4] sm:$0xf0] }
 0x241   :  { %5762 = vmatpush.bf16.msra.mxu3 %v9094_v11  ;;  %v10414_v11 = vld [vmem:[#allocation5 + $0x1214] sm:$0xf0]  ;;  %v9413_v25 = vld [vmem:[#allocation5 + $0x15e8] sm:$0xf]  ;;  %v9286_v7 = vor.u32 %v10506_v24, %v9285_v50 }
 0x242   :  { %5721 = vmatpush.bf16.msra.mxu0 %v8694_v14  ;;  %v10538_v14 = vld [vmem:[#allocation5 + $0x15f4] sm:$0xf0]  ;;  %v9541_v18 = vld [vmem:[#allocation5 + $0x16e8] sm:$0xf] }
 0x243   :  { %5735 = vmatpush.bf16.msra.mxu1 %v8822_v13  ;;  %v8790_v13 = vor.u32 %v10382_v9, %v8789_v20  ;;  %v9669_v22 = vld [vmem:[#allocation5 + $0x17e8] sm:$0xf]  ;;  %v9414_v28 = vor.u32 %v10538_v14, %v9413_v25  ;;  %v9542_v12 = vor.u32 %v10570_v57, %v9541_v18  ;;  %v10566_v16 = vld [vmem:[#allocation5 + $0x16d4] sm:$0xf0] }
 0x244   :  { %5749 = vmatpush.bf16.msra.mxu2 %v8950_v23  ;;  %v8918_v23 = vor.u32 %v10414_v11, %v8917_v15  ;;  %v9269_v8 = vld [vmem:[#allocation5 + $0x14c8] sm:$0xf]  ;;  %v10498_v11 = vld [vmem:[#allocation5 + $0x14b4] sm:$0xf0] }
 0x245   :  { %5763 = vmatpush.bf16.msra.mxu3 %v9078_v3  ;;  %v9046_v3 = vor.u32 %v10446_v37, %v9045_v52  ;;  %v9397_v49 = vld [vmem:[#allocation5 + $0x15c8] sm:$0xf]  ;;  %v9270_v20 = vor.u32 %v10502_v29, %v9269_v8  ;;  %v10530_v50 = vld [vmem:[#allocation5 + $0x15b4] sm:$0xf0] }
 0x246   :  { %5722 = vmatpush.bf16.msra.mxu0 %v8678_v63  ;;  %v9670_v63 = vor.u32 %v10602_v61, %v9669_v22  ;;  %v9525_v30 = vld [vmem:[#allocation5 + $0x16c8] sm:$0xf]  ;;  %v9398_v9 = vor.u32 %v10534_v0, %v9397_v49  ;;  %v10562_v25 = vld [vmem:[#allocation5 + $0x16b4] sm:$0xf0] }
 0x247   :  { %5736 = vmatpush.bf16.msra.mxu1 %v8806_v53  ;;  %v9653_v53 = vld [vmem:[#allocation5 + $0x17c8] sm:$0xf]  ;;  %v9526_v15 = vor.u32 %v10566_v16, %v9525_v30  ;;  %v10594_v29 = vld [vmem:[#allocation5 + $0x17b4] sm:$0xf0] }
 0x248   :  { %5750 = vmatpush.bf16.msra.mxu2 %v8934_v19  ;;  %v10598_v19 = vld [vmem:[#allocation5 + $0x17d4] sm:$0xf0]  ;;  %v9381_v52 = vld [vmem:[#allocation5 + $0x15a8] sm:$0xf] }
 0x249   :  { %5764 = vmatpush.bf16.msra.mxu3 %v9062_v27  ;;  %v9253_v27 = vld [vmem:[#allocation5 + $0x14a8] sm:$0xf]  ;;  %v9654_v37 = vor.u32 %v10598_v19, %v9653_v53  ;;  %v9382_v49 = vor.u32 %v10530_v50, %v9381_v52  ;;  %v10494_v57 = vld [vmem:[#allocation5 + $0x1494] sm:$0xf0] }
 0x24a   :  { %5723 = vmatpush.bf16.msra.mxu0 %v8662_v62  ;;  %v9509_v24 = vld [vmem:[#allocation5 + $0x16a8] sm:$0xf]  ;;  %v9254_v16 = vor.u32 %v10498_v11, %v9253_v27  ;;  %v10526_v22 = vld [vmem:[#allocation5 + $0x1594] sm:$0xf0] }
 0x24b   :  { %5737 = vmatpush.bf16.msra.mxu1 %v8790_v13  ;;  %v9637_v62 = vld [vmem:[#allocation5 + $0x17a8] sm:$0xf]  ;;  %v9510_v14 = vor.u32 %v10562_v25, %v9509_v24  ;;  %v10490_v30 = vld [vmem:[#allocation5 + $0x1474] sm:$0xf0] }
 0x24c   :  { %5751 = vmatpush.bf16.msra.mxu2 %v8918_v23  ;;  %v9237_v18 = vld [vmem:[#allocation5 + $0x1488] sm:$0xf]  ;;  %v9638_v23 = vor.u32 %v10594_v29, %v9637_v62  ;;  %v10586_v11 = vld [vmem:[#allocation5 + $0x1774] sm:$0xf0] }
 0x24d   :  { %5765 = vmatpush.bf16.msra.mxu3 %v9046_v3  ;;  %5724 = vmatmul.bf16.vlgmr.msra.gmra.mxu0 %v10997_v51  ;;  %v9365_v13 = vld [vmem:[#allocation5 + $0x1588] sm:$0xf]  ;;  %v10558_v3 = vld [vmem:[#allocation5 + $0x1694] sm:$0xf0] }
 0x24e   :  { %5772 = vmatpush.bf16.msrb.mxu0 %v9286_v7  ;;  %5738 = vmatmul.bf16.vlgmr.msra.gmra.mxu1 %v11001_v56  ;;  %v9493_v61 = vld [vmem:[#allocation5 + $0x1688] sm:$0xf]  ;;  %v9366_v8 = vor.u32 %v10526_v22, %v9365_v13  ;;  %v10486_v25 = vld [vmem:[#allocation5 + $0x1454] sm:$0xf0] }
 0x24f   :  { %5786 = vmatpush.bf16.msrb.mxu1 %v9414_v28  ;;  %5752 = vmatmul.bf16.vlgmr.msra.gmra.mxu2 %v10999_v55  ;;  %v9621_v7 = vld [vmem:[#allocation5 + $0x1788] sm:$0xf]  ;;  %v10590_v28 = vld [vmem:[#allocation5 + $0x1794] sm:$0xf0] }
 0x250   :  { %5800 = vmatpush.bf16.msrb.mxu2 %v9542_v12  ;;  %5766 = vmatmul.bf16.vlgmr.msra.gmra.mxu3 %v11003_v60  ;;  %v9238_v12 = vor.u32 %v10494_v57, %v9237_v18  ;;  %v9221_v0 = vld [vmem:[#allocation5 + $0x1468] sm:$0xf]  ;;  %v9622_v19 = vor.u32 %v10590_v28, %v9621_v7  ;;  %v10582_v57 = vld [vmem:[#allocation5 + $0x1754] sm:$0xf0] }
 0x251   :  { %5814 = vmatpush.bf16.msrb.mxu3 %v9670_v63  ;;  %v9494_v63 = vor.u32 %v10558_v3, %v9493_v61  ;;  %v9349_v53 = vld [vmem:[#allocation5 + $0x1568] sm:$0xf]  ;;  %v9222_v52 = vor.u32 %v10490_v30, %v9221_v0  ;;  %v10482_v3 = vld [vmem:[#allocation5 + $0x1434] sm:$0xf0] }
 0x252   :  { %5773 = vmatpush.bf16.msrb.mxu0 %v9270_v20  ;;  %v10522_v20 = vld [vmem:[#allocation5 + $0x1574] sm:$0xf0]  ;;  %v9605_v27 = vld [vmem:[#allocation5 + $0x1768] sm:$0xf] }
 0x253   :  { %5787 = vmatpush.bf16.msrb.mxu1 %v9398_v9  ;;  %v9477_v9 = vld [vmem:[#allocation5 + $0x1668] sm:$0xf]  ;;  %v9606_v29 = vor.u32 %v10586_v11, %v9605_v27  ;;  %v10578_v30 = vld [vmem:[#allocation5 + $0x1734] sm:$0xf0] }
 0x254   :  { %5801 = vmatpush.bf16.msrb.mxu2 %v9526_v15  ;;  %v10554_v15 = vld [vmem:[#allocation5 + $0x1674] sm:$0xf0]  ;;  %v9205_v24 = vld [vmem:[#allocation5 + $0x1448] sm:$0xf] }
 0x255   :  { %5815 = vmatpush.bf16.msrb.mxu3 %v9654_v37  ;;  %v9350_v37 = vor.u32 %v10522_v20, %v9349_v53  ;;  %v9478_v50 = vor.u32 %v10554_v15, %v9477_v9  ;;  %v9333_v62 = vld [vmem:[#allocation5 + $0x1548] sm:$0xf]  ;;  %v9206_v13 = vor.u32 %v10486_v25, %v9205_v24  ;;  %v10478_v20 = vld [vmem:[#allocation5 + $0x1414] sm:$0xf0] }
 0x256   :  { %5774 = vmatpush.bf16.msrb.mxu0 %v9254_v16  ;;  %v10518_v16 = vld [vmem:[#allocation5 + $0x1554] sm:$0xf0]  ;;  %v9589_v18 = vld [vmem:[#allocation5 + $0x1748] sm:$0xf] }
 0x257   :  { %5788 = vmatpush.bf16.msrb.mxu1 %v9382_v49  ;;  %v9461_v49 = vld [vmem:[#allocation5 + $0x1648] sm:$0xf]  ;;  %v9590_v28 = vor.u32 %v10582_v57, %v9589_v18  ;;  %v10510_v11 = vld [vmem:[#allocation5 + $0x1514] sm:$0xf0]  ;;  %v9928_v18 = vld [vmem:[#allocation5 + $0x2ec] sm:$0xf] }
 0x258   :  { %5802 = vmatpush.bf16.msrb.mxu2 %v9510_v14  ;;  %v10550_v14 = vld [vmem:[#allocation5 + $0x1654] sm:$0xf0]  ;;  %v9189_v61 = vld [vmem:[#allocation5 + $0x1428] sm:$0xf]  ;;  %v6983_v57 = vld [vmem:[#allocation5 + $0x2f8] sm:$0xf0] }
 0x259   :  { %5816 = vmatpush.bf16.msrb.mxu3 %v9638_v23  ;;  %v9334_v23 = vor.u32 %v10518_v16, %v9333_v62  ;;  %v9462_v22 = vor.u32 %v10550_v14, %v9461_v49  ;;  %v9317_v7 = vld [vmem:[#allocation5 + $0x1528] sm:$0xf]  ;;  %v9190_v53 = vor.u32 %v10482_v3, %v9189_v61  ;;  %v10574_v25 = vld [vmem:[#allocation5 + $0x1714] sm:$0xf0]  ;;  %v9864_v62 = vld [vmem:[#allocation5 + $0xec] sm:$0xf] }
 0x25a   :  { %5775 = vmatpush.bf16.msrb.mxu0 %v9238_v12  ;;  %v10514_v12 = vld [vmem:[#allocation5 + $0x1534] sm:$0xf0]  ;;  %v9573_v0 = vld [vmem:[#allocation5 + $0x1728] sm:$0xf]  ;;  %v9896_v16 = vld [vmem:[#allocation5 + $0x1ec] sm:$0xf] }
 0x25b   :  { %5789 = vmatpush.bf16.msrb.mxu1 %v9366_v8  ;;  %v9445_v8 = vld [vmem:[#allocation5 + $0x1628] sm:$0xf]  ;;  %v9318_v9 = vor.u32 %v10514_v12, %v9317_v7  ;;  %v6855_v14 = vld [vmem:[#allocation5 + $0x1f8] sm:$0xf0]  ;;  %v6986_v12 = vor.u32 %v9928_v18, %v6983_v57 }
 0x25c   :  { %5803 = vmatpush.bf16.msrb.mxu2 %v9494_v63  ;;  %v10546_v63 = vld [vmem:[#allocation5 + $0x1634] sm:$0xf0]  ;;  %v9301_v27 = vld [vmem:[#allocation5 + $0x1508] sm:$0xf]  ;;  %v7111_v61 = vld [vmem:[#allocation5 + $0x3f8] sm:$0xf0] }
 0x25d   :  { %5817 = vmatpush.bf16.msrb.mxu3 %v9622_v19  ;;  %v9173_v19 = vld [vmem:[#allocation5 + $0x1408] sm:$0xf]  ;;  %v9446_v15 = vor.u32 %v10546_v63, %v9445_v8  ;;  %v9860_v8 = vld [vmem:[#allocation5 + $0xcc] sm:$0xf]  ;;  %v6711_v63 = vld [vmem:[#allocation5 + $0xd8] sm:$0xf0] }
 0x25e   :  { %5776 = vmatpush.bf16.msrb.mxu0 %v9222_v52  ;;  %v9429_v52 = vld [vmem:[#allocation5 + $0x1608] sm:$0xf]  ;;  %v9174_v49 = vor.u32 %v10478_v20, %v9173_v19  ;;  %v9924_v19 = vld [vmem:[#allocation5 + $0x2cc] sm:$0xf]  ;;  %v6967_v20 = vld [vmem:[#allocation5 + $0x2d8] sm:$0xf0] }
 0x25f   :  { %5790 = vmatpush.bf16.msrb.mxu1 %v9350_v37  ;;  %v9574_v37 = vor.u32 %v10578_v30, %v9573_v0  ;;  %v9557_v24 = vld [vmem:[#allocation5 + $0x1708] sm:$0xf]  ;;  %v9892_v0 = vld [vmem:[#allocation5 + $0x1cc] sm:$0xf] }
 0x260   :  { %5804 = vmatpush.bf16.msrb.mxu2 %v9478_v50  ;;  %v10542_v50 = vld [vmem:[#allocation5 + $0x1614] sm:$0xf0]  ;;  %v9558_v3 = vor.u32 %v10574_v25, %v9557_v24  ;;  %v9888_v24 = vld [vmem:[#allocation5 + $0x1ac] sm:$0xf] }
 0x261   :  { %5818 = vmatpush.bf16.msrb.mxu3 %v9606_v29  ;;  %v6727_v29 = vld [vmem:[#allocation5 + $0xf8] sm:$0xf0] }
 0x262   :  { %5777 = vmatpush.bf16.msrb.mxu0 %v9206_v13  ;;  %v9302_v13 = vor.u32 %v10510_v11, %v9301_v27  ;;  %v6730_v7 = vor.u32 %v9864_v62, %v6727_v29  ;;  %v6714_v27 = vor.u32 %v9860_v8, %v6711_v63  ;;  %v6823_v62 = vld [vmem:[#allocation5 + $0x1b8] sm:$0xf0]  ;;  %v9920_v29 = vld [vmem:[#allocation5 + $0x2ac] sm:$0xf] }
 0x263   :  { %5791 = vmatpush.bf16.msrb.mxu1 %v9334_v23  ;;  %v9430_v23 = vor.u32 %v10542_v50, %v9429_v52  ;;  %v6970_v52 = vor.u32 %v9924_v19, %v6967_v20  ;;  %v6695_v50 = vld [vmem:[#allocation5 + $0xb8] sm:$0xf0]  ;;  %v6826_v57 = vor.u32 %v9888_v24, %v6823_v62  ;;  %v9948_v8 = vld [vmem:[#allocation5 + $0x38c] sm:$0xf] }
 0x264   :  { %5805 = vmatpush.bf16.msrb.mxu2 %v9462_v22  ;;  %v9960_v22 = vld [vmem:[#allocation5 + $0x3ec] sm:$0xf]  ;;  %v7063_v63 = vld [vmem:[#allocation5 + $0x398] sm:$0xf0] }
 0x265   :  { %5819 = vmatpush.bf16.msrb.mxu3 %v9590_v28  ;;  %v6858_v28 = vor.u32 %v9896_v16, %v6855_v14  ;;  %v7114_v30 = vor.u32 %v9960_v22, %v7111_v61  ;;  %v6951_v16 = vld [vmem:[#allocation5 + $0x2b8] sm:$0xf0]  ;;  %v9884_v61 = vld [vmem:[#allocation5 + $0x18c] sm:$0xf] }
 0x266   :  { %5778 = vmatpush.bf16.msrb.mxu0 %v9190_v53  ;;  %v6839_v53 = vld [vmem:[#allocation5 + $0x1d8] sm:$0xf0]  ;;  %v9848_v19 = vld [vmem:[#allocation5 + $0x6c] sm:$0xf] }
 0x267   :  { %5792 = vmatpush.bf16.msrb.mxu1 %v9318_v9  ;;  %v9956_v9 = vld [vmem:[#allocation5 + $0x3cc] sm:$0xf]  ;;  %v6842_v11 = vor.u32 %v9892_v0, %v6839_v53  ;;  %v7079_v14 = vld [vmem:[#allocation5 + $0x3b8] sm:$0xf0] }
 0x268   :  { %5806 = vmatpush.bf16.msrb.mxu2 %v9446_v15  ;;  %v7095_v15 = vld [vmem:[#allocation5 + $0x3d8] sm:$0xf0] }
 0x269   :  { %5820 = vmatpush.bf16.msrb.mxu3 %v9574_v37  ;;  %v9856_v37 = vld [vmem:[#allocation5 + $0xac] sm:$0xf]  ;;  %v7098_v25 = vor.u32 %v9956_v9, %v7095_v15  ;;  %v6679_v22 = vld [vmem:[#allocation5 + $0x98] sm:$0xf0]  ;;  %v7066_v15 = vor.u32 %v9948_v8, %v7063_v63 }
 0x26a   :  { %5779 = vmatpush.bf16.msrb.mxu0 %v9174_v49  ;;  %v9952_v49 = vld [vmem:[#allocation5 + $0x3ac] sm:$0xf]  ;;  %v6698_v18 = vor.u32 %v9856_v37, %v6695_v50  ;;  %v6663_v20 = vld [vmem:[#allocation5 + $0x78] sm:$0xf0] }
 0x26b   :  { %5793 = vmatpush.bf16.msrb.mxu1 %v9302_v13  ;;  %v6954_v13 = vor.u32 %v9920_v29, %v6951_v16  ;;  %v9880_v9 = vld [vmem:[#allocation5 + $0x16c] sm:$0xf]  ;;  %v7047_v50 = vld [vmem:[#allocation5 + $0x378] sm:$0xf0]  ;;  %v6666_v24 = vor.u32 %v9848_v19, %v6663_v20 }
 0x26c   :  { %5807 = vmatpush.bf16.msrb.mxu2 %v9430_v23  ;;  %v9852_v23 = vld [vmem:[#allocation5 + $0x8c] sm:$0xf]  ;;  %v6647_v16 = vld [vmem:[#allocation5 + $0x58] sm:$0xf0] }
 0x26d   :  { %5821 = vmatpush.bf16.msrb.mxu3 %v9558_v3  ;;  %5780 = vmatmul.bf16.vlgmr.msrb.gmra.mxu0 %v11018_v26  ;;  %v7082_v3 = vor.u32 %v9952_v49, %v7079_v14  ;;  %v6682_v0 = vor.u32 %v9852_v23, %v6679_v22  ;;  %v9944_v37 = vld [vmem:[#allocation5 + $0x36c] sm:$0xf]  ;;  %v7031_v22 = vld [vmem:[#allocation5 + $0x358] sm:$0xf0] }
 0x26e   :  { %5828 = vmatpush.bf16.msra.mxu0 %v6730_v7  ;;  %5794 = vmatmul.bf16.vlgmr.msrb.gmra.mxu1 %v11022_v34  ;;  %v6807_v7 = vld [vmem:[#allocation5 + $0x198] sm:$0xf0]  ;;  %v9844_v29 = vld [vmem:[#allocation5 + $0x4c] sm:$0xf]  ;;  %v7050_v14 = vor.u32 %v9944_v37, %v7047_v50 }
 0x26f   :  { %5842 = vmatpush.bf16.msra.mxu1 %v6858_v28  ;;  %5808 = vmatmul.bf16.vlgmr.msrb.gmra.mxu2 %v11020_v33  ;;  %v9916_v28 = vld [vmem:[#allocation5 + $0x28c] sm:$0xf]  ;;  %v7015_v20 = vld [vmem:[#allocation5 + $0x338] sm:$0xf0] }
 0x270   :  { %5856 = vmatpush.bf16.msra.mxu2 %v6986_v12  ;;  %5822 = vmatmul.bf16.vlgmr.msrb.gmra.mxu3 %v11026_v48  ;;  %v6935_v12 = vld [vmem:[#allocation5 + $0x298] sm:$0xf0]  ;;  %v9876_v49 = vld [vmem:[#allocation5 + $0x14c] sm:$0xf] }
 0x271   :  { %5870 = vmatpush.bf16.msra.mxu3 %v7114_v30  ;;  %v6810_v30 = vor.u32 %v9884_v61, %v6807_v7  ;;  %v6938_v53 = vor.u32 %v9916_v28, %v6935_v12  ;;  %v9940_v23 = vld [vmem:[#allocation5 + $0x34c] sm:$0xf]  ;;  %v6650_v61 = vor.u32 %v9844_v29, %v6647_v16  ;;  %v6631_v12 = vld [vmem:[#allocation5 + $0x38] sm:$0xf0] }
 0x272   :  { %5829 = vmatpush.bf16.msra.mxu0 %v6714_v27  ;;  %v6791_v27 = vld [vmem:[#allocation5 + $0x178] sm:$0xf0]  ;;  %v9840_v28 = vld [vmem:[#allocation5 + $0x2c] sm:$0xf]  ;;  %v7034_v63 = vor.u32 %v9940_v23, %v7031_v22 }
 0x273   :  { %5843 = vmatpush.bf16.msra.mxu1 %v6842_v11  ;;  %v9912_v11 = vld [vmem:[#allocation5 + $0x26c] sm:$0xf]  ;;  %v6743_v50 = vld [vmem:[#allocation5 + $0x118] sm:$0xf0] }
 0x274   :  { %5857 = vmatpush.bf16.msra.mxu2 %v6970_v52  ;;  %v6919_v52 = vld [vmem:[#allocation5 + $0x278] sm:$0xf0]  ;;  %v9872_v8 = vld [vmem:[#allocation5 + $0x12c] sm:$0xf] }
 0x275   :  { %5871 = vmatpush.bf16.msra.mxu3 %v7098_v25  ;;  %v6794_v25 = vor.u32 %v9880_v9, %v6791_v27  ;;  %v6922_v62 = vor.u32 %v9912_v11, %v6919_v52  ;;  %v9936_v19 = vld [vmem:[#allocation5 + $0x32c] sm:$0xf]  ;;  %v6634_v9 = vor.u32 %v9840_v28, %v6631_v12  ;;  %v6615_v27 = vld [vmem:[#allocation5 + $0x18] sm:$0xf0] }
 0x276   :  { %5830 = vmatpush.bf16.msra.mxu0 %v6698_v18  ;;  %v6775_v18 = vld [vmem:[#allocation5 + $0x158] sm:$0xf0]  ;;  %v9868_v37 = vld [vmem:[#allocation5 + $0x10c] sm:$0xf] }
 0x277   :  { %5844 = vmatpush.bf16.msra.mxu1 %v6826_v57  ;;  %v9908_v57 = vld [vmem:[#allocation5 + $0x24c] sm:$0xf]  ;;  %v6999_v16 = vld [vmem:[#allocation5 + $0x318] sm:$0xf0] }
 0x278   :  { %5858 = vmatpush.bf16.msra.mxu2 %v6954_v13  ;;  %v6903_v13 = vld [vmem:[#allocation5 + $0x258] sm:$0xf0]  ;;  %v9932_v29 = vld [vmem:[#allocation5 + $0x30c] sm:$0xf] }
 0x279   :  { %5872 = vmatpush.bf16.msra.mxu3 %v7082_v3  ;;  %v6778_v3 = vor.u32 %v9876_v49, %v6775_v18  ;;  %v6906_v7 = vor.u32 %v9908_v57, %v6903_v13  ;;  %v9992_v49 = vld [vmem:[#allocation5 + $0x4ec] sm:$0xf]  ;;  %v7367_v13 = vld [vmem:[#allocation5 + $0x5f8] sm:$0xf0]  ;;  %v7002_v12 = vor.u32 %v9932_v29, %v6999_v16 }
 0x27a   :  { %5831 = vmatpush.bf16.msra.mxu0 %v6682_v0  ;;  %v6759_v0 = vld [vmem:[#allocation5 + $0x138] sm:$0xf0]  ;;  %v10024_v18 = vld [vmem:[#allocation5 + $0x5ec] sm:$0xf] }
 0x27b   :  { %5845 = vmatpush.bf16.msra.mxu1 %v6810_v30  ;;  %v9904_v30 = vld [vmem:[#allocation5 + $0x22c] sm:$0xf]  ;;  %v6762_v11 = vor.u32 %v9872_v8, %v6759_v0  ;;  %v7495_v22 = vld [vmem:[#allocation5 + $0x6f8] sm:$0xf0] }
 0x27c   :  { %5859 = vmatpush.bf16.msra.mxu2 %v6938_v53  ;;  %v6887_v53 = vld [vmem:[#allocation5 + $0x238] sm:$0xf0]  ;;  %v10056_v23 = vld [vmem:[#allocation5 + $0x6ec] sm:$0xf] }
 0x27d   :  { %5873 = vmatpush.bf16.msra.mxu3 %v7066_v15  ;;  %v9836_v15 = vld [vmem:[#allocation5 + $0xc] sm:$0xf]  ;;  %v6890_v52 = vor.u32 %v9904_v30, %v6887_v53  ;;  %v7623_v28 = vld [vmem:[#allocation5 + $0x7f8] sm:$0xf0]  ;;  %v7498_v0 = vor.u32 %v10056_v23, %v7495_v22 }
 0x27e   :  { %5832 = vmatpush.bf16.msra.mxu0 %v6666_v24  ;;  %v9900_v24 = vld [vmem:[#allocation5 + $0x20c] sm:$0xf]  ;;  %v6618_v57 = vor.u32 %v9836_v15, %v6615_v27  ;;  %v7223_v53 = vld [vmem:[#allocation5 + $0x4d8] sm:$0xf0] }
 0x27f   :  { %5846 = vmatpush.bf16.msra.mxu1 %v6794_v25  ;;  %v7018_v25 = vor.u32 %v9936_v19, %v7015_v20  ;;  %v9988_v30 = vld [vmem:[#allocation5 + $0x4cc] sm:$0xf]  ;;  %v7479_v27 = vld [vmem:[#allocation5 + $0x6d8] sm:$0xf0] }
 0x280   :  { %5860 = vmatpush.bf16.msra.mxu2 %v6922_v62  ;;  %v6871_v62 = vld [vmem:[#allocation5 + $0x218] sm:$0xf0]  ;;  %v10020_v19 = vld [vmem:[#allocation5 + $0x5cc] sm:$0xf] }
 0x281   :  { %5874 = vmatpush.bf16.msra.mxu3 %v7050_v14  ;;  %v7239_v14 = vld [vmem:[#allocation5 + $0x4f8] sm:$0xf0]  ;;  %v10052_v15 = vld [vmem:[#allocation5 + $0x6cc] sm:$0xf] }
 0x282   :  { %5833 = vmatpush.bf16.msra.mxu0 %v6650_v61  ;;  %v6746_v61 = vor.u32 %v9868_v37, %v6743_v50  ;;  %v7242_v8 = vor.u32 %v9992_v49, %v7239_v14  ;;  %v7226_v37 = vor.u32 %v9988_v30, %v7223_v53  ;;  %v10016_v29 = vld [vmem:[#allocation5 + $0x5ac] sm:$0xf]  ;;  %v7335_v49 = vld [vmem:[#allocation5 + $0x5b8] sm:$0xf0] }
 0x283   :  { %5847 = vmatpush.bf16.msra.mxu1 %v6778_v3  ;;  %v6874_v3 = vor.u32 %v9900_v24, %v6871_v62  ;;  %v7482_v24 = vor.u32 %v10052_v15, %v7479_v27  ;;  %v7207_v62 = vld [vmem:[#allocation5 + $0x4b8] sm:$0xf0]  ;;  %v10048_v14 = vld [vmem:[#allocation5 + $0x6ac] sm:$0xf]  ;;  %v7338_v22 = vor.u32 %v10016_v29, %v7335_v49 }
 0x284   :  { %5861 = vmatpush.bf16.msra.mxu2 %v6906_v7  ;;  %v10088_v7 = vld [vmem:[#allocation5 + $0x7ec] sm:$0xf]  ;;  %v7303_v15 = vld [vmem:[#allocation5 + $0x578] sm:$0xf0] }
 0x285   :  { %5875 = vmatpush.bf16.msra.mxu3 %v7034_v63  ;;  %v7370_v63 = vor.u32 %v10024_v18, %v7367_v13  ;;  %v7626_v20 = vor.u32 %v10088_v7, %v7623_v28  ;;  %v7463_v18 = vld [vmem:[#allocation5 + $0x6b8] sm:$0xf0]  ;;  %v10012_v28 = vld [vmem:[#allocation5 + $0x58c] sm:$0xf] }
 0x286   :  { %5834 = vmatpush.bf16.msra.mxu0 %v6634_v9  ;;  %v7351_v9 = vld [vmem:[#allocation5 + $0x5d8] sm:$0xf0]  ;;  %v9976_v53 = vld [vmem:[#allocation5 + $0x46c] sm:$0xf] }
 0x287   :  { %5848 = vmatpush.bf16.msra.mxu1 %v6762_v11  ;;  %v10084_v11 = vld [vmem:[#allocation5 + $0x7cc] sm:$0xf]  ;;  %v7354_v50 = vor.u32 %v10020_v19, %v7351_v9  ;;  %v7591_v13 = vld [vmem:[#allocation5 + $0x7b8] sm:$0xf0] }
 0x288   :  { %5862 = vmatpush.bf16.msra.mxu2 %v6890_v52  ;;  %v7607_v52 = vld [vmem:[#allocation5 + $0x7d8] sm:$0xf0]  ;;  %v10040_v27 = vld [vmem:[#allocation5 + $0x66c] sm:$0xf] }
 0x289   :  { %5876 = vmatpush.bf16.msra.mxu3 %v7018_v25  ;;  %v9984_v25 = vld [vmem:[#allocation5 + $0x4ac] sm:$0xf]  ;;  %v7610_v16 = vor.u32 %v10084_v11, %v7607_v52  ;;  %v7191_v7 = vld [vmem:[#allocation5 + $0x498] sm:$0xf0] }
 0x28a   :  { %5835 = vmatpush.bf16.msra.mxu0 %v6618_v57  ;;  %v10080_v57 = vld [vmem:[#allocation5 + $0x7ac] sm:$0xf]  ;;  %v7210_v23 = vor.u32 %v9984_v25, %v7207_v62  ;;  %v7175_v19 = vld [vmem:[#allocation5 + $0x478] sm:$0xf0] }
 0x28b   :  { %5849 = vmatpush.bf16.msra.mxu1 %v6746_v61  ;;  %v7466_v61 = vor.u32 %v10048_v14, %v7463_v18  ;;  %v7431_v11 = vld [vmem:[#allocation5 + $0x678] sm:$0xf0]  ;;  %v10072_v52 = vld [vmem:[#allocation5 + $0x76c] sm:$0xf] }
 0x28c   :  { %5863 = vmatpush.bf16.msra.mxu2 %v6874_v3  ;;  %v9980_v3 = vld [vmem:[#allocation5 + $0x48c] sm:$0xf]  ;;  %v7434_v25 = vor.u32 %v10040_v27, %v7431_v11  ;;  %v7159_v29 = vld [vmem:[#allocation5 + $0x458] sm:$0xf0] }
 0x28d   :  { %5877 = vmatpush.bf16.msra.mxu3 %v7002_v12  ;;  %5836 = vmatmul.bf16.vlgmr.msra.gmra.mxu0 %v10949_v58  ;;  %v7594_v12 = vor.u32 %v10080_v57, %v7591_v13  ;;  %v7319_v58 = vld [vmem:[#allocation5 + $0x598] sm:$0xf0]  ;;  %v9972_v62 = vld [vmem:[#allocation5 + $0x44c] sm:$0xf] }
 0x28e   :  { %5884 = vmatpush.bf16.msrb.mxu0 %v7242_v8  ;;  %5850 = vmatmul.bf16.vlgmr.msra.gmra.mxu1 %v10955_v10  ;;  %v10044_v8 = vld [vmem:[#allocation5 + $0x68c] sm:$0xf]  ;;  %v7194_v10 = vor.u32 %v9980_v3, %v7191_v7  ;;  %v7322_v30 = vor.u32 %v10012_v28, %v7319_v58  ;;  %v7287_v14 = vld [vmem:[#allocation5 + $0x558] sm:$0xf0] }
 0x28f   :  { %5898 = vmatpush.bf16.msrb.mxu1 %v7370_v63  ;;  %5864 = vmatmul.bf16.vlgmr.msra.gmra.mxu2 %v10951_v1  ;;  %v7447_v63 = vld [vmem:[#allocation5 + $0x698] sm:$0xf0]  ;;  %v10036_v18 = vld [vmem:[#allocation5 + $0x64c] sm:$0xf] }
 0x290   :  { %5912 = vmatpush.bf16.msrb.mxu2 %v7498_v0  ;;  %5878 = vmatmul.bf16.vlgmr.msra.gmra.mxu3 %v10957_v17  ;;  %v10076_v0 = vld [vmem:[#allocation5 + $0x78c] sm:$0xf]  ;;  %v7575_v1 = vld [vmem:[#allocation5 + $0x798] sm:$0xf0]  ;;  %v7450_v17 = vor.u32 %v10044_v8, %v7447_v63 }
 0x291   :  { %5926 = vmatpush.bf16.msrb.mxu3 %v7626_v20  ;;  %v10008_v20 = vld [vmem:[#allocation5 + $0x56c] sm:$0xf]  ;;  %v7578_v9 = vor.u32 %v10076_v0, %v7575_v1  ;;  %v7415_v57 = vld [vmem:[#allocation5 + $0x658] sm:$0xf0] }
 0x292   :  { %5885 = vmatpush.bf16.msrb.mxu0 %v7226_v37  ;;  %v7559_v37 = vld [vmem:[#allocation5 + $0x778] sm:$0xf0]  ;;  %v10068_v13 = vld [vmem:[#allocation5 + $0x74c] sm:$0xf]  ;;  %v7418_v3 = vor.u32 %v10036_v18, %v7415_v57 }
 0x293   :  { %5899 = vmatpush.bf16.msrb.mxu1 %v7354_v50  ;;  %v7178_v50 = vor.u32 %v9976_v53, %v7175_v19  ;;  %v7562_v49 = vor.u32 %v10072_v52, %v7559_v37  ;;  %v9968_v7 = vld [vmem:[#allocation5 + $0x42c] sm:$0xf]  ;;  %v7143_v28 = vld [vmem:[#allocation5 + $0x438] sm:$0xf0] }
 0x294   :  { %5913 = vmatpush.bf16.msrb.mxu2 %v7482_v24  ;;  %v7306_v24 = vor.u32 %v10008_v20, %v7303_v15  ;;  %v7271_v8 = vld [vmem:[#allocation5 + $0x538] sm:$0xf0]  ;;  %v10032_v63 = vld [vmem:[#allocation5 + $0x62c] sm:$0xf] }
 0x295   :  { %5927 = vmatpush.bf16.msrb.mxu3 %v7610_v16  ;;  %v10004_v16 = vld [vmem:[#allocation5 + $0x54c] sm:$0xf]  ;;  %v7399_v0 = vld [vmem:[#allocation5 + $0x638] sm:$0xf0] }
 0x296   :  { %5886 = vmatpush.bf16.msrb.mxu0 %v7210_v23  ;;  %v7543_v23 = vld [vmem:[#allocation5 + $0x758] sm:$0xf0]  ;;  %v10064_v1 = vld [vmem:[#allocation5 + $0x72c] sm:$0xf]  ;;  %v7402_v20 = vor.u32 %v10032_v63, %v7399_v0 }
 0x297   :  { %5900 = vmatpush.bf16.msrb.mxu1 %v7338_v22  ;;  %v7162_v22 = vor.u32 %v9972_v62, %v7159_v29  ;;  %v7546_v58 = vor.u32 %v10068_v13, %v7543_v23  ;;  %v7127_v53 = vld [vmem:[#allocation5 + $0x418] sm:$0xf0]  ;;  %v10028_v27 = vld [vmem:[#allocation5 + $0x60c] sm:$0xf] }
 0x298   :  { %5914 = vmatpush.bf16.msrb.mxu2 %v7466_v61  ;;  %v7290_v61 = vor.u32 %v10004_v16, %v7287_v14  ;;  %v7255_v15 = vld [vmem:[#allocation5 + $0x518] sm:$0xf0]  ;;  %v10060_v37 = vld [vmem:[#allocation5 + $0x70c] sm:$0xf] }
 0x299   :  { %5928 = vmatpush.bf16.msrb.mxu3 %v7594_v12  ;;  %v10000_v12 = vld [vmem:[#allocation5 + $0x52c] sm:$0xf]  ;;  %v7383_v52 = vld [vmem:[#allocation5 + $0x618] sm:$0xf0] }
 0x29a   :  { %5887 = vmatpush.bf16.msrb.mxu0 %v7194_v10  ;;  %v7527_v10 = vld [vmem:[#allocation5 + $0x738] sm:$0xf0]  ;;  %v7274_v19 = vor.u32 %v10000_v12, %v7271_v8  ;;  %v10152_v62 = vld [vmem:[#allocation5 + $0x9ec] sm:$0xf]  ;;  %v7386_v57 = vor.u32 %v10028_v27, %v7383_v52 }
 0x29b   :  { %5901 = vmatpush.bf16.msrb.mxu1 %v7322_v30  ;;  %v7146_v30 = vor.u32 %v9968_v7, %v7143_v28  ;;  %v7530_v11 = vor.u32 %v10064_v1, %v7527_v10  ;;  %v7879_v16 = vld [vmem:[#allocation5 + $0x9f8] sm:$0xf0]  ;;  %v10216_v13 = vld [vmem:[#allocation5 + $0xbec] sm:$0xf] }
 0x29c   :  { %5915 = vmatpush.bf16.msrb.mxu2 %v7450_v17  ;;  %v9964_v17 = vld [vmem:[#allocation5 + $0x40c] sm:$0xf]  ;;  %v8007_v14 = vld [vmem:[#allocation5 + $0xaf8] sm:$0xf0] }
 0x29d   :  { %5929 = vmatpush.bf16.msrb.mxu3 %v7578_v9  ;;  %v9996_v9 = vld [vmem:[#allocation5 + $0x50c] sm:$0xf]  ;;  %v7130_v29 = vor.u32 %v9964_v17, %v7127_v53  ;;  %v8135_v23 = vld [vmem:[#allocation5 + $0xbf8] sm:$0xf0] }
 0x29e   :  { %5888 = vmatpush.bf16.msrb.mxu0 %v7178_v50  ;;  %v7511_v50 = vld [vmem:[#allocation5 + $0x718] sm:$0xf0]  ;;  %v7258_v18 = vor.u32 %v9996_v9, %v7255_v15  ;;  %v10116_v28 = vld [vmem:[#allocation5 + $0x8cc] sm:$0xf]  ;;  %v8138_v8 = vor.u32 %v10216_v13, %v8135_v23 }
 0x29f   :  { %5902 = vmatpush.bf16.msrb.mxu1 %v7306_v24  ;;  %v10120_v24 = vld [vmem:[#allocation5 + $0x8ec] sm:$0xf]  ;;  %v7735_v12 = vld [vmem:[#allocation5 + $0x8d8] sm:$0xf0] }
 0x2a0   :  { %5916 = vmatpush.bf16.msrb.mxu2 %v7434_v25  ;;  %v7751_v25 = vld [vmem:[#allocation5 + $0x8f8] sm:$0xf0]  ;;  %v10180_v0 = vld [vmem:[#allocation5 + $0xacc] sm:$0xf]  ;;  %v7738_v17 = vor.u32 %v10116_v28, %v7735_v12 }
 0x2a1   :  { %5930 = vmatpush.bf16.msrb.mxu3 %v7562_v49  ;;  %v10184_v49 = vld [vmem:[#allocation5 + $0xaec] sm:$0xf]  ;;  %v7863_v63 = vld [vmem:[#allocation5 + $0x9d8] sm:$0xf0] }
 0x2a2   :  { %5889 = vmatpush.bf16.msrb.mxu0 %v7162_v22  ;;  %v7514_v22 = vor.u32 %v10060_v37, %v7511_v50  ;;  %v8010_v7 = vor.u32 %v10184_v49, %v8007_v14  ;;  %v7991_v1 = vld [vmem:[#allocation5 + $0xad8] sm:$0xf0]  ;;  %v10212_v10 = vld [vmem:[#allocation5 + $0xbcc] sm:$0xf] }
 0x2a3   :  { %5903 = vmatpush.bf16.msrb.mxu1 %v7290_v61  ;;  %v7754_v61 = vor.u32 %v10120_v24, %v7751_v25  ;;  %v7719_v9 = vld [vmem:[#allocation5 + $0x8b8] sm:$0xf0]  ;;  %v10144_v15 = vld [vmem:[#allocation5 + $0x9ac] sm:$0xf] }
 0x2a4   :  { %5917 = vmatpush.bf16.msrb.mxu2 %v7418_v3  ;;  %v7882_v3 = vor.u32 %v10152_v62, %v7879_v16  ;;  %v10176_v52 = vld [vmem:[#allocation5 + $0xaac] sm:$0xf]  ;;  %v7975_v37 = vld [vmem:[#allocation5 + $0xab8] sm:$0xf0] }
 0x2a5   :  { %5931 = vmatpush.bf16.msrb.mxu3 %v7546_v58  ;;  %v10148_v58 = vld [vmem:[#allocation5 + $0x9cc] sm:$0xf]  ;;  %v8103_v24 = vld [vmem:[#allocation5 + $0xbb8] sm:$0xf0] }
 0x2a6   :  { %5890 = vmatpush.bf16.msrb.mxu0 %v7146_v30  ;;  %v8119_v30 = vld [vmem:[#allocation5 + $0xbd8] sm:$0xf0]  ;;  %v7866_v53 = vor.u32 %v10148_v58, %v7863_v63  ;;  %v10208_v50 = vld [vmem:[#allocation5 + $0xbac] sm:$0xf] }
 0x2a7   :  { %5904 = vmatpush.bf16.msrb.mxu1 %v7274_v19  ;;  %v7994_v19 = vor.u32 %v10180_v0, %v7991_v1  ;;  %v8122_v27 = vor.u32 %v10212_v10, %v8119_v30  ;;  %v10108_v16 = vld [vmem:[#allocation5 + $0x88c] sm:$0xf]  ;;  %v8106_v14 = vor.u32 %v10208_v50, %v8103_v24  ;;  %v7815_v12 = vld [vmem:[#allocation5 + $0x978] sm:$0xf0] }
 0x2a8   :  { %5918 = vmatpush.bf16.msrb.mxu2 %v7402_v20  ;;  %v10112_v20 = vld [vmem:[#allocation5 + $0x8ac] sm:$0xf]  ;;  %v8071_v0 = vld [vmem:[#allocation5 + $0xb78] sm:$0xf0] }
 0x2a9   :  { %5932 = vmatpush.bf16.msrb.mxu3 %v7530_v11  ;;  %v7847_v11 = vld [vmem:[#allocation5 + $0x9b8] sm:$0xf0]  ;;  %v7722_v25 = vor.u32 %v10112_v20, %v7719_v9  ;;  %v10140_v49 = vld [vmem:[#allocation5 + $0x98c] sm:$0xf] }
 0x2aa   :  { %5891 = vmatpush.bf16.msrb.mxu0 %v7130_v29  ;;  %v7850_v62 = vor.u32 %v10144_v15, %v7847_v11  ;;  %v7978_v29 = vor.u32 %v10176_v52, %v7975_v37  ;;  %v10204_v13 = vld [vmem:[#allocation5 + $0xb8c] sm:$0xf]  ;;  %v7799_v9 = vld [vmem:[#allocation5 + $0x958] sm:$0xf0] }
 0x2ab   :  { %5905 = vmatpush.bf16.msrb.mxu1 %v7258_v18  ;;  %v7831_v18 = vld [vmem:[#allocation5 + $0x998] sm:$0xf0]  ;;  %v10168_v58 = vld [vmem:[#allocation5 + $0xa6c] sm:$0xf] }
 0x2ac   :  { %5919 = vmatpush.bf16.msrb.mxu2 %v7386_v57  ;;  %v10172_v57 = vld [vmem:[#allocation5 + $0xa8c] sm:$0xf]  ;;  %v8055_v52 = vld [vmem:[#allocation5 + $0xb58] sm:$0xf0] }
 0x2ad   :  { %5933 = vmatpush.bf16.msrb.mxu3 %v7514_v22  ;;  %5892 = vmatmul.bf16.vlgmr.msrb.gmra.mxu0 %v10961_v39  ;;  %v7703_v39 = vld [vmem:[#allocation5 + $0x898] sm:$0xf0]  ;;  %v10200_v63 = vld [vmem:[#allocation5 + $0xb6c] sm:$0xf] }
 0x2ae   :  { %5940 = vmatpush.bf16.msra.mxu0 %v7754_v61  ;;  %5906 = vmatmul.bf16.vlgmr.msrb.gmra.mxu1 %v10965_v44  ;;  %v8087_v44 = vld [vmem:[#allocation5 + $0xb98] sm:$0xf0]  ;;  %v7706_v23 = vor.u32 %v10108_v16, %v7703_v39  ;;  %v10104_v61 = vld [vmem:[#allocation5 + $0x86c] sm:$0xf]  ;;  %v8074_v20 = vor.u32 %v10200_v63, %v8071_v0  ;;  %v11211_v63 = vpop.f32.mrf.mxu1 }
 0x2af   :  { %5954 = vmatpush.bf16.msra.mxu1 %v7882_v3  ;;  %5920 = vmatmul.bf16.vlgmr.msrb.gmra.mxu2 %v10963_v43  ;;  %v7959_v43 = vld [vmem:[#allocation5 + $0xa98] sm:$0xf0]  ;;  %v8090_v28 = vor.u32 %v10204_v13, %v8087_v44  ;;  %v10164_v15 = vld [vmem:[#allocation5 + $0xa4c] sm:$0xf] }
 0x2b0   :  { %5968 = vmatpush.bf16.msra.mxu2 %v8010_v7  ;;  %5934 = vmatmul.bf16.vlgmr.msrb.gmra.mxu3 %v10967_v47  ;;  %v7834_v47 = vor.u32 %v10140_v49, %v7831_v18  ;;  %v7962_v22 = vor.u32 %v10172_v57, %v7959_v43  ;;  %v7687_v3 = vld [vmem:[#allocation5 + $0x878] sm:$0xf0]  ;;  %v10136_v7 = vld [vmem:[#allocation5 + $0x96c] sm:$0xf]  ;;  %v11209_v18 = vpop.f32.mrf.mxu0 }
 0x2b1   :  { %5982 = vmatpush.bf16.msra.mxu3 %v8138_v8  ;;  %v7943_v8 = vld [vmem:[#allocation5 + $0xa78] sm:$0xf0]  ;;  %v7690_v1 = vor.u32 %v10104_v61, %v7687_v3  ;;  %v7818_v10 = vor.u32 %v10136_v7, %v7815_v12  ;;  %v10196_v11 = vld [vmem:[#allocation5 + $0xb4c] sm:$0xf] }
 0x2b2   :  { %5941 = vmatpush.bf16.msra.mxu0 %v7738_v17  ;;  %v7946_v30 = vor.u32 %v10168_v58, %v7943_v8  ;;  %v10100_v17 = vld [vmem:[#allocation5 + $0x84c] sm:$0xf]  ;;  %v8058_v16 = vor.u32 %v10196_v11, %v8055_v52  ;;  %v7783_v39 = vld [vmem:[#allocation5 + $0x938] sm:$0xf0] }
 0x2b3   :  { %5955 = vmatpush.bf16.msra.mxu1 %v7866_v53  ;;  %v7671_v53 = vld [vmem:[#allocation5 + $0x858] sm:$0xf0]  ;;  %v10160_v49 = vld [vmem:[#allocation5 + $0xa2c] sm:$0xf] }
 0x2b4   :  { %5969 = vmatpush.bf16.msra.mxu2 %v7994_v19  ;;  %v10132_v19 = vld [vmem:[#allocation5 + $0x94c] sm:$0xf]  ;;  %v7674_v37 = vor.u32 %v10100_v17, %v7671_v53  ;;  %v8039_v43 = vld [vmem:[#allocation5 + $0xb38] sm:$0xf0] }
 0x2b5   :  { %5983 = vmatpush.bf16.msra.mxu3 %v8122_v27  ;;  %v7927_v27 = vld [vmem:[#allocation5 + $0xa58] sm:$0xf0]  ;;  %v7802_v50 = vor.u32 %v10132_v19, %v7799_v9  ;;  %v10192_v57 = vld [vmem:[#allocation5 + $0xb2c] sm:$0xf] }
 0x2b6   :  { %5942 = vmatpush.bf16.msra.mxu0 %v7722_v25  ;;  %v7930_v24 = vor.u32 %v10164_v15, %v7927_v27  ;;  %v10096_v25 = vld [vmem:[#allocation5 + $0x82c] sm:$0xf]  ;;  %v7767_v3 = vld [vmem:[#allocation5 + $0x918] sm:$0xf0] }
 0x2b7   :  { %5956 = vmatpush.bf16.msra.mxu1 %v7850_v62  ;;  %v7655_v62 = vld [vmem:[#allocation5 + $0x838] sm:$0xf0]  ;;  %v10092_v44 = vld [vmem:[#allocation5 + $0x80c] sm:$0xf] }
 0x2b8   :  { %5970 = vmatpush.bf16.msra.mxu2 %v7978_v29  ;;  %v10128_v29 = vld [vmem:[#allocation5 + $0x92c] sm:$0xf]  ;;  %v7658_v13 = vor.u32 %v10096_v25, %v7655_v62  ;;  %v7895_v12 = vld [vmem:[#allocation5 + $0xa18] sm:$0xf0] }
 0x2b9   :  { %5984 = vmatpush.bf16.msra.mxu3 %v8106_v14  ;;  %v7911_v14 = vld [vmem:[#allocation5 + $0xa38] sm:$0xf0]  ;;  %v10124_v61 = vld [vmem:[#allocation5 + $0x90c] sm:$0xf] }
 0x2ba   :  { %5943 = vmatpush.bf16.msra.mxu0 %v7706_v23  ;;  %v7639_v23 = vld [vmem:[#allocation5 + $0x818] sm:$0xf0]  ;;  %v10156_v7 = vld [vmem:[#allocation5 + $0xa0c] sm:$0xf]  ;;  %v7770_v9 = vor.u32 %v10124_v61, %v7767_v3 }
 0x2bb   :  { %5957 = vmatpush.bf16.msra.mxu1 %v7834_v47  ;;  %v7786_v47 = vor.u32 %v10128_v29, %v7783_v39  ;;  %v10188_v58 = vld [vmem:[#allocation5 + $0xb0c] sm:$0xf]  ;;  %v8023_v8 = vld [vmem:[#allocation5 + $0xb18] sm:$0xf0]  ;;  %v7898_v15 = vor.u32 %v10156_v7, %v7895_v12 }
 0x2bc   :  { %5971 = vmatpush.bf16.msra.mxu2 %v7962_v22  ;;  %v7914_v22 = vor.u32 %v10160_v49, %v7911_v14  ;;  %v10248_v0 = vld [vmem:[#allocation5 + $0xcec] sm:$0xf]  ;;  %v8391_v17 = vld [vmem:[#allocation5 + $0xdf8] sm:$0xf0]  ;;  %v8026_v52 = vor.u32 %v10188_v58, %v8023_v8 }
 0x2bd   :  { %5985 = vmatpush.bf16.msra.mxu3 %v8090_v28  ;;  %v8042_v28 = vor.u32 %v10192_v57, %v8039_v43  ;;  %v10312_v53 = vld [vmem:[#allocation5 + $0xeec] sm:$0xf]  ;;  %v8519_v19 = vld [vmem:[#allocation5 + $0xef8] sm:$0xf0]  ;;  %v11217_v43 = vpop.f32.mrf.mxu3 }
 0x2be   :  { %5944 = vmatpush.bf16.msra.mxu0 %v7690_v1  ;;  %v8263_v1 = vld [vmem:[#allocation5 + $0xcf8] sm:$0xf0]  ;;  %v10344_v27 = vld [vmem:[#allocation5 + $0xfec] sm:$0xf]  ;;  %v8522_v25 = vor.u32 %v10312_v53, %v8519_v19  ;;  %11455 = vst [vmem:[#allocation60_spill] sm:$0xff] %v11217_v43 }
 0x2bf   :  { %5958 = vmatpush.bf16.msra.mxu1 %v7818_v10  ;;  %v10280_v10 = vld [vmem:[#allocation5 + $0xdec] sm:$0xf]  ;;  %v8647_v11 = vld [vmem:[#allocation5 + $0xff8] sm:$0xf0] }
 0x2c0   :  { %5972 = vmatpush.bf16.msra.mxu2 %v7946_v30  ;;  %v7642_v30 = vor.u32 %v10092_v44, %v7639_v23  ;;  %v10244_v62 = vld [vmem:[#allocation5 + $0xccc] sm:$0xf]  ;;  %v8247_v29 = vld [vmem:[#allocation5 + $0xcd8] sm:$0xf0]  ;;  %v8650_v39 = vor.u32 %v10344_v27, %v8647_v11 }
 0x2c1   :  { %5986 = vmatpush.bf16.msra.mxu3 %v8074_v20  ;;  %v11213_v20 = vpop.f32.mrf.mxu2  ;;  %v8375_v49 = vld [vmem:[#allocation5 + $0xdd8] sm:$0xf0]  ;;  %v10308_v14 = vld [vmem:[#allocation5 + $0xecc] sm:$0xf]  ;;  %v8250_v23 = vor.u32 %v10244_v62, %v8247_v29 }
 0x2c2   :  { %5945 = vmatpush.bf16.msra.mxu0 %v7674_v37  ;;  %11454 = vst [vmem:[#allocation59_spill] sm:$0xff] %v11213_v20  ;;  %v8266_v37 = vor.u32 %v10248_v0, %v8263_v1  ;;  %v8503_v57 = vld [vmem:[#allocation5 + $0xed8] sm:$0xf0]  ;;  %v10240_v3 = vld [vmem:[#allocation5 + $0xcac] sm:$0xf] }
 0x2c3   :  { %5959 = vmatpush.bf16.msra.mxu1 %v7802_v50  ;;  %v11215_v50 = vpop.f32.mrf.mxu0  ;;  %v8631_v44 = vld [vmem:[#allocation5 + $0xfd8] sm:$0xf0]  ;;  %v8506_v61 = vor.u32 %v10308_v14, %v8503_v57  ;;  %v10304_v8 = vld [vmem:[#allocation5 + $0xeac] sm:$0xf] }
 0x2c4   :  { %5973 = vmatpush.bf16.msra.mxu2 %v7930_v24  ;;  %v8394_v24 = vor.u32 %v10280_v10, %v8391_v17  ;;  %v8231_v7 = vld [vmem:[#allocation5 + $0xcb8] sm:$0xf0]  ;;  %v10336_v10 = vld [vmem:[#allocation5 + $0xfac] sm:$0xf] }
 0x2c5   :  { %5987 = vmatpush.bf16.msra.mxu3 %v8058_v16  ;;  %v10276_v16 = vld [vmem:[#allocation5 + $0xdcc] sm:$0xf]  ;;  %v8359_v58 = vld [vmem:[#allocation5 + $0xdb8] sm:$0xf0]  ;;  %v8234_v17 = vor.u32 %v10240_v3, %v8231_v7 }
 0x2c6   :  { %5946 = vmatpush.bf16.msra.mxu0 %v7658_v13  ;;  %v10340_v13 = vld [vmem:[#allocation5 + $0xfcc] sm:$0xf]  ;;  %v8487_v0 = vld [vmem:[#allocation5 + $0xeb8] sm:$0xf0] }
 0x2c7   :  { %5960 = vmatpush.bf16.msra.mxu1 %v7786_v47  ;;  %v11219_v47 = vpop.f32.mrf.mxu1  ;;  %v8634_v12 = vor.u32 %v10340_v13, %v8631_v44  ;;  %v10236_v19 = vld [vmem:[#allocation5 + $0xc8c] sm:$0xf]  ;;  %v8343_v11 = vld [vmem:[#allocation5 + $0xd98] sm:$0xf0] }
 0x2c8   :  { %5974 = vmatpush.bf16.msra.mxu2 %v7914_v22  ;;  %v8378_v22 = vor.u32 %v10276_v16, %v8375_v49  ;;  %v10232_v16 = vld [vmem:[#allocation5 + $0xc6c] sm:$0xf]  ;;  %v8327_v57 = vld [vmem:[#allocation5 + $0xd78] sm:$0xf0] }
 0x2c9   :  { %5988 = vmatpush.bf16.msra.mxu3 %v8042_v28  ;;  %v10272_v28 = vld [vmem:[#allocation5 + $0xdac] sm:$0xf]  ;;  %v11222_v1 = vpop.f32.mrf.mxu2  ;;  %v8455_v44 = vld [vmem:[#allocation5 + $0xe78] sm:$0xf0] }
 0x2ca   :  { %5947 = vmatpush.bf16.msra.mxu0 %v7642_v30  ;;  %v8615_v30 = vld [vmem:[#allocation5 + $0xfb8] sm:$0xf0]  ;;  %v8362_v53 = vor.u32 %v10272_v28, %v8359_v58  ;;  %v10264_v49 = vld [vmem:[#allocation5 + $0xd6c] sm:$0xf] }
 0x2cb   :  { %5961 = vmatpush.bf16.msra.mxu1 %v7770_v9  ;;  %v8215_v9 = vld [vmem:[#allocation5 + $0xc98] sm:$0xf0]  ;;  %v8618_v27 = vor.u32 %v10336_v10, %v8615_v30  ;;  %v10296_v13 = vld [vmem:[#allocation5 + $0xe6c] sm:$0xf]  ;;  %v8330_v28 = vor.u32 %v10264_v49, %v8327_v57 }
 0x2cc   :  { %5975 = vmatpush.bf16.msra.mxu2 %v7898_v15  ;;  %v10268_v15 = vld [vmem:[#allocation5 + $0xd8c] sm:$0xf]  ;;  %v8311_v30 = vld [vmem:[#allocation5 + $0xd58] sm:$0xf0] }
 0x2cd   :  { %5989 = vmatpush.bf16.msra.mxu3 %v8026_v52  ;;  %5948 = vmatmul.bf16.vlgmr.msra.gmra.mxu0 %v10973_v31  ;;  %v8490_v31 = vor.u32 %v10304_v8, %v8487_v0  ;;  %v10300_v52 = vld [vmem:[#allocation5 + $0xe8c] sm:$0xf]  ;;  %v8346_v62 = vor.u32 %v10268_v15, %v8343_v11  ;;  %v8183_v8 = vld [vmem:[#allocation5 + $0xc58] sm:$0xf0] }
 0x2ce   :  { %5996 = vmatpush.bf16.msrb.mxu0 %v8266_v37  ;;  %5962 = vmatmul.bf16.vlgmr.msra.gmra.mxu1 %v10977_v36  ;;  %v11227_v37 = vpop.f32.mrf.mxu0  ;;  %v11229_v36 = vpop.f32.mrf.mxu3  ;;  %v10228_v58 = vld [vmem:[#allocation5 + $0xc4c] sm:$0xf]  ;;  %v8551_v49 = vld [vmem:[#allocation5 + $0xf38] sm:$0xf0] }
 0x2cf   :  { %6010 = vmatpush.bf16.msrb.mxu1 %v8394_v24  ;;  %5976 = vmatmul.bf16.vlgmr.msra.gmra.mxu2 %v10975_v35  ;;  %v8471_v35 = vld [vmem:[#allocation5 + $0xe98] sm:$0xf0]  ;;  %v10332_v24 = vld [vmem:[#allocation5 + $0xf8c] sm:$0xf] }
 0x2d0   :  { %6024 = vmatpush.bf16.msrb.mxu2 %v8522_v25  ;;  %5990 = vmatmul.bf16.vlgmr.msra.gmra.mxu3 %v10979_v40  ;;  %v8599_v40 = vld [vmem:[#allocation5 + $0xf98] sm:$0xf0]  ;;  %v8218_v25 = vor.u32 %v10236_v19, %v8215_v9  ;;  %v8474_v29 = vor.u32 %v10300_v52, %v8471_v35  ;;  %v10260_v0 = vld [vmem:[#allocation5 + $0xd4c] sm:$0xf]  ;;  %v8186_v9 = vor.u32 %v10228_v58, %v8183_v8 }
 0x2d1   :  { %6038 = vmatpush.bf16.msrb.mxu3 %v8650_v39  ;;  %v8199_v39 = vld [vmem:[#allocation5 + $0xc78] sm:$0xf0]  ;;  %v8602_v14 = vor.u32 %v10332_v24, %v8599_v40  ;;  %v11233_v7 = vpop.f32.mrf.mxu2  ;;  %v8314_v11 = vor.u32 %v10260_v0, %v8311_v30  ;;  %v10224_v35 = vld [vmem:[#allocation5 + $0xc2c] sm:$0xf] }
 0x2d2   :  { %5997 = vmatpush.bf16.msrb.mxu0 %v8250_v23  ;;  %v11231_v23 = vpop.f32.mrf.mxu1  ;;  %v8202_v3 = vor.u32 %v10232_v16, %v8199_v39  ;;  %v8567_v19 = vld [vmem:[#allocation5 + $0xf58] sm:$0xf0]  ;;  %v10256_v40 = vld [vmem:[#allocation5 + $0xd2c] sm:$0xf] }
 0x2d3   :  { %6011 = vmatpush.bf16.msrb.mxu1 %v8378_v22  ;;  %v10328_v22 = vld [vmem:[#allocation5 + $0xf6c] sm:$0xf]  ;;  %v8167_v24 = vld [vmem:[#allocation5 + $0xc38] sm:$0xf0] }
 0x2d4   :  { %6025 = vmatpush.bf16.msrb.mxu2 %v8506_v61  ;;  %v8583_v61 = vld [vmem:[#allocation5 + $0xf78] sm:$0xf0]  ;;  %v10320_v39 = vld [vmem:[#allocation5 + $0xf2c] sm:$0xf] }
 0x2d5   :  { %6039 = vmatpush.bf16.msrb.mxu3 %v8634_v12  ;;  %v8458_v12 = vor.u32 %v10296_v13, %v8455_v44  ;;  %v8586_v10 = vor.u32 %v10328_v22, %v8583_v61  ;;  %v8423_v16 = vld [vmem:[#allocation5 + $0xe38] sm:$0xf0]  ;;  %v10220_v57 = vld [vmem:[#allocation5 + $0xc0c] sm:$0xf]  ;;  %v8554_v58 = vor.u32 %v10320_v39, %v8551_v49 }
 0x2d6   :  { %5998 = vmatpush.bf16.msrb.mxu0 %v8234_v17  ;;  %v10292_v17 = vld [vmem:[#allocation5 + $0xe4c] sm:$0xf]  ;;  %v11235_v15 = vpop.f32.mrf.mxu3  ;;  %v8151_v13 = vld [vmem:[#allocation5 + $0xc18] sm:$0xf0] }
 0x2d7   :  { %6012 = vmatpush.bf16.msrb.mxu1 %v8362_v53  ;;  %v8439_v53 = vld [vmem:[#allocation5 + $0xe58] sm:$0xf0]  ;;  %v10316_v0 = vld [vmem:[#allocation5 + $0xf0c] sm:$0xf] }
 0x2d8   :  { %6026 = vmatpush.bf16.msrb.mxu2 %v8490_v31  ;;  %v10324_v31 = vld [vmem:[#allocation5 + $0xf4c] sm:$0xf]  ;;  %v8442_v52 = vor.u32 %v10292_v17, %v8439_v53  ;;  %v8407_v8 = vld [vmem:[#allocation5 + $0xe18] sm:$0xf0] }
 0x2d9   :  { %6040 = vmatpush.bf16.msrb.mxu3 %v8618_v27  ;;  %v11237_v27 = vpop.f32.mrf.mxu0  ;;  %v11241_v30 = vpop.f32.mrf.mxu2  ;;  %v10376_v17 = vld [vmem:[#allocation5 + $0x10ec] sm:$0xf]  ;;  %v8775_v53 = vld [vmem:[#allocation5 + $0x10f8] sm:$0xf0] }
 0x2da   :  { %5999 = vmatpush.bf16.msrb.mxu0 %v8218_v25  ;;  %v8570_v25 = vor.u32 %v10324_v31, %v8567_v19  ;;  %v11239_v44 = vpop.f32.mrf.mxu1  ;;  %v10408_v31 = vld [vmem:[#allocation5 + $0x11ec] sm:$0xf]  ;;  %v8154_v19 = vor.u32 %v10220_v57, %v8151_v13  ;;  %v8759_v57 = vld [vmem:[#allocation5 + $0x10d8] sm:$0xf0] }
 0x2db   :  { %6013 = vmatpush.bf16.msrb.mxu1 %v8346_v62  ;;  %v8295_v62 = vld [vmem:[#allocation5 + $0xd38] sm:$0xf0]  ;;  %v10404_v13 = vld [vmem:[#allocation5 + $0x11cc] sm:$0xf] }
 0x2dc   :  { %6027 = vmatpush.bf16.msrb.mxu2 %v8474_v29  ;;  %v10288_v29 = vld [vmem:[#allocation5 + $0xe2c] sm:$0xf]  ;;  %v8298_v22 = vor.u32 %v10256_v40, %v8295_v62 }
 0x2dd   :  { %6041 = vmatpush.bf16.msrb.mxu3 %v8602_v14  ;;  %v8170_v14 = vor.u32 %v10224_v35, %v8167_v24  ;;  %v8426_v61 = vor.u32 %v10288_v29, %v8423_v16  ;;  %v10472_v40 = vld [vmem:[#allocation5 + $0x13ec] sm:$0xf]  ;;  %v8778_v29 = vor.u32 %v10376_v17, %v8775_v53  ;;  %v8743_v53 = vld [vmem:[#allocation5 + $0x10b8] sm:$0xf0] }
 0x2de   :  { %6000 = vmatpush.bf16.msrb.mxu0 %v8202_v3  ;;  %v10252_v3 = vld [vmem:[#allocation5 + $0xd0c] sm:$0xf]  ;;  %v11245_v39 = vpop.f32.mrf.mxu3 }
 0x2df   :  { %6014 = vmatpush.bf16.msrb.mxu1 %v8330_v28  ;;  %v8279_v28 = vld [vmem:[#allocation5 + $0xd18] sm:$0xf0]  ;;  %v10368_v17 = vld [vmem:[#allocation5 + $0x10ac] sm:$0xf] }
 0x2e0   :  { %6028 = vmatpush.bf16.msrb.mxu2 %v8458_v12  ;;  %v10284_v12 = vld [vmem:[#allocation5 + $0xe0c] sm:$0xf]  ;;  %v8282_v35 = vor.u32 %v10252_v3, %v8279_v28  ;;  %v9015_v3 = vld [vmem:[#allocation5 + $0x12d8] sm:$0xf0] }
 0x2e1   :  { %6042 = vmatpush.bf16.msrb.mxu3 %v8586_v10  ;;  %v8535_v10 = vld [vmem:[#allocation5 + $0xf18] sm:$0xf0]  ;;  %v8410_v24 = vor.u32 %v10284_v12, %v8407_v8  ;;  %v11243_v16 = vpop.f32.mrf.mxu0  ;;  %v10468_v28 = vld [vmem:[#allocation5 + $0x13cc] sm:$0xf] }
 0x2e2   :  { %6001 = vmatpush.bf16.msrb.mxu0 %v8186_v9  ;;  %v8903_v9 = vld [vmem:[#allocation5 + $0x11f8] sm:$0xf0]  ;;  %v8538_v62 = vor.u32 %v10316_v0, %v8535_v10  ;;  %v11247_v8 = vpop.f32.mrf.mxu1 }
 0x2e3   :  { %6015 = vmatpush.bf16.msrb.mxu1 %v8314_v11  ;;  %v10440_v11 = vld [vmem:[#allocation5 + $0x12ec] sm:$0xf]  ;;  %v8906_v49 = vor.u32 %v10408_v31, %v8903_v9  ;;  %v9143_v12 = vld [vmem:[#allocation5 + $0x13d8] sm:$0xf0] }
 0x2e4   :  { %6029 = vmatpush.bf16.msrb.mxu2 %v8442_v52  ;;  %v9031_v52 = vld [vmem:[#allocation5 + $0x12f8] sm:$0xf0]  ;;  %v10400_v31 = vld [vmem:[#allocation5 + $0x11ac] sm:$0xf] }
 0x2e5   :  { %6043 = vmatpush.bf16.msrb.mxu3 %v8570_v25  ;;  %v9159_v25 = vld [vmem:[#allocation5 + $0x13f8] sm:$0xf0]  ;;  %v9034_v43 = vor.u32 %v10440_v11, %v9031_v52  ;;  %v10432_v11 = vld [vmem:[#allocation5 + $0x12ac] sm:$0xf] }
 0x2e6   :  { %6002 = vmatpush.bf16.msrb.mxu0 %v8170_v14  ;;  %v10372_v14 = vld [vmem:[#allocation5 + $0x10cc] sm:$0xf]  ;;  %v9162_v20 = vor.u32 %v10472_v40, %v9159_v25  ;;  %v8871_v9 = vld [vmem:[#allocation5 + $0x11b8] sm:$0xf0]  ;;  %v11254_v40 = vld [vmem:[#allocation7] sm:$0xf] }
 0x2e7   :  { %6016 = vmatpush.bf16.msrb.mxu1 %v8298_v22  ;;  %v8887_v22 = vld [vmem:[#allocation5 + $0x11d8] sm:$0xf0]  ;;  %v974_v25 = vperm.slane %v11254_v40, 2 }
 0x2e8   :  { %6030 = vmatpush.bf16.msrb.mxu2 %v8426_v61  ;;  %v10436_v61 = vld [vmem:[#allocation5 + $0x12cc] sm:$0xf]  ;;  %v8890_v0 = vor.u32 %v10404_v13, %v8887_v22  ;;  %v8999_v52 = vld [vmem:[#allocation5 + $0x12b8] sm:$0xf0] }
 0x2e9   :  { %6044 = vmatpush.bf16.msrb.mxu3 %v8554_v58  ;;  %v8762_v58 = vor.u32 %v10372_v14, %v8759_v57  ;;  %v9018_v10 = vor.u32 %v10436_v61, %v9015_v3  ;;  %v10396_v14 = vld [vmem:[#allocation5 + $0x118c] sm:$0xf]  ;;  %v8855_v57 = vld [vmem:[#allocation5 + $0x1198] sm:$0xf0]  ;;  %v11456_v61 = vperm.slane %v11005_v4, 0  ;;  %v11263_v3 = vpop.f32.mrf.mxu3 }
 0x2ea   :  { %6003 = vmatpush.bf16.msrb.mxu0 %v8154_v19  ;;  %v9146_v19 = vor.u32 %v10468_v28, %v9143_v12  ;;  %v10428_v13 = vld [vmem:[#allocation5 + $0x128c] sm:$0xf]  ;;  %v8983_v22 = vld [vmem:[#allocation5 + $0x1298] sm:$0xf0]  ;;  %v8858_v4 = vor.u32 %v10396_v14, %v8855_v57 }
 0x2eb   :  { %6017 = vmatpush.bf16.msrb.mxu1 %v8282_v35  ;;  %v11250_v35 = vpop.f32.mrf.mxu2  ;;  %v10460_v28 = vld [vmem:[#allocation5 + $0x138c] sm:$0xf]  ;;  %v9111_v12 = vld [vmem:[#allocation5 + $0x1398] sm:$0xf0] }
 0x2ec   :  { %6031 = vmatpush.bf16.msrb.mxu2 %v8410_v24  ;;  %v10464_v24 = vld [vmem:[#allocation5 + $0x13ac] sm:$0xf]  ;;  %v8695_v57 = vld [vmem:[#allocation5 + $0x1058] sm:$0xf0] }
 0x2ed   :  { %6045 = vmatpush.bf16.msrb.mxu3 %v8538_v62  ;;  %6004 = vmatmul.bf16.vlgmr.msrb.gmra.mxu0 %v10985_v32  ;;  %v8746_v32 = vor.u32 %v10368_v17, %v8743_v53  ;;  %v8874_v62 = vor.u32 %v10400_v31, %v8871_v9  ;;  %v5504_v17 = vadd.f32 %v11227_v37, %v974_v25  ;;  %v11270_v31 = vpop.f32.mrf.mxu1  ;;  %v8711_v9 = vld [vmem:[#allocation5 + $0x1078] sm:$0xf0]  ;;  %v10456_v37 = vld [vmem:[#allocation5 + $0x136c] sm:$0xf] }
 0x2ee   :  { %6052 = vmatpush.bf16.msra.mxu0 %v8778_v29  ;;  %6018 = vmatmul.bf16.vlgmr.msrb.gmra.mxu1 %v10989_v41  ;;  %v9002_v29 = vor.u32 %v10432_v11, %v8999_v52  ;;  %v10392_v11 = vld [vmem:[#allocation5 + $0x116c] sm:$0xf]  ;;  %v9114_v52 = vor.u32 %v10460_v28, %v9111_v12  ;;  %v9079_v12 = vld [vmem:[#allocation5 + $0x1358] sm:$0xf0] }
 0x2ef   :  { %6066 = vmatpush.bf16.msra.mxu1 %v8906_v49  ;;  %6032 = vmatmul.bf16.vlgmr.msrb.gmra.mxu2 %v10987_v38  ;;  %v10364_v49 = vld [vmem:[#allocation5 + $0x108c] sm:$0xf]  ;;  %v8727_v38 = vld [vmem:[#allocation5 + $0x1098] sm:$0xf0] }
 0x2f0   :  { %6080 = vmatpush.bf16.msra.mxu2 %v9034_v43  ;;  %v9127_v43 = vld [vmem:[#allocation5 + $0x13b8] sm:$0xf0]  ;;  %6046 = vmatmul.bf16.vlgmr.msrb.gmra.mxu3 %v10991_v46  ;;  %v4832_v46 = vadd.f32 %v11016_v21, %v11456_v61  ;;  %v8730_v53 = vor.u32 %v10364_v49, %v8727_v38  ;;  %v8986_v21 = vor.u32 %v10428_v13, %v8983_v22  ;;  %v10388_v13 = vld [vmem:[#allocation5 + $0x114c] sm:$0xf] }
 0x2f1   :  { %6094 = vmatpush.bf16.msra.mxu3 %v9162_v20  ;;  %v11258_v20 = vpop.f32.mrf.mxu0  ;;  %v9130_v41 = vor.u32 %v10464_v24, %v9127_v43  ;;  %v10424_v24 = vld [vmem:[#allocation5 + $0x126c] sm:$0xf]  ;;  %v8823_v22 = vld [vmem:[#allocation5 + $0x1158] sm:$0xf0] }
 0x2f2   :  { %6053 = vmatpush.bf16.msra.mxu0 %v8762_v58  ;;  %v11457_v58 = vperm.slane %v11107_v6, 1  ;;  %v8839_v6 = vld [vmem:[#allocation5 + $0x1178] sm:$0xf0]  ;;  %v10420_v61 = vld [vmem:[#allocation5 + $0x124c] sm:$0xf] }
 0x2f3   :  { %6067 = vmatpush.bf16.msra.mxu1 %v8890_v0  ;;  %v11273_v43 = vpop.f32.mrf.mxu2  ;;  %v8842_v38 = vor.u32 %v10392_v11, %v8839_v6  ;;  %v10416_v6 = vld [vmem:[#allocation5 + $0x122c] sm:$0xf] }
 0x2f4   :  { %6081 = vmatpush.bf16.msra.mxu2 %v9018_v10  ;;  %v5168_v0 = vadd.f32 %v11118_v2, %v11457_v58  ;;  %v5502_v10 = vadd.f32 %v11215_v50, %v974_v25  ;;  %v8967_v2 = vld [vmem:[#allocation5 + $0x1278] sm:$0xf0]  ;;  %v4846_v50 = vadd.f32 %v11024_v45, %v4832_v46  ;;  %v11458_v58 = vld [vmem:[#allocation42_spill] sm:$0xff] }
 0x2f5   :  { %6095 = vmatpush.bf16.msra.mxu3 %v9146_v19  ;;  %v10360_v19 = vld [vmem:[#allocation5 + $0x106c] sm:$0xf]  ;;  %v9095_v25 = vld [vmem:[#allocation5 + $0x1378] sm:$0xf0]  ;;  %v8970_v14 = vor.u32 %v10424_v24, %v8967_v2  ;;  %v11459_v2 = vld [vmem:[#allocation20_spill] sm:$0xff] }
 0x2f6   :  { %6054 = vmatpush.bf16.msra.mxu0 %v8746_v32  ;;  %v5182_v32 = vadd.f32 %v11120_v59, %v5168_v0  ;;  %v8714_v49 = vor.u32 %v10360_v19, %v8711_v9  ;;  %v9098_v45 = vor.u32 %v10456_v37, %v9095_v25  ;;  %v8951_v46 = vld [vmem:[#allocation5 + $0x1258] sm:$0xf0]  ;;  %v4860_v59 = vadd.f32 %v11032_v5, %v4846_v50  ;;  %v10352_v19 = vld [vmem:[#allocation5 + $0x102c] sm:$0xf]  ;;  %v11287_v37 = vpop.f32.mrf.mxu1 }
 0x2f7   :  { %6068 = vmatpush.bf16.msra.mxu1 %v8874_v62  ;;  %v5516_v62 = vadd.f32 %v11219_v47, %v5502_v10  ;;  %v11281_v47 = vpop.f32.mrf.mxu3  ;;  %v8679_v5 = vld [vmem:[#allocation5 + $0x1038] sm:$0xf0]  ;;  %v10384_v9 = vld [vmem:[#allocation5 + $0x112c] sm:$0xf] }
 0x2f8   :  { %6082 = vmatpush.bf16.msra.mxu2 %v9002_v29  ;;  %v5518_v29 = vadd.f32 %v11231_v23, %v5504_v17  ;;  %v10452_v23 = vld [vmem:[#allocation5 + $0x134c] sm:$0xf]  ;;  %v5196_v0 = vadd.f32 %v11458_v58, %v5182_v32  ;;  %v8935_v24 = vld [vmem:[#allocation5 + $0x1238] sm:$0xf0]  ;;  %v4874_v50 = vadd.f32 %v11459_v2, %v4860_v59 }
 0x2f9   :  { %6096 = vmatpush.bf16.msra.mxu3 %v9130_v41  ;;  %v10356_v41 = vld [vmem:[#allocation5 + $0x104c] sm:$0xf]  ;;  %v11279_v28 = vpop.f32.mrf.mxu0  ;;  %v5530_v10 = vadd.f32 %v11222_v1, %v5516_v62  ;;  %v9082_v11 = vor.u32 %v10452_v23, %v9079_v12  ;;  %v8919_v59 = vld [vmem:[#allocation5 + $0x1218] sm:$0xf0] }
 0x2fa   :  { %6055 = vmatpush.bf16.msra.mxu0 %v8730_v53  ;;  %v5532_v17 = vadd.f32 %v11233_v7, %v5518_v29  ;;  %v8698_v53 = vor.u32 %v10356_v41, %v8695_v57  ;;  %v10448_v1 = vld [vmem:[#allocation5 + $0x132c] sm:$0xf]  ;;  %v9063_v7 = vld [vmem:[#allocation5 + $0x1338] sm:$0xf0] }
 0x2fb   :  { %6069 = vmatpush.bf16.msra.mxu1 %v8858_v4  ;;  %v8826_v4 = vor.u32 %v10388_v13, %v8823_v22  ;;  %v11460_v25 = vld [vmem:[#allocation43_spill] sm:$0xff]  ;;  %v5544_v62 = vadd.f32 %v11229_v36, %v5530_v10  ;;  %v11292_v41 = vpop.f32.mrf.mxu2  ;;  %v8938_v13 = vor.u32 %v10416_v6, %v8935_v24  ;;  %v8791_v22 = vld [vmem:[#allocation5 + $0x1118] sm:$0xf0] }
 0x2fc   :  { %6083 = vmatpush.bf16.msra.mxu2 %v8986_v21  ;;  %v8954_v21 = vor.u32 %v10420_v61, %v8951_v46  ;;  %v5210_v32 = vadd.f32 %v11460_v25, %v5196_v0  ;;  %v5546_v29 = vadd.f32 %v11235_v15, %v5532_v17  ;;  %v10412_v61 = vld [vmem:[#allocation5 + $0x120c] sm:$0xf]  ;;  %v9066_v46 = vor.u32 %v10448_v1, %v9063_v7  ;;  %v9047_v36 = vld [vmem:[#allocation5 + $0x1318] sm:$0xf0] }
 0x2fd   :  { %6097 = vmatpush.bf16.msra.mxu3 %v9114_v52  ;;  %v8807_v52 = vld [vmem:[#allocation5 + $0x1138] sm:$0xf0]  ;;  %v10444_v23 = vld [vmem:[#allocation5 + $0x130c] sm:$0xf]  ;;  %v8922_v2 = vor.u32 %v10412_v61, %v8919_v59 }
 0x2fe   :  { %6056 = vmatpush.bf16.msra.mxu0 %v8714_v49  ;;  %v8682_v49 = vor.u32 %v10352_v19, %v8679_v5  ;;  %v8810_v57 = vor.u32 %v10384_v9, %v8807_v52  ;;  %v11461_v12 = vld [vmem:[#allocation21_spill] sm:$0xff]  ;;  %v10504_v0 = vld [vmem:[#allocation5 + $0x14ec] sm:$0xf]  ;;  %v5560_v19 = vadd.f32 %v11243_v16, %v5546_v29  ;;  %v9050_v7 = vor.u32 %v10444_v23, %v9047_v36 }
 0x2ff   :  { %6070 = vmatpush.bf16.msra.mxu1 %v8842_v38  ;;  %v10348_v38 = vld [vmem:[#allocation5 + $0x100c] sm:$0xf]  ;;  %v4888_v15 = vadd.f32 %v11461_v12, %v4874_v50  ;;  %v9287_v10 = vld [vmem:[#allocation5 + $0x14f8] sm:$0xf0]  ;;  %v11300_v6 = vpop.f32.mrf.mxu3 }
 0x300   :  { %6084 = vmatpush.bf16.msra.mxu2 %v8970_v14  ;;  %v8663_v14 = vld [vmem:[#allocation5 + $0x1018] sm:$0xf0]  ;;  %v10536_v17 = vld [vmem:[#allocation5 + $0x15ec] sm:$0xf]  ;;  %v9290_v25 = vor.u32 %v10504_v0, %v9287_v10  ;;  %v11466_v10 = vld [vmem:[#allocation46_spill] sm:$0xff] }
 0x301   :  { %6098 = vmatpush.bf16.msra.mxu3 %v9098_v45  ;;  %v10380_v45 = vld [vmem:[#allocation5 + $0x110c] sm:$0xf]  ;;  %v11295_v58 = vpop.f32.mrf.mxu0  ;;  %v8666_v5 = vor.u32 %v10348_v38, %v8663_v14  ;;  %v9415_v9 = vld [vmem:[#allocation5 + $0x15f8] sm:$0xf0] }
 0x302   :  { %6057 = vmatpush.bf16.msra.mxu0 %v8698_v53  ;;  %v11462_v53 = vld [vmem:[#allocation44_spill] sm:$0xff]  ;;  %v9543_v52 = vld [vmem:[#allocation5 + $0x16f8] sm:$0xf0]  ;;  %v8794_v24 = vor.u32 %v10380_v45, %v8791_v22  ;;  %v10600_v50 = vld [vmem:[#allocation5 + $0x17ec] sm:$0xf]  ;;  %v9418_v16 = vor.u32 %v10536_v17, %v9415_v9 }
 0x303   :  { %6071 = vmatpush.bf16.msra.mxu1 %v8826_v4  ;;  %v5224_v4 = vadd.f32 %v11462_v53, %v5210_v32  ;;  %v9671_v1 = vld [vmem:[#allocation5 + $0x17f8] sm:$0xf0]  ;;  %v11463_v32 = vld [vmem:[#allocation22_spill] sm:$0xff]  ;;  %v10532_v14 = vld [vmem:[#allocation5 + $0x15cc] sm:$0xf]  ;;  %v11309_v36 = vpop.f32.mrf.mxu2 }
 0x304   :  { %6085 = vmatpush.bf16.msra.mxu2 %v8954_v21  ;;  %v5558_v21 = vadd.f32 %v11237_v27, %v5544_v62  ;;  %v4902_v27 = vadd.f32 %v11463_v32, %v4888_v15  ;;  %v11303_v62 = vpop.f32.mrf.mxu1  ;;  %v9271_v38 = vld [vmem:[#allocation5 + $0x14d8] sm:$0xf0]  ;;  %v9674_v45 = vor.u32 %v10600_v50, %v9671_v1  ;;  %v10564_v61 = vld [vmem:[#allocation5 + $0x16cc] sm:$0xf] }
 0x305   :  { %6099 = vmatpush.bf16.msra.mxu3 %v9082_v11  ;;  %v10568_v11 = vld [vmem:[#allocation5 + $0x16ec] sm:$0xf]  ;;  %v11464_v12 = vld [vmem:[#allocation45_spill] sm:$0xff] }
 0x306   :  { %6058 = vmatpush.bf16.msra.mxu0 %v8682_v49  ;;  %v9546_v29 = vor.u32 %v10568_v11, %v9543_v52  ;;  %v10500_v49 = vld [vmem:[#allocation5 + $0x14cc] sm:$0xf]  ;;  %v5238_v53 = vadd.f32 %v11464_v12, %v5224_v4  ;;  %v9399_v22 = vld [vmem:[#allocation5 + $0x15d8] sm:$0xf0] }
 0x307   :  { %6072 = vmatpush.bf16.msra.mxu1 %v8810_v57  ;;  %v5572_v57 = vadd.f32 %v11239_v44, %v5558_v21  ;;  %v11465_v59 = vld [vmem:[#allocation23_spill] sm:$0xff]  ;;  %v9655_v0 = vld [vmem:[#allocation5 + $0x17d8] sm:$0xf0]  ;;  %v9274_v44 = vor.u32 %v10500_v49, %v9271_v38 }
 0x308   :  { %6086 = vmatpush.bf16.msra.mxu2 %v8938_v13  ;;  %v5574_v13 = vadd.f32 %v11247_v8, %v5560_v19  ;;  %v4916_v23 = vadd.f32 %v11465_v59, %v4902_v27  ;;  %v10596_v15 = vld [vmem:[#allocation5 + $0x17cc] sm:$0xf]  ;;  %v5252_v17 = vadd.f32 %v11466_v10, %v5238_v53  ;;  %v9402_v8 = vor.u32 %v10532_v14, %v9399_v22  ;;  %v9511_v50 = vld [vmem:[#allocation5 + $0x16b8] sm:$0xf0] }
 0x309   :  { %6100 = vmatpush.bf16.msra.mxu3 %v9066_v46  ;;  %v9527_v46 = vld [vmem:[#allocation5 + $0x16d8] sm:$0xf0]  ;;  %v10496_v19 = vld [vmem:[#allocation5 + $0x14ac] sm:$0xf]  ;;  %v5586_v11 = vadd.f32 %v11241_v30, %v5572_v57  ;;  %v9658_v52 = vor.u32 %v10596_v15, %v9655_v0 }
 0x30a   :  { %6059 = vmatpush.bf16.msra.mxu0 %v8666_v5  ;;  %v5588_v4 = vadd.f32 %v11250_v35, %v5574_v13  ;;  %v9530_v21 = vor.u32 %v10564_v61, %v9527_v46  ;;  %v9255_v5 = vld [vmem:[#allocation5 + $0x14b8] sm:$0xf0]  ;;  %v10528_v9 = vld [vmem:[#allocation5 + $0x15ac] sm:$0xf]  ;;  %v11467_v35 = vld [vmem:[#allocation24_spill] sm:$0xff] }
 0x30b   :  { %6073 = vmatpush.bf16.msra.mxu1 %v8794_v24  ;;  %v9383_v24 = vld [vmem:[#allocation5 + $0x15b8] sm:$0xf0]  ;;  %v4930_v1 = vadd.f32 %v11467_v35, %v4916_v23  ;;  %v10592_v32 = vld [vmem:[#allocation5 + $0x17ac] sm:$0xf] }
 0x30c   :  { %6087 = vmatpush.bf16.msra.mxu2 %v8922_v2  ;;  %v10560_v2 = vld [vmem:[#allocation5 + $0x16ac] sm:$0xf]  ;;  %v9639_v27 = vld [vmem:[#allocation5 + $0x17b8] sm:$0xf0]  ;;  %v9386_v14 = vor.u32 %v10528_v9, %v9383_v24  ;;  %v11329_v59 = vpop.f32.mrf.mxu1 }
 0x30d   :  { %6101 = vmatpush.bf16.msra.mxu3 %v9050_v7  ;;  %6060 = vmatmul.bf16.vlgmr.msra.gmra.mxu0 %v10997_v51  ;;  %v11316_v7 = vpop.f32.mrf.mxu0  ;;  %v11468_v30 = vld [vmem:[#allocation47_spill] sm:$0xff]  ;;  %v5602_v51 = vadd.f32 %v11263_v3, %v5588_v4  ;;  %v11469_v49 = vld [vmem:[#allocation25_spill] sm:$0xff]  ;;  %v9514_v12 = vor.u32 %v10560_v2, %v9511_v50  ;;  %v9642_v3 = vor.u32 %v10592_v32, %v9639_v27 }
 0x30e   :  { %6108 = vmatpush.bf16.msrb.mxu0 %v9290_v25  ;;  %v11318_v25 = vpop.f32.mrf.mxu3  ;;  %6074 = vmatmul.bf16.vlgmr.msra.gmra.mxu1 %v11001_v56  ;;  %v4944_v38 = vadd.f32 %v11469_v49, %v4930_v1  ;;  %v10492_v53 = vld [vmem:[#allocation5 + $0x148c] sm:$0xf]  ;;  %v11470_v56 = vld [vmem:[#allocation48_spill] sm:$0xff]  ;;  %v9495_v46 = vld [vmem:[#allocation5 + $0x1698] sm:$0xf0] }
 0x30f   :  { %6122 = vmatpush.bf16.msrb.mxu1 %v9418_v16  ;;  %6088 = vmatmul.bf16.vlgmr.msra.gmra.mxu2 %v10999_v55  ;;  %v5266_v16 = vadd.f32 %v11468_v30, %v5252_v17  ;;  %v9239_v55 = vld [vmem:[#allocation5 + $0x1498] sm:$0xf0]  ;;  %v10524_v57 = vld [vmem:[#allocation5 + $0x158c] sm:$0xf]  ;;  %v5616_v22 = vadd.f32 %v11279_v28, %v5602_v51  ;;  %v11471_v17 = vld [vmem:[#allocation26_spill] sm:$0xff] }
 0x310   :  { %6136 = vmatpush.bf16.msrb.mxu2 %v9546_v29  ;;  %6102 = vmatmul.bf16.vlgmr.msra.gmra.mxu3 %v11003_v60  ;;  %v9258_v29 = vor.u32 %v10496_v19, %v9255_v5  ;;  %v9367_v60 = vld [vmem:[#allocation5 + $0x1598] sm:$0xf0]  ;;  %v10556_v61 = vld [vmem:[#allocation5 + $0x168c] sm:$0xf]  ;;  %v9242_v10 = vor.u32 %v10492_v53, %v9239_v55  ;;  %v4958_v4 = vadd.f32 %v11471_v17, %v4944_v38  ;;  %v11474_v30 = vld [vmem:[#allocation50_spill] sm:$0xff] }
 0x311   :  { %6150 = vmatpush.bf16.msrb.mxu3 %v9674_v45  ;;  %v5280_v13 = vadd.f32 %v11470_v56, %v5266_v16  ;;  %v5600_v45 = vadd.f32 %v11245_v39, %v5586_v11  ;;  %v10588_v23 = vld [vmem:[#allocation5 + $0x178c] sm:$0xf]  ;;  %v9623_v15 = vld [vmem:[#allocation5 + $0x1798] sm:$0xf0]  ;;  %v9370_v39 = vor.u32 %v10524_v57, %v9367_v60  ;;  %v9498_v28 = vor.u32 %v10556_v61, %v9495_v46 }
 0x312   :  { %6109 = vmatpush.bf16.msrb.mxu0 %v9274_v44  ;;  %v11333_v44 = vpop.f32.mrf.mxu2  ;;  %v10520_v19 = vld [vmem:[#allocation5 + $0x156c] sm:$0xf]  ;;  %v11472_v5 = vld [vmem:[#allocation49_spill] sm:$0xff]  ;;  %v5630_v11 = vadd.f32 %v11287_v37, %v5616_v22  ;;  %v11475_v22 = vld [vmem:[#allocation28_spill] sm:$0xff] }
 0x313   :  { %6123 = vmatpush.bf16.msrb.mxu1 %v9402_v8  ;;  %v5614_v0 = vadd.f32 %v11258_v20, %v5600_v45  ;;  %v10488_v8 = vld [vmem:[#allocation5 + $0x146c] sm:$0xf]  ;;  %v5294_v9 = vadd.f32 %v11472_v5, %v5280_v13  ;;  %v9351_v20 = vld [vmem:[#allocation5 + $0x1578] sm:$0xf0] }
 0x314   :  { %6137 = vmatpush.bf16.msrb.mxu2 %v9530_v21  ;;  %v9223_v21 = vld [vmem:[#allocation5 + $0x1478] sm:$0xf0]  ;;  %v10552_v24 = vld [vmem:[#allocation5 + $0x166c] sm:$0xf]  ;;  %v9354_v38 = vor.u32 %v10520_v19, %v9351_v20  ;;  %v11478_v19 = vld [vmem:[#allocation52_spill] sm:$0xff] }
 0x315   :  { %6151 = vmatpush.bf16.msrb.mxu3 %v9658_v52  ;;  %v9626_v52 = vor.u32 %v10588_v23, %v9623_v15  ;;  %v9479_v2 = vld [vmem:[#allocation5 + $0x1678] sm:$0xf0]  ;;  %v11473_v50 = vld [vmem:[#allocation27_spill] sm:$0xff]  ;;  %v11338_v1 = vpop.f32.mrf.mxu0  ;;  %v5308_v16 = vadd.f32 %v11474_v30, %v5294_v9  ;;  %v5628_v51 = vadd.f32 %v11270_v31, %v5614_v0  ;;  %v9226_v49 = vor.u32 %v10488_v8, %v9223_v21 }
 0x316   :  { %6110 = vmatpush.bf16.msrb.mxu0 %v9258_v29  ;;  %v4972_v35 = vadd.f32 %v11473_v50, %v4958_v4  ;;  %v10584_v32 = vld [vmem:[#allocation5 + $0x176c] sm:$0xf]  ;;  %v9607_v27 = vld [vmem:[#allocation5 + $0x1778] sm:$0xf0]  ;;  %v5644_v29 = vadd.f32 %v11292_v41, %v5630_v11  ;;  %v11343_v37 = vpop.f32.mrf.mxu3 }
 0x317   :  { %6124 = vmatpush.bf16.msrb.mxu1 %v9386_v14  ;;  %v9482_v14 = vor.u32 %v10552_v24, %v9479_v2  ;;  %v9207_v53 = vld [vmem:[#allocation5 + $0x1458] sm:$0xf0]  ;;  %v10516_v55 = vld [vmem:[#allocation5 + $0x154c] sm:$0xf]  ;;  %v5642_v57 = vadd.f32 %v11273_v43, %v5628_v51  ;;  %v9610_v56 = vor.u32 %v10584_v32, %v9607_v27  ;;  %v11479_v27 = vld [vmem:[#allocation30_spill] sm:$0xff] }
 0x318   :  { %6138 = vmatpush.bf16.msrb.mxu2 %v9514_v12  ;;  %v10484_v12 = vld [vmem:[#allocation5 + $0x144c] sm:$0xf]  ;;  %v9335_v13 = vld [vmem:[#allocation5 + $0x1558] sm:$0xf0]  ;;  %v4986_v41 = vadd.f32 %v11475_v22, %v4972_v35  ;;  %v5658_v15 = vadd.f32 %v11300_v6, %v5644_v29 }
 0x319   :  { %6152 = vmatpush.bf16.msrb.mxu3 %v9642_v3  ;;  %v10548_v45 = vld [vmem:[#allocation5 + $0x164c] sm:$0xf]  ;;  %v9463_v31 = vld [vmem:[#allocation5 + $0x1658] sm:$0xf0]  ;;  %v11347_v3 = vpop.f32.mrf.mxu1  ;;  %v9210_v0 = vor.u32 %v10484_v12, %v9207_v53  ;;  %v9338_v4 = vor.u32 %v10516_v55, %v9335_v13  ;;  %v5656_v9 = vadd.f32 %v11281_v47, %v5642_v57 }
 0x31a   :  { %6111 = vmatpush.bf16.msrb.mxu0 %v9242_v10  ;;  %v10580_v60 = vld [vmem:[#allocation5 + $0x174c] sm:$0xf]  ;;  %v9591_v61 = vld [vmem:[#allocation5 + $0x1758] sm:$0xf0]  ;;  %v11352_v43 = vpop.f32.mrf.mxu2  ;;  %v5672_v11 = vadd.f32 %v11316_v7, %v5658_v15 }
 0x31b   :  { %6125 = vmatpush.bf16.msrb.mxu1 %v9370_v39  ;;  %v11476_v46 = vld [vmem:[#allocation51_spill] sm:$0xff]  ;;  %v11477_v10 = vld [vmem:[#allocation29_spill] sm:$0xff]  ;;  %v9466_v39 = vor.u32 %v10548_v45, %v9463_v31  ;;  %v9594_v6 = vor.u32 %v10580_v60, %v9591_v61  ;;  %v5670_v35 = vadd.f32 %v11295_v58, %v5656_v9 }
 0x31c   :  { %6139 = vmatpush.bf16.msrb.mxu2 %v9498_v28  ;;  %v5322_v23 = vadd.f32 %v11476_v46, %v5308_v16  ;;  %v5000_v17 = vadd.f32 %v11477_v10, %v4986_v41  ;;  %v10480_v28 = vld [vmem:[#allocation5 + $0x142c] sm:$0xf]  ;;  %v9191_v8 = vld [vmem:[#allocation5 + $0x1438] sm:$0xf0]  ;;  %v5686_v53 = vadd.f32 %v11329_v59, %v5672_v11  ;;  %v11482_v41 = vld [vmem:[#allocation54_spill] sm:$0xff] }
 0x31d   :  { %6153 = vmatpush.bf16.msrb.mxu3 %v9626_v52  ;;  %v10512_v21 = vld [vmem:[#allocation5 + $0x152c] sm:$0xf]  ;;  %v9319_v52 = vld [vmem:[#allocation5 + $0x1538] sm:$0xf0]  ;;  %v9194_v32 = vor.u32 %v10480_v28, %v9191_v8  ;;  %v5727_v16 = vpop.f32.mrf.mxu0  ;;  %v5684_v61 = vadd.f32 %v11303_v62, %v5670_v35  ;;  %v10625_v35 = vld [vmem:[#allocation8 + $0xb0] sm:$0xff] }
 0x31e   :  { %6112 = vmatpush.bf16.msrb.mxu0 %v9226_v49  ;;  %v5336_v5 = vadd.f32 %v11478_v19, %v5322_v23  ;;  %v10544_v20 = vld [vmem:[#allocation5 + $0x162c] sm:$0xf]  ;;  %v9447_v24 = vld [vmem:[#allocation5 + $0x1638] sm:$0xf0]  ;;  %v5014_v30 = vadd.f32 %v11479_v27, %v5000_v17  ;;  %v11359_v51 = vpop.f32.mrf.mxu3  ;;  %v9322_v47 = vor.u32 %v10512_v21, %v9319_v52  ;;  %v5700_v46 = vadd.f32 %v11333_v44, %v5686_v53 }
 0x31f   :  { %6126 = vmatpush.bf16.msrb.mxu1 %v9354_v38  ;;  %v10576_v2 = vld [vmem:[#allocation5 + $0x172c] sm:$0xf]  ;;  %v9575_v50 = vld [vmem:[#allocation5 + $0x1738] sm:$0xf0]  ;;  %v9450_v7 = vor.u32 %v10544_v20, %v9447_v24  ;;  %v5698_v10 = vadd.f32 %v11309_v36, %v5684_v61  ;;  %v10609_v24 = vld [vmem:[#allocation8 + $0x30] sm:$0xff] }
 0x320   :  { %6140 = vmatpush.bf16.msrb.mxu2 %v9482_v14  ;;  %v10476_v29 = vld [vmem:[#allocation5 + $0x140c] sm:$0xf]  ;;  %v9175_v49 = vld [vmem:[#allocation5 + $0x1418] sm:$0xf0]  ;;  %v9578_v58 = vor.u32 %v10576_v2, %v9575_v50  ;;  %v5714_v44 = vadd.f32 %v11343_v37, %v5700_v46  ;;  %v10617_v50 = vld [vmem:[#allocation8 + $0x70] sm:$0xff] }
 0x321   :  { %6154 = vmatpush.bf16.msrb.mxu3 %v9610_v56  ;;  %v10508_v38 = vld [vmem:[#allocation5 + $0x150c] sm:$0xf]  ;;  %v11480_v14 = vld [vmem:[#allocation53_spill] sm:$0xff]  ;;  %v9178_v23 = vor.u32 %v10476_v29, %v9175_v49  ;;  %v5741_v15 = vpop.f32.mrf.mxu1  ;;  %v5712_v52 = vadd.f32 %v11318_v25, %v5698_v10 }
 0x322   :  { %6113 = vmatpush.bf16.msrb.mxu0 %v9210_v0  ;;  %v5350_v12 = vadd.f32 %v11480_v14, %v5336_v5  ;;  %v9303_v55 = vld [vmem:[#allocation5 + $0x1518] sm:$0xf0]  ;;  %v10540_v57 = vld [vmem:[#allocation5 + $0x160c] sm:$0xf]  ;;  %v5755_v8 = vpop.f32.mrf.mxu2  ;;  %v5728_v20 = vadd.f32 %v5727_v16, %v5714_v44 }
 0x323   :  { %6127 = vmatpush.bf16.msrb.mxu1 %v9338_v4  ;;  %v9431_v56 = vld [vmem:[#allocation5 + $0x1618] sm:$0xf0]  ;;  %v11481_v13 = vld [vmem:[#allocation31_spill] sm:$0xff]  ;;  %v9306_v59 = vor.u32 %v10508_v38, %v9303_v55  ;;  %v5726_v37 = vadd.f32 %v11338_v1, %v5712_v52 }
 0x324   :  { %6141 = vmatpush.bf16.msrb.mxu2 %v9466_v39  ;;  %v5028_v45 = vadd.f32 %v11481_v13, %v5014_v30  ;;  %v10572_v31 = vld [vmem:[#allocation5 + $0x170c] sm:$0xf]  ;;  %v9559_v22 = vld [vmem:[#allocation5 + $0x1718] sm:$0xf0]  ;;  %v5364_v60 = vadd.f32 %v11482_v41, %v5350_v12  ;;  %v9434_v0 = vor.u32 %v10540_v57, %v9431_v56  ;;  %v11483_v39 = vld [vmem:[#allocation32_spill] sm:$0xff]  ;;  %v5742_v30 = vadd.f32 %v5741_v15, %v5728_v20 }
 0x325   :  { %6155 = vmatpush.bf16.msrb.mxu3 %v9594_v6  ;;  %v9562_v17 = vor.u32 %v10572_v31, %v9559_v22  ;;  %v10610_v4 = vld [vmem:[#allocation8 + $0x38] sm:$0xff]  ;;  %v11484_v62 = vld [vmem:[#allocation55_spill] sm:$0xff]  ;;  %v5781_v6 = vpop.f32.mrf.mxu0  ;;  %v5740_v38 = vadd.f32 %v11347_v3, %v5726_v37  ;;  %v11496_v20 = vld [vmem:[#allocation60_spill] sm:$0xff] }
 0x326   :  { %6114 = vmatpush.bf16.msrb.mxu0 %v9194_v32  ;;  %v5042_v28 = vadd.f32 %v11483_v39, %v5028_v45  ;;  %v10618_v21 = vld [vmem:[#allocation8 + $0x78] sm:$0xff]  ;;  %v5378_v5 = vadd.f32 %v11484_v62, %v5364_v60  ;;  %v5769_v2 = vpop.f32.mrf.mxu3  ;;  %v10608_v16 = vld [vmem:[#allocation8 + $0x28] sm:$0xff]  ;;  %v5756_v14 = vadd.f32 %v5755_v8, %v5742_v30  ;;  %v10615_v55 = vld [vmem:[#allocation8 + $0x60] sm:$0xff] }
 0x327   :  { %6128 = vmatpush.bf16.msrb.mxu1 %v9322_v47  ;;  %v10626_v19 = vld [vmem:[#allocation8 + $0xb8] sm:$0xff]  ;;  %v11487_v47 = vld [vmem:[#allocation35_spill] sm:$0xff]  ;;  %v10605_v39 = vld [vmem:[#allocation8 + $0x10] sm:$0xff] }
 0x328   :  { %6142 = vmatpush.bf16.msrb.mxu2 %v9450_v7  ;;  %v11485_v9 = vld [vmem:[#allocation33_spill] sm:$0xff]  ;;  %v5392_v36 = vadd.f32 %v11178_v54, %v5378_v5  ;;  %v11486_v32 = vld [vmem:[#allocation34_spill] sm:$0xff]  ;;  %v10624_v1 = vld [vmem:[#allocation8 + $0xa8] sm:$0xff]  ;;  %v5770_v45 = vadd.f32 %v5769_v2, %v5756_v14 }
 0x329   :  { %6156 = vmatpush.bf16.msrb.mxu3 %v9578_v58  ;;  %v5056_v11 = vadd.f32 %v11485_v9, %v5042_v28  ;;  %v5795_v54 = vpop.f32.mrf.mxu1  ;;  %v10623_v57 = vld [vmem:[#allocation8 + $0xa0] sm:$0xff]  ;;  %v11490_v56 = vld [vmem:[#allocation57_spill] sm:$0xff]  ;;  %v10620_v52 = vld [vmem:[#allocation8 + $0x88] sm:$0xff] }
 0x32a   :  { %6115 = vmatpush.bf16.msrb.mxu0 %v9178_v23  ;;  %v5406_v25 = vadd.f32 %v11180_v42, %v5392_v36  ;;  %v5809_v29 = vpop.f32.mrf.mxu2  ;;  %v11489_v42 = vld [vmem:[#allocation36_spill] sm:$0xff]  ;;  %v11491_v31 = vld [vmem:[#allocation38_spill] sm:$0xff]  ;;  %v11497_v30 = vld [vmem:[#allocation37_spill] sm:$0xff] }
 0x32b   :  { %6129 = vmatpush.bf16.msrb.mxu1 %v9306_v59  ;;  %v5070_v27 = vadd.f32 %v11486_v32, %v5056_v11  ;;  %v10606_v60 = vld [vmem:[#allocation8 + $0x18] sm:$0xff]  ;;  %v11492_v59 = vld [vmem:[#allocation39_spill] sm:$0xff]  ;;  %v10621_v8 = vld [vmem:[#allocation8 + $0x90] sm:$0xff] }
 0x32c   :  { %6143 = vmatpush.bf16.msrb.mxu2 %v9434_v0  ;;  %v10614_v46 = vld [vmem:[#allocation8 + $0x58] sm:$0xff]  ;;  %v10604_v11 = vld [vmem:[#allocation8 + $0x8] sm:$0xff]  ;;  %v10611_v32 = vld [vmem:[#allocation8 + $0x40] sm:$0xff] }
 0x32d   :  { %6157 = vmatpush.bf16.msrb.mxu3 %v9562_v17  ;;  %6116 = vmatmul.bf16.vlgmr.msrb.gmra.mxu0 %v11018_v26  ;;  %v5084_v7 = vadd.f32 %v11487_v47, %v5070_v27  ;;  %v10616_v26 = vld [vmem:[#allocation8 + $0x68] sm:$0xff]  ;;  %v5783_v53 = vpop.f32.mrf.mxu0  ;;  %v10622_v23 = vld [vmem:[#allocation8 + $0x98] sm:$0xff]  ;;  %v10619_v27 = vld [vmem:[#allocation8 + $0x80] sm:$0xff] }
 0x32e   :  { %6436 = vmatpush.bf16.msra.mxu0 %v10610_v4  ;;  %6130 = vmatmul.bf16.vlgmr.msrb.gmra.mxu1 %v11022_v34  ;;  %v11488_v34 = vld [vmem:[#allocation56_spill] sm:$0xff]  ;;  %v5823_v58 = vpop.f32.mrf.mxu3  ;;  %v11498_v47 = vld [vmem:[#allocation58_spill] sm:$0xff] }
 0x32f   :  { %6450 = vmatpush.bf16.msra.mxu1 %v10618_v21  ;;  %6144 = vmatmul.bf16.vlgmr.msrb.gmra.mxu2 %v11020_v33  ;;  %v5420_v49 = vadd.f32 %v11488_v34, %v5406_v25  ;;  %v5754_v33 = vadd.f32 %v11352_v43, %v5740_v38  ;;  %v5098_v12 = vadd.f32 %v11489_v42, %v5084_v7  ;;  %v11494_v21 = vld [vmem:[#allocation59_spill] sm:$0xff]  ;;  %v6165_v7 = vmax.f32 %v11498_v47, 0.0 }
 0x330   :  { %6464 = vmatpush.bf16.msra.mxu2 %v10626_v19  ;;  %6158 = vmatmul.bf16.vlgmr.msrb.gmra.mxu3 %v11026_v48  ;;  %v10607_v48 = vld [vmem:[#allocation8 + $0x20] sm:$0xff]  ;;  %v5784_v43 = vadd.f32 %v5783_v53, %v5770_v45 }
 0x331   :  { %v5434_v13 = vadd.f32 %v11490_v56, %v5420_v49  ;;  %v5112_v22 = vadd.f32 %v11491_v31, %v5098_v12  ;;  %v5768_v41 = vadd.f32 %v11359_v51, %v5754_v33  ;;  %v5797_v61 = vpop.f32.mrf.mxu1  ;;  %v10613_v51 = vld [vmem:[#allocation8 + $0x50] sm:$0xff] }
 0x332   :  { %6437 = vmatpush.bf16.msra.mxu0 %v10609_v24  ;;  %v5811_v10 = vpop.f32.mrf.mxu2  ;;  %v5798_v4 = vadd.f32 %v5797_v61, %v5784_v43 }
 0x333   :  { %6451 = vmatpush.bf16.msra.mxu1 %v10617_v50  ;;  %v5448_v3 = vadd.f32 %v11209_v18, %v5434_v13  ;;  %v5782_v15 = vadd.f32 %v5781_v6, %v5768_v41  ;;  %v5126_v0 = vadd.f32 %v11492_v59, %v5112_v22  ;;  %v11493_v18 = vld [vmem:[#allocation40_spill] sm:$0xff]  ;;  %v11495_v6 = vld [vmem:[#allocation41_spill] sm:$0xff]  ;;  %v975_v13 = vperm.slane %v11254_v40, 3 }
 0x334   :  { %6465 = vmatpush.bf16.msra.mxu2 %v10625_v35  ;;  %v5812_v5 = vadd.f32 %v5811_v10, %v5798_v4  ;;  %v10603_v35 = vld [vmem:[#allocation8] sm:$0xff]  ;;  %v10633_v40 = vld [vmem:[#allocation8 + $0xf0] sm:$0xff] }
 0x335   :  { %v5462_v17 = vadd.f32 %v11211_v63, %v5448_v3  ;;  %v5140_v28 = vadd.f32 %v11493_v18, %v5126_v0  ;;  %v5796_v62 = vadd.f32 %v5795_v54, %v5782_v15  ;;  %v10612_v63 = vld [vmem:[#allocation8 + $0x48] sm:$0xff]  ;;  %v5837_v49 = vpop.f32.mrf.mxu0  ;;  %v10634_v18 = vld [vmem:[#allocation8 + $0xf8] sm:$0xff] }
 0x336   :  { %6438 = vmatpush.bf16.msra.mxu0 %v10608_v16  ;;  %v5825_v44 = vpop.f32.mrf.mxu3  ;;  %v6164_v16 = vmax.f32 %v11497_v30, 0.0  ;;  %v5838_v31 = vadd.f32 %v5837_v49, %v975_v13  ;;  %6478 = vmatpush.bf16.msra.mxu3 %v10634_v18  ;;  %v10628_v49 = vld [vmem:[#allocation8 + $0xc8] sm:$0xff] }
 0x337   :  { %6452 = vmatpush.bf16.msra.mxu1 %v10616_v26  ;;  %v5476_v19 = vadd.f32 %v11494_v21, %v5462_v17  ;;  %v5810_v9 = vadd.f32 %v5809_v29, %v5796_v62  ;;  %v5154_v36 = vadd.f32 %v11495_v6, %v5140_v28  ;;  %v5826_v2 = vadd.f32 %v5825_v44, %v5812_v5  ;;  %v10632_v6 = vld [vmem:[#allocation8 + $0xe8] sm:$0xff] }
 0x338   :  { %6466 = vmatpush.bf16.msra.mxu2 %v10624_v1 }
 0x339   :  { %v5490_v24 = vadd.f32 %v11496_v20, %v5476_v19  ;;  %v5824_v50 = vadd.f32 %v5823_v58, %v5810_v9  ;;  %v6168_v37 = vmax.f32 %v5154_v36, 0.0  ;;  %v6170_v25 = vmax.f32 %v5826_v2, 0.0  ;;  %v5851_v38 = vpop.f32.mrf.mxu1  ;;  %v10631_v2 = vld [vmem:[#allocation8 + $0xe0] sm:$0xff] }
 0x33a   :  { %6439 = vmatpush.bf16.msra.mxu0 %v10607_v48  ;;  %v5865_v14 = vpop.f32.mrf.mxu2  ;;  %v5852_v3 = vadd.f32 %v5851_v38, %v5838_v31  ;;  %6479 = vmatpush.bf16.msra.mxu3 %v10633_v40 }
 0x33b   :  { %6453 = vmatpush.bf16.msra.mxu1 %v10615_v55  ;;  %v6169_v54 = vmax.f32 %v5490_v24, 0.0  ;;  %v6166_v29 = vmax.f32 %v5824_v50, 0.0  ;;  %v6172_v26 = vpack.c.bf16 %v6168_v37, %v6164_v16  ;;  %v10629_v16 = vld [vmem:[#allocation8 + $0xd0] sm:$0xff] }
 0x33c   :  { %6467 = vmatpush.bf16.msra.mxu2 %v10623_v57 }
 0x33d   :  { %v6173_v1 = vpack.c.bf16 %v6169_v54, %v6165_v7  ;;  %v6174_v34 = vpack.c.bf16 %v6170_v25, %v6166_v29  ;;  %v5839_v48 = vpop.f32.mrf.mxu0 }
 0x33e   :  { %6440 = vmatpush.bf16.msra.mxu0 %v10606_v60  ;;  %v5879_v33 = vpop.f32.mrf.mxu3  ;;  %v5840_v60 = vadd.f32 %v5839_v48, %v975_v13  ;;  %6480 = vmatpush.bf16.msra.mxu3 %v10632_v6 }
 0x33f   :  { %6454 = vmatpush.bf16.msra.mxu1 %v10614_v46  ;;  %v5866_v46 = vadd.f32 %v5865_v14, %v5852_v3 }
 0x340   :  { %6468 = vmatpush.bf16.msra.mxu2 %v10622_v23 }
 0x341   :  { %v5853_v42 = vpop.f32.mrf.mxu1  ;;  %v5880_v59 = vadd.f32 %v5879_v33, %v5866_v46 }
 0x342   :  { %6441 = vmatpush.bf16.msra.mxu0 %v10605_v39  ;;  %v5867_v12 = vpop.f32.mrf.mxu2  ;;  %v5854_v15 = vadd.f32 %v5853_v42, %v5840_v60  ;;  %6481 = vmatpush.bf16.msra.mxu3 %v10631_v2  ;;  %v10627_v42 = vld [vmem:[#allocation8 + $0xc0] sm:$0xff] }
 0x343   :  { %6455 = vmatpush.bf16.msra.mxu1 %v10613_v51  ;;  %v10638_v2 = vld [vmem:[#allocation11 + $0x18] sm:$0xff] }
 0x344   :  { %6469 = vmatpush.bf16.msra.mxu2 %v10621_v8  ;;  %v5868_v17 = vadd.f32 %v5867_v12, %v5854_v15 }
 0x345   :  { %v5893_v58 = vpop.f32.mrf.mxu0 }
 0x346   :  { %6442 = vmatpush.bf16.msra.mxu0 %v10604_v11  ;;  %v5881_v53 = vpop.f32.mrf.mxu3  ;;  %v5894_v4 = vadd.f32 %v5893_v58, %v5880_v59 }
 0x347   :  { %6456 = vmatpush.bf16.msra.mxu1 %v10612_v63  ;;  %v5882_v28 = vadd.f32 %v5881_v53, %v5868_v17 }
 0x348   :  { %6470 = vmatpush.bf16.msra.mxu2 %v10620_v52 }
 0x349   :  { %v5907_v55 = vpop.f32.mrf.mxu1 }
 0x34a   :  { %6443 = vmatpush.bf16.msra.mxu0 %v10603_v35  ;;  %v5921_v57 = vpop.f32.mrf.mxu2  ;;  %v5908_v8 = vadd.f32 %v5907_v55, %v5894_v4 }
 0x34b   :  { %6457 = vmatpush.bf16.msra.mxu1 %v10611_v32 }
 0x34c   :  { %6471 = vmatpush.bf16.msra.mxu2 %v10619_v27  ;;  %v5922_v5 = vadd.f32 %v5921_v57, %v5908_v8  ;;  %v10630_v27 = vld [vmem:[#allocation8 + $0xd8] sm:$0xff] }
 0x34d   :  { %6444 = vmatmul.bf16.vlgmr.msra.gmra.mxu0 %v6172_v26  ;;  %v5895_v45 = vpop.f32.mrf.mxu0  ;;  %6482 = vmatpush.bf16.msra.mxu3 %v10630_v27 }
 0x34e   :  { %6458 = vmatmul.bf16.vlgmr.msra.gmra.mxu1 %v6173_v1  ;;  %v5935_v56 = vpop.f32.mrf.mxu3  ;;  %v5896_v21 = vadd.f32 %v5895_v45, %v5882_v28 }
 0x34f   :  { %6472 = vmatmul.bf16.vlgmr.msra.gmra.mxu2 %v6174_v34  ;;  %v5936_v36 = vadd.f32 %v5935_v56, %v5922_v5  ;;  %v10641_v5 = vld [vmem:[#allocation11 + $0x30] sm:$0xff] }
 0x351   :  { %v5909_v22 = vpop.f32.mrf.mxu1  ;;  %6483 = vmatpush.bf16.msra.mxu3 %v10629_v16 }
 0x352   :  { %v5923_v41 = vpop.f32.mrf.mxu2  ;;  %v5910_v9 = vadd.f32 %v5909_v22, %v5896_v21  ;;  %v10642_v21 = vld [vmem:[#allocation11 + $0x38] sm:$0xff] }
 0x353   :  { %6563 = vmatpush.bf16.msrb.mxu0 %v10642_v21 }
 0x354   :  { %v5924_v63 = vadd.f32 %v5923_v41, %v5910_v9 }
 0x355   :  { %v5949_v61 = vpop.f32.mrf.mxu0  ;;  %6484 = vmatpush.bf16.msra.mxu3 %v10628_v49 }
 0x356   :  { %v5937_v43 = vpop.f32.mrf.mxu3  ;;  %v5950_v52 = vadd.f32 %v5949_v61, %v5936_v36  ;;  %v10640_v36 = vld [vmem:[#allocation11 + $0x28] sm:$0xff] }
 0x357   :  { %v5938_v50 = vadd.f32 %v5937_v43, %v5924_v63  ;;  %6564 = vmatpush.bf16.msrb.mxu0 %v10641_v5 }
 0x359   :  { %v5963_v23 = vpop.f32.mrf.mxu1  ;;  %6485 = vmatpush.bf16.msra.mxu3 %v10627_v42 }
 0x35a   :  { %v5977_v0 = vpop.f32.mrf.mxu2  ;;  %v5964_v35 = vadd.f32 %v5963_v23, %v5950_v52 }
 0x35b   :  { %6565 = vmatpush.bf16.msrb.mxu0 %v10640_v36 }
 0x35c   :  { %v5978_v54 = vadd.f32 %v5977_v0, %v5964_v35  ;;  %v10636_v35 = vld [vmem:[#allocation11 + $0x8] sm:$0xff] }
 0x35d   :  { %v5951_v39 = vpop.f32.mrf.mxu0 }
 0x35e   :  { %v5991_v10 = vpop.f32.mrf.mxu3  ;;  %v5952_v37 = vadd.f32 %v5951_v39, %v5938_v50  ;;  %v10637_v50 = vld [vmem:[#allocation11 + $0x10] sm:$0xff] }
 0x35f   :  { %v5992_v47 = vadd.f32 %v5991_v10, %v5978_v54 }
 0x361   :  { %v5965_v51 = vpop.f32.mrf.mxu1 }
 0x362   :  { %v5979_v19 = vpop.f32.mrf.mxu2  ;;  %v5966_v30 = vadd.f32 %v5965_v51, %v5952_v37  ;;  %v10635_v37 = vld [vmem:[#allocation11] sm:$0xff] }
 0x364   :  { %v5980_v7 = vadd.f32 %v5979_v19, %v5966_v30 }
 0x366   :  { %v5993_v62 = vpop.f32.mrf.mxu3 }
 0x367   :  { %v5994_v38 = vadd.f32 %v5993_v62, %v5980_v7 }
 0x36a   :  { %v6005_v44 = vpop.f32.mrf.mxu0 }
 0x36b   :  { %v6019_v11 = vpop.f32.mrf.mxu1  ;;  %v6006_v1 = vadd.f32 %v6005_v44, %v5992_v47 }
 0x36d   :  { %v6020_v33 = vadd.f32 %v6019_v11, %v6006_v1 }
 0x372   :  { %v6033_v20 = vpop.f32.mrf.mxu2  ;;  %v6007_v32 = vpop.f32.mrf.mxu0 }
 0x373   :  { %v6047_v24 = vpop.f32.mrf.mxu3  ;;  %v6021_v25 = vpop.f32.mrf.mxu1  ;;  %v6008_v48 = vadd.f32 %v6007_v32, %v5994_v38  ;;  %v6034_v12 = vadd.f32 %v6033_v20, %v6020_v33 }
 0x375   :  { %v6022_v55 = vadd.f32 %v6021_v25, %v6008_v48  ;;  %v6048_v57 = vadd.f32 %v6047_v24, %v6034_v12  ;;  %v10639_v24 = vld [vmem:[#allocation11 + $0x20] sm:$0xff]  ;;  %v10662_v25 = vld [vmem:[#allocation10] ss:$0 sm:$0xff] }
 0x376   :  { %6566 = vmatpush.bf16.msrb.mxu0 %v10639_v24 }
 0x37a   :  { %v6035_v29 = vpop.f32.mrf.mxu2  ;;  %6567 = vmatpush.bf16.msrb.mxu0 %v10638_v2 }
 0x37b   :  { %v6049_v26 = vpop.f32.mrf.mxu3  ;;  %v6036_v56 = vadd.f32 %v6035_v29, %v6022_v55  ;;  %v10663_v55 = vld [vmem:[#allocation13] ss:$0 sm:$0xff] }
 0x37d   :  { %v6050_v22 = vadd.f32 %v6049_v26, %v6036_v56 }
 0x37e   :  { %6568 = vmatpush.bf16.msrb.mxu0 %v10637_v50 }
 0x382   :  { %6569 = vmatpush.bf16.msrb.mxu0 %v10636_v35 }
 0x386   :  { %6570 = vmatpush.bf16.msrb.mxu0 %v10635_v37 }
 0x38a   :  { %v6061_v34 = vpop.f32.mrf.mxu0 }
 0x38b   :  { %v6075_v14 = vpop.f32.mrf.mxu1  ;;  %v6062_v45 = vadd.f32 %v6061_v34, %v6048_v57 }
 0x38d   :  { %v6076_v3 = vadd.f32 %v6075_v14, %v6062_v45 }
 0x392   :  { %v6089_v53 = vpop.f32.mrf.mxu2  ;;  %v6063_v13 = vpop.f32.mrf.mxu0 }
 0x393   :  { %v6103_v58 = vpop.f32.mrf.mxu3  ;;  %v6077_v31 = vpop.f32.mrf.mxu1  ;;  %v6064_v41 = vadd.f32 %v6063_v13, %v6050_v22  ;;  %v6090_v61 = vadd.f32 %v6089_v53, %v6076_v3 }
 0x395   :  { %v6078_v23 = vadd.f32 %v6077_v31, %v6064_v41  ;;  %v6104_v59 = vadd.f32 %v6103_v58, %v6090_v61 }
 0x39a   :  { %v6091_v43 = vpop.f32.mrf.mxu2 }
 0x39b   :  { %v6105_v60 = vpop.f32.mrf.mxu3  ;;  %v6092_v0 = vadd.f32 %v6091_v43, %v6078_v23 }
 0x39d   :  { %v6106_v39 = vadd.f32 %v6105_v60, %v6092_v0 }
 0x3aa   :  { %v6117_v46 = vpop.f32.mrf.mxu0 }
 0x3ab   :  { %v6131_v15 = vpop.f32.mrf.mxu1  ;;  %v6118_v10 = vadd.f32 %v6117_v46, %v6104_v59 }
 0x3ad   :  { %v6132_v28 = vadd.f32 %v6131_v15, %v6118_v10 }
 0x3b2   :  { %v6145_v17 = vpop.f32.mrf.mxu2  ;;  %v6119_v18 = vpop.f32.mrf.mxu0 }
 0x3b3   :  { %v6159_v4 = vpop.f32.mrf.mxu3  ;;  %v6120_v40 = vadd.f32 %v6119_v18, %v6106_v39  ;;  %v6146_v51 = vadd.f32 %v6145_v17, %v6132_v28  ;;  %v6133_v8 = vpop.f32.mrf.mxu1 }
 0x3b5   :  { %v6134_v19 = vadd.f32 %v6133_v8, %v6120_v40  ;;  %v6160_v44 = vadd.f32 %v6159_v4, %v6146_v51 }
 0x3b7   :  { %v6167_v63 = vmax.f32 %v6160_v44, 0.0 }
 0x3ba   :  { %v6147_v62 = vpop.f32.mrf.mxu2 }
 0x3bb   :  { %v6148_v9 = vadd.f32 %v6147_v62, %v6134_v19  ;;  %v6161_v11 = vpop.f32.mrf.mxu3 }
 0x3bd   :  { %v6162_v6 = vadd.f32 %v6161_v11, %v6148_v9 }
 0x3bf   :  { %v6171_v52 = vmax.f32 %v6162_v6, 0.0 }
 0x3c1   :  { %v6175_v20 = vpack.c.bf16 %v6171_v52, %v6167_v63 }
 0x3c3   :  { %6486 = vmatmul.bf16.vlgmr.msra.gmra.mxu3 %v6175_v20 }
 0x3ca   :  { %v6445_v32 = vpop.f32.mrf.mxu0 }
 0x3cb   :  { %v6459_v27 = vpop.f32.mrf.mxu1  ;;  %v6446_v16 = vadd.f32 %v10662_v25, %v6445_v32 }
 0x3cd   :  { %v6460_v29 = vadd.f32 %v6459_v27, %v6446_v16 }
 0x3d2   :  { %v6473_v54 = vpop.f32.mrf.mxu2  ;;  %v6447_v30 = vpop.f32.mrf.mxu0 }
 0x3d3   :  { %v6448_v7 = vadd.f32 %v10662_v25, %v6447_v30  ;;  %v6461_v26 = vpop.f32.mrf.mxu1  ;;  %v6474_v34 = vadd.f32 %v6473_v54, %v6460_v29 }
 0x3d5   :  { %v6462_v49 = vadd.f32 %v6461_v26, %v6448_v7 }
 0x3da   :  { %v6475_v1 = vpop.f32.mrf.mxu2 }
 0x3db   :  { %v6476_v38 = vadd.f32 %v6475_v1, %v6462_v49 }
 0x446   :  { %v6487_v47 = vpop.f32.mrf.mxu3 }
 0x447   :  { %v6488_v14 = vadd.f32 %v6487_v47, %v6474_v34 }
 0x449   :  { %v6492_v42 = vmax.f32 %v6488_v14, 0.0 }
 0x44e   :  { %v6489_v33 = vpop.f32.mrf.mxu3 }
 0x44f   :  { %v6490_v48 = vadd.f32 %v6489_v33, %v6476_v38 }
 0x451   :  { %v6493_v12 = vmax.f32 %v6490_v48, 0.0 }
 0x453   :  { %v6494_v53 = vpack.c.bf16 %v6493_v12, %v6492_v42 }
 0x455   :  { %6571 = vmatmul.bf16.vlgmr.msrb.gmra.mxu0 %v6494_v53 }
 0x4d2   :  { %v6572_v58 = vpop.f32.mrf.mxu0 }
 0x4d3   :  { %v6573_v56 = vadd.f32 %v10663_v55, %v6572_v58 }
 0x4da   :  { %v6574_v57 = vpop.f32.mrf.mxu0 }
 0x4db   :  { %v6575_v13 = vadd.f32 %v10663_v55, %v6574_v57 }
 0x4dd   :  { %v10646_v45 = vpack.c.bf16 %v6575_v13, %v6573_v56 }
 0x4df   :  { %10647 = vst [vmem:[#allocation14] sm:$0xff] %v10646_v45  }
 0x4e0   :  { %6593 = dma.vmem_to_hbm [thread:$0]  %s6586_s6, 128, %s6588_s17, [#allocation4], %s10872_s13, %s10872_s13, %s10873_s14  }
 0x4e1   :  { %10866 = dma.done.wait [#allocation4], 128  }
 0x4e2   :  { %10867 = vsyncadd [#allocation4], 4294967168 }
 0x4e3   :  { %6598 = vsyncpa [#allocation3], 1 }
 0x4e4   :  { %6599 = vsyncpa [#allocation6], 1 }
 0x4e5   :  { %6600 = vsyncpa [#allocation9], 1 }
 0x4e6   :  { %6601 = vsyncpa [#allocation12], 1 }
 0x4e7   :  { %6602 = vsyncpa [#allocation4], 1 }

</bundles_post_ra>
